<compile_context>
chip_gen: v5e
topology: v5e:2x2
jax: 0.10.0
libtpu: 0.0.40
codegen_flags: <defaults>
</compile_context>

<pallas_src>
import functools
import math

import jax
import jax.numpy as jnp
from jax.experimental import pallas as pl
from jax.experimental.pallas import tpu as pltpu

NU = 0.1          # UpperDiagonalThresholdedLogTransform(0.1)
BN_EPS = 1e-5
C_CH = 3          # 1 + 2 * n_neighbor_directions
K8 = 8            # stage_1 conv_2 output channels (hard-coded in the module)


def _round_up(x, m):
    return (x + m - 1) // m * m


def _block_diag(blocks):
    r, c = blocks[0].shape
    n = len(blocks)
    out = jnp.zeros((n * r, n * c), blocks[0].dtype)
    for i, b in enumerate(blocks):
        out = out.at[i * r:(i + 1) * r, i * c:(i + 1) * c].set(b)
    return out


# ---------------------------------------------------------------------------
# Fused kernel: transform -> SLayerPHT -> stage_1 (+max) -> stage_2 -> head.
# Grid is a 1-D parallel tiling of the (padded) batch axis; all weights are
# resident in VMEM, conv scalars in SMEM.
# ---------------------------------------------------------------------------
def _fused_kernel(conv_w_ref,                                   # SMEM (V*8*3,)
                  births_ref, deaths_ref, mask_ref,             # (V, TB, P)
                  cx_ref, cy_ref, sx2_ref, sy2_ref,             # (VC, 1, E_PAD)
                  s2_w1_ref, s2_b1_ref, s2_w2_ref, s2_b2_ref,   # stage_2 blk-diag
                  h_w1_ref, h_b1_ref, h_w2_ref, h_b2_ref,       # head (padded)
                  o_ref):                                       # (TB, OUT_PAD)
    V, TB, P = births_ref.shape
    VC = cx_ref.shape[0]            # 1 -> SLayer params shared across views
    inv_sqrt2 = jnp.float32(1.0 / math.sqrt(2.0))

    births = births_ref[...]
    deaths = deaths_ref[...]
    mask = mask_ref[...]

    # UpperDiagonalThresholdedLogTransform: rotate (b,d) -> (x,y), log-threshold y.
    x_all = (births + deaths) * inv_sqrt2
    y_all = (deaths - births) * inv_sqrt2
    y_all = jnp.where(y_all <= NU,
                      jnp.log(jnp.maximum(y_all, 1e-30) / NU) * NU + NU,
                      y_all)

    # SLayer planes.  planes[v][c] = SLayer_v applied to data view u=(v+c-1)%V.
    # Data-view u is the OUTER loop: the (TB,P,1) relayout of x/y/mask happens
    # once per u, and with shared centers (VC == 1) the exp(-q) plane itself is
    # computed only once per u (3 exp passes total instead of 9).
    planes = [[None] * C_CH for _ in range(V)]
    for u in range(V):
        x_u = x_all[u][:, :, None]                              # (TB, P, 1)
        y_u = y_all[u][:, :, None]
        m_u = mask[u][:, :, None]
        if VC == 1:
            dx = x_u - cx_ref[0]                                # (TB, P, E_PAD)
            dy = y_u - cy_ref[0]
            q = dx * dx * sx2_ref[0] + dy * dy * sy2_ref[0]
            plane_u = jnp.sum(jnp.exp(-q) * m_u, axis=1)        # (TB, E_PAD)
            for c in range(C_CH):
                planes[(u - c + 1) % V][c] = plane_u
        else:
            for c in range(C_CH):
                v = (u - c + 1) % V                             # consumer view
                dx = x_u - cx_ref[v]
                dy = y_u - cy_ref[v]
                q = dx * dx * sx2_ref[v] + dy * dy * sy2_ref[v]
                planes[v][c] = jnp.sum(jnp.exp(-q) * m_u, axis=1)

    # stage_1: folded 1x1 convs as SMEM-scalar VPU FMAs, max over 8 channels.
    mx_list = []
    for v in range(V):
        p0, p1, p2 = planes[v]
        mx = None
        for k in range(K8):
            base = (v * K8 + k) * C_CH
            a = (p0 * conv_w_ref[base]
                 + p1 * conv_w_ref[base + 1]
                 + p2 * conv_w_ref[base + 2])
            mx = a if mx is None else jnp.maximum(mx, a)        # (TB, E_PAD)
        mx_list.append(mx)
    mx_all = jnp.concatenate(mx_list, axis=-1)                  # (TB, V*E_PAD)

    # stage_2, block-diagonal across views (BN folded; padded-E rows are zero).
    h = jnp.dot(mx_all, s2_w1_ref[...],
                preferred_element_type=jnp.float32) + s2_b1_ref[...]
    h = jnp.dot(h, s2_w2_ref[...],
                preferred_element_type=jnp.float32) + s2_b2_ref[...]
    h = jnp.maximum(h, 0.0)                                     # (TB, V*S2)

    # head: cat(x,1)+Linear(75,500)+BN as ONE (TB,75)@(75,512) dot; then the
    # Linear(500,200) padded to (512,256) -- padded rows/cols carry exact zeros.
    h1 = jnp.dot(h, h_w1_ref[...],
                 preferred_element_type=jnp.float32) + h_b1_ref[...]
    o_ref[...] = jnp.dot(h1, h_w2_ref[...],
                         preferred_element_type=jnp.float32) + h_b2_ref[...]


# ---------------------------------------------------------------------------
# Parameter init (deterministic surrogate for the shapes in __init__) with
# eval-mode BN folding, conv1*conv2 folding, E/H1/OUT padding and block-diag
# stage_2 weights.  per_view_slayer=False matches the module right after
# __init__ (all views share the SLayer center/sharpness values).
# ---------------------------------------------------------------------------
def init_params(key, V, E, E_PAD, F, C_IN, S2, H1, H1_PAD, OUT, OUT_PAD,
                per_view_slayer=False):
    ks = jax.random.split(key, 13)
    pad_e = E_PAD - E

    # SLayer centers: pers_dgm_center_init surrogate, then the transform.
    u01 = jax.random.uniform(ks[0], (E, 2), jnp.float32)
    c_birth = u01[:, 0] * 0.6
    c_death = c_birth + u01[:, 1] * 0.6 + 0.02
    cx = (c_birth + c_death) / jnp.float32(math.sqrt(2.0))
    cy = (c_death - c_birth) / jnp.float32(math.sqrt(2.0))
    cy = jnp.where(cy <= NU, jnp.log(jnp.maximum(cy, 1e-30) / NU) * NU + NU, cy)
    cx = jnp.pad(cx, (0, pad_e))
    cy = jnp.pad(cy, (0, pad_e))
    if per_view_slayer:
        # Trained-weights shape: every view owns its own SLayer parameters.
        sl_cx = cx[None, None, :] + 0.05 * jax.random.normal(ks[11], (V, 1, E_PAD), jnp.float32)
        sl_cy = cy[None, None, :] + 0.05 * jax.random.normal(ks[12], (V, 1, E_PAD), jnp.float32)
        sl_sx2 = jnp.full((V, 1, E_PAD), 16.0, jnp.float32)
        sl_sy2 = jnp.full((V, 1, E_PAD), 16.0, jnp.float32)
    else:
        # Right after __init__ every view holds an identical copy -> pass one.
        sl_cx = cx[None, None, :]
        sl_cy = cy[None, None, :]
        sl_sx2 = jnp.full((1, 1, E_PAD), 16.0, jnp.float32)    # sharpness 4 -> 4^2
        sl_sy2 = jnp.full((1, 1, E_PAD), 16.0, jnp.float32)

    # stage_1: conv_2(conv_1(x)), no nonlinearity between -> fold to (8, C).
    conv1_w = jax.random.normal(ks[1], (V, F, C_IN), jnp.float32) * 0.5
    conv2_w = jax.random.normal(ks[2], (V, K8, F), jnp.float32) * 0.3
    conv_w = jnp.einsum('vkf,vfc->vkc', conv2_w, conv1_w)        # (V, 8, C)

    # stage_2: fold eval BatchNorm1d(25) into linear_1, zero-pad E rows,
    # then block-diagonalize both linears across views.
    s2_w1 = jax.random.normal(ks[3], (V, E, S2), jnp.float32) / math.sqrt(E)
    s2_b1 = jax.random.normal(ks[4], (V, 1, S2), jnp.float32) * 0.05
    bn_scale = jnp.float32(1.0 / math.sqrt(1.0 + BN_EPS))        # gamma=1, var=1, mean=0
    s2_w1f = jnp.pad(s2_w1 * bn_scale, ((0, 0), (0, pad_e), (0, 0)))  # (V, E_PAD, S2)
    s2_w1_bd = _block_diag([s2_w1f[v] for v in range(V)])        # (V*E_PAD, V*S2)
    s2_b1_cat = (s2_b1 * bn_scale).reshape(1, V * S2)
    s2_w2 = jax.random.normal(ks[5], (V, S2, S2), jnp.float32) / math.sqrt(S2)
    s2_w2_bd = _block_diag([s2_w2[v] for v in range(V)])         # (V*S2, V*S2)
    s2_b2_cat = (jax.random.normal(ks[6], (V, 1, S2), jnp.float32) * 0.05).reshape(1, V * S2)

    # head: fold BatchNorm1d(500) into linear_1; pad H1 500->512 and
    # OUT 200->256 with zeros (the pads stay exactly zero end-to-end).
    h_w1 = jax.random.normal(ks[7], (V * S2, H1), jnp.float32) / math.sqrt(V * S2)
    h_b1 = jax.random.normal(ks[8], (1, H1), jnp.float32) * 0.05
    h_w1f = jnp.pad(h_w1 * bn_scale, ((0, 0), (0, H1_PAD - H1)))
    h_b1f = jnp.pad(h_b1 * bn_scale, ((0, 0), (0, H1_PAD - H1)))
    h_w2 = jax.random.normal(ks[9], (H1, OUT), jnp.float32) / math.sqrt(H1)
    h_w2p = jnp.pad(h_w2, ((0, H1_PAD - H1), (0, OUT_PAD - OUT)))
    h_b2 = jax.random.normal(ks[10], (1, OUT), jnp.float32) * 0.05
    h_b2p = jnp.pad(h_b2, ((0, 0), (0, OUT_PAD - OUT)))

    return dict(
        conv_w_flat=conv_w.reshape(-1),
        sl_cx=sl_cx, sl_cy=sl_cy, sl_sx2=sl_sx2, sl_sy2=sl_sy2,
        s2_w1=s2_w1_bd, s2_b1=s2_b1_cat, s2_w2=s2_w2_bd, s2_b2=s2_b2_cat,
        h_w1=h_w1f, h_b1=h_b1f, h_w2=h_w2p, h_b2=h_b2p,
    )


# ---------------------------------------------------------------------------
# Forward wrapper: batch zero-padded to a sublane multiple and tiled by a 1-D
# "parallel" grid (tile <= 128 rows); output sliced back to (B, out_dim).
# ---------------------------------------------------------------------------
def forward(births, deaths, mask, params, *, out_dim, block_b=128):
    V, B, P = births.shape
    TB = _round_up(min(block_b, _round_up(B, 8)), 8)
    B_pad = _round_up(B, TB)
    if B_pad != B:
        padcfg = ((0, 0), (0, B_pad - B), (0, 0))
        births = jnp.pad(births, padcfg)
        deaths = jnp.pad(deaths, padcfg)
        mask = jnp.pad(mask, padcfg)

    out_pad = params["h_w2"].shape[1]
    grid = (B_pad // TB,)

    data_spec = pl.BlockSpec((V, TB, P), lambda i: (0, i, 0))

    def const_spec(arr):
        nd = arr.ndim
        return pl.BlockSpec(arr.shape, lambda i: (0,) * nd)

    const_args = (params["sl_cx"], params["sl_cy"], params["sl_sx2"], params["sl_sy2"],
                  params["s2_w1"], params["s2_b1"], params["s2_w2"], params["s2_b2"],
                  params["h_w1"], params["h_b1"], params["h_w2"], params["h_b2"])

    in_specs = ([pl.BlockSpec(memory_space=pltpu.MemorySpace.SMEM),   # conv scalars
                 data_spec, data_spec, data_spec]
                + [const_spec(a) for a in const_args])

    out = pl.pallas_call(
        _fused_kernel,
        out_shape=jax.ShapeDtypeStruct((B_pad, out_pad), jnp.float32),
        grid=grid,
        in_specs=in_specs,
        out_specs=pl.BlockSpec((TB, out_pad), lambda i: (i, 0)),
        compiler_params=pltpu.CompilerParams(dimension_semantics=("parallel",)),
    )(params["conv_w_flat"], births, deaths, mask, *const_args)
    return out[:B, :out_dim]


# ---------------------------------------------------------------------------
# Pure-JAX reference (per-view structure, same folded params) for correctness.
# ---------------------------------------------------------------------------
def forward_reference(births, deaths, mask, params, out_dim):
    V, B, P = births.shape
    E_PAD = params["sl_cx"].shape[-1]
    S2 = params["s2_w2"].shape[0] // V
    VC = params["sl_cx"].shape[0]
    inv_sqrt2 = 1.0 / math.sqrt(2.0)
    x = (births + deaths) * inv_sqrt2
    y = (deaths - births) * inv_sqrt2
    y = jnp.where(y <= NU, jnp.log(jnp.maximum(y, 1e-30) / NU) * NU + NU, y)
    conv_w = params["conv_w_flat"].reshape(V, K8, C_CH)
    feats = []
    for v in range(V):
        vc = v if VC > 1 else 0
        planes = []
        for c in range(C_CH):
            u = (v + c - 1) % V
            dx = x[u][:, :, None] - params["sl_cx"][vc]
            dy = y[u][:, :, None] - params["sl_cy"][vc]
            q = dx * dx * params["sl_sx2"][vc] + dy * dy * params["sl_sy2"][vc]
            planes.append(jnp.sum(jnp.exp(-q) * mask[u][:, :, None], axis=1))
        s = jnp.stack(planes, axis=1)                            # (B, C, E_PAD)
        mx = jnp.max(jnp.einsum('kc,bce->bke', conv_w[v], s), axis=1)
        w1 = params["s2_w1"][v * E_PAD:(v + 1) * E_PAD, v * S2:(v + 1) * S2]
        b1 = params["s2_b1"][:, v * S2:(v + 1) * S2]
        w2 = params["s2_w2"][v * S2:(v + 1) * S2, v * S2:(v + 1) * S2]
        b2 = params["s2_b2"][:, v * S2:(v + 1) * S2]
        h = mx @ w1 + b1
        h = jnp.maximum(h @ w2 + b2, 0.0)
        feats.append(h)
    h_cat = jnp.concatenate(feats, axis=1)                       # (B, V*S2)
    h1 = h_cat @ params["h_w1"] + params["h_b1"]
    out = h1 @ params["h_w2"] + params["h_b2"]
    return out[:, :out_dim]


if __name__ == "__main__":
    V = 3        # len(subscripted_views)
    B = 4        # batch size
    P = 16       # max points per persistence diagram (padded)
    E = 75       # n_elements
    E_PAD = 128  # lane-padded n_elements
    F = 8        # directions -> n_filters
    S2 = 25      # stage_2_out
    H1, H1_PAD = 500, 512
    OUT, OUT_PAD = 200, 256
    C_IN = 3     # 1 + 2 * n_neighbor_directions

    key = jax.random.PRNGKey(0)
    k_b, k_p, k_par, k_par2 = jax.random.split(key, 4)

    birth = jax.random.uniform(k_b, (V, B, P), jnp.float32) * 0.7
    pers = jax.random.uniform(k_p, (V, B, P), jnp.float32) * 0.6 + 0.01
    death = birth + pers
    counts = jnp.array([[16, 12, 9, 5],
                        [14, 16, 7, 11],
                        [10, 6, 16, 13]], dtype=jnp.int32)           # (V, B)
    valid = (jnp.arange(P)[None, None, :] < counts[:, :, None]).astype(jnp.float32)
    births = birth * valid        # zero-padded like SLayer.prepare_batch
    deaths = death * valid
    mask = valid

    fwd = jax.jit(functools.partial(forward, out_dim=OUT))

    # 1) module right after __init__: shared SLayer params -> 3-exp fast path.
    params = init_params(k_par, V, E, E_PAD, F, C_IN, S2, H1, H1_PAD, OUT, OUT_PAD,
                         per_view_slayer=False)
    out = jax.block_until_ready(fwd(births, deaths, mask, params))
    assert out.shape == (B, OUT) and out.dtype == jnp.float32
    assert bool(jnp.all(jnp.isfinite(out)))
    ref = forward_reference(births, deaths, mask, params, OUT)
    err = float(jnp.max(jnp.abs(out - ref)))
    assert err < 1e-2, f"shared-path mismatch: max abs err = {err}"

    # 2) general path: per-view SLayer parameters (as after training).
    params_pv = init_params(k_par2, V, E, E_PAD, F, C_IN, S2, H1, H1_PAD, OUT, OUT_PAD,
                            per_view_slayer=True)
    out_pv = jax.block_until_ready(fwd(births, deaths, mask, params_pv))
    assert out_pv.shape == (B, OUT)
    ref_pv = forward_reference(births, deaths, mask, params_pv, OUT)
    err_pv = float(jnp.max(jnp.abs(out_pv - ref_pv)))
    assert err_pv < 1e-2, f"per-view-path mismatch: max abs err = {err_pv}"

    print("KERNEL_OK")
</pallas_src>

<mosaic_0001>
module attributes {stable_mosaic.version = 11 : i64} {
  func.func @_fused_kernel(%arg0: i32, %arg1: memref<72xf32, #tpu.memory_space<smem>>, %arg2: memref<3x8x16xf32, #tpu.memory_space<vmem>>, %arg3: memref<3x8x16xf32, #tpu.memory_space<vmem>>, %arg4: memref<3x8x16xf32, #tpu.memory_space<vmem>>, %arg5: memref<1x1x128xf32, #tpu.memory_space<vmem>>, %arg6: memref<1x1x128xf32, #tpu.memory_space<vmem>>, %arg7: memref<1x1x128xf32, #tpu.memory_space<vmem>>, %arg8: memref<1x1x128xf32, #tpu.memory_space<vmem>>, %arg9: memref<384x75xf32, #tpu.memory_space<vmem>>, %arg10: memref<1x75xf32, #tpu.memory_space<vmem>>, %arg11: memref<75x75xf32, #tpu.memory_space<vmem>>, %arg12: memref<1x75xf32, #tpu.memory_space<vmem>>, %arg13: memref<75x512xf32, #tpu.memory_space<vmem>>, %arg14: memref<1x512xf32, #tpu.memory_space<vmem>>, %arg15: memref<512x256xf32, #tpu.memory_space<vmem>>, %arg16: memref<1x256xf32, #tpu.memory_space<vmem>>, %arg17: memref<8x256xf32, #tpu.memory_space<vmem>>) attributes {dimension_semantics = [#tpu.dimension_semantics<parallel>], iteration_bounds = array<i64: 1>, scalar_prefetch = 0 : i64, scratch_operands = 0 : i64, tpu.core_type = #tpu.core_type<tc>, window_params = [{transform_indices = @transform_0, window_bounds = array<i64: 72>}, {transform_indices = @transform_1, window_bounds = array<i64: 3, 8, 16>}, {transform_indices = @transform_2, window_bounds = array<i64: 3, 8, 16>}, {transform_indices = @transform_3, window_bounds = array<i64: 3, 8, 16>}, {pipeline_mode = #tpu.pipeline_mode<synchronous>, transform_indices = @transform_4, window_bounds = array<i64: 1, 1, 128>}, {pipeline_mode = #tpu.pipeline_mode<synchronous>, transform_indices = @transform_5, window_bounds = array<i64: 1, 1, 128>}, {pipeline_mode = #tpu.pipeline_mode<synchronous>, transform_indices = @transform_6, window_bounds = array<i64: 1, 1, 128>}, {pipeline_mode = #tpu.pipeline_mode<synchronous>, transform_indices = @transform_7, window_bounds = array<i64: 1, 1, 128>}, {pipeline_mode = #tpu.pipeline_mode<synchronous>, transform_indices = @transform_8, window_bounds = array<i64: 384, 75>}, {pipeline_mode = #tpu.pipeline_mode<synchronous>, transform_indices = @transform_9, window_bounds = array<i64: 1, 75>}, {pipeline_mode = #tpu.pipeline_mode<synchronous>, transform_indices = @transform_10, window_bounds = array<i64: 75, 75>}, {pipeline_mode = #tpu.pipeline_mode<synchronous>, transform_indices = @transform_11, window_bounds = array<i64: 1, 75>}, {pipeline_mode = #tpu.pipeline_mode<synchronous>, transform_indices = @transform_12, window_bounds = array<i64: 75, 512>}, {pipeline_mode = #tpu.pipeline_mode<synchronous>, transform_indices = @transform_13, window_bounds = array<i64: 1, 512>}, {pipeline_mode = #tpu.pipeline_mode<synchronous>, transform_indices = @transform_14, window_bounds = array<i64: 512, 256>}, {pipeline_mode = #tpu.pipeline_mode<synchronous>, transform_indices = @transform_15, window_bounds = array<i64: 1, 256>}, {transform_indices = @transform_16, window_bounds = array<i64: 8, 256>}]} {
    %c0 = arith.constant 0 : index
    %c0_0 = arith.constant 0 : index
    %c0_1 = arith.constant 0 : index
    %0 = vector.load %arg2[%c0, %c0_0, %c0_1] : memref<3x8x16xf32, #tpu.memory_space<vmem>>, vector<3x8x16xf32>
    %c0_2 = arith.constant 0 : index
    %c0_3 = arith.constant 0 : index
    %c0_4 = arith.constant 0 : index
    %1 = vector.load %arg3[%c0_2, %c0_3, %c0_4] : memref<3x8x16xf32, #tpu.memory_space<vmem>>, vector<3x8x16xf32>
    %c0_5 = arith.constant 0 : index
    %c0_6 = arith.constant 0 : index
    %c0_7 = arith.constant 0 : index
    %2 = vector.load %arg4[%c0_5, %c0_6, %c0_7] : memref<3x8x16xf32, #tpu.memory_space<vmem>>, vector<3x8x16xf32>
    %3 = arith.addf %0, %1 : vector<3x8x16xf32>
    %cst = arith.constant 0.707106769 : f32
    %4 = vector.broadcast %cst : f32 to vector<3x8x16xf32>
    %5 = arith.mulf %3, %4 : vector<3x8x16xf32>
    %6 = arith.subf %1, %0 : vector<3x8x16xf32>
    %cst_8 = arith.constant 0.707106769 : f32
    %7 = vector.broadcast %cst_8 : f32 to vector<3x8x16xf32>
    %8 = arith.mulf %6, %7 : vector<3x8x16xf32>
    %cst_9 = arith.constant 1.000000e-01 : f32
    %9 = vector.broadcast %cst_9 : f32 to vector<3x8x16xf32>
    %10 = arith.cmpf ole, %8, %9 : vector<3x8x16xf32>
    %cst_10 = arith.constant 1.000000e-30 : f32
    %11 = vector.broadcast %cst_10 : f32 to vector<3x8x16xf32>
    %12 = arith.maximumf %8, %11 : vector<3x8x16xf32>
    %cst_11 = arith.constant 1.000000e-01 : f32
    %13 = vector.broadcast %cst_11 : f32 to vector<3x8x16xf32>
    %14 = arith.divf %12, %13 : vector<3x8x16xf32>
    %15 = math.log %14 : vector<3x8x16xf32>
    %cst_12 = arith.constant 1.000000e-01 : f32
    %16 = vector.broadcast %cst_12 : f32 to vector<3x8x16xf32>
    %17 = arith.mulf %15, %16 : vector<3x8x16xf32>
    %cst_13 = arith.constant 1.000000e-01 : f32
    %18 = vector.broadcast %cst_13 : f32 to vector<3x8x16xf32>
    %19 = arith.addf %17, %18 : vector<3x8x16xf32>
    %20 = arith.select %10, %19, %8 : vector<3x8x16xi1>, vector<3x8x16xf32>
    %21 = vector.extract_strided_slice %5 {offsets = [0, 0, 0], sizes = [1, 8, 16], strides = [1, 1, 1]} : vector<3x8x16xf32> to vector<1x8x16xf32>
    %22 = vector.shape_cast %21 : vector<1x8x16xf32> to vector<8x16xf32>
    %23 = vector.shape_cast %22 : vector<8x16xf32> to vector<8x16x1xf32>
    %24 = vector.extract_strided_slice %20 {offsets = [0, 0, 0], sizes = [1, 8, 16], strides = [1, 1, 1]} : vector<3x8x16xf32> to vector<1x8x16xf32>
    %25 = vector.shape_cast %24 : vector<1x8x16xf32> to vector<8x16xf32>
    %26 = vector.shape_cast %25 : vector<8x16xf32> to vector<8x16x1xf32>
    %27 = vector.extract_strided_slice %2 {offsets = [0, 0, 0], sizes = [1, 8, 16], strides = [1, 1, 1]} : vector<3x8x16xf32> to vector<1x8x16xf32>
    %28 = vector.shape_cast %27 : vector<1x8x16xf32> to vector<8x16xf32>
    %29 = vector.shape_cast %28 : vector<8x16xf32> to vector<8x16x1xf32>
    %c0_14 = arith.constant 0 : index
    %c0_15 = arith.constant 0 : index
    %c0_16 = arith.constant 0 : index
    %30 = vector.load %arg5[%c0_14, %c0_15, %c0_16] : memref<1x1x128xf32, #tpu.memory_space<vmem>>, vector<1x1x128xf32>
    %31 = vector.shape_cast %30 : vector<1x1x128xf32> to vector<1x128xf32>
    %32 = vector.shape_cast %31 : vector<1x128xf32> to vector<1x1x128xf32>
    %33 = vector.broadcast %23 : vector<8x16x1xf32> to vector<8x16x128xf32>
    %34 = vector.broadcast %32 : vector<1x1x128xf32> to vector<8x16x128xf32>
    %35 = arith.subf %33, %34 : vector<8x16x128xf32>
    %c0_17 = arith.constant 0 : index
    %c0_18 = arith.constant 0 : index
    %c0_19 = arith.constant 0 : index
    %36 = vector.load %arg6[%c0_17, %c0_18, %c0_19] : memref<1x1x128xf32, #tpu.memory_space<vmem>>, vector<1x1x128xf32>
    %37 = vector.shape_cast %36 : vector<1x1x128xf32> to vector<1x128xf32>
    %38 = vector.shape_cast %37 : vector<1x128xf32> to vector<1x1x128xf32>
    %39 = vector.broadcast %26 : vector<8x16x1xf32> to vector<8x16x128xf32>
    %40 = vector.broadcast %38 : vector<1x1x128xf32> to vector<8x16x128xf32>
    %41 = arith.subf %39, %40 : vector<8x16x128xf32>
    %42 = arith.mulf %35, %35 : vector<8x16x128xf32>
    %c0_20 = arith.constant 0 : index
    %c0_21 = arith.constant 0 : index
    %c0_22 = arith.constant 0 : index
    %43 = vector.load %arg7[%c0_20, %c0_21, %c0_22] : memref<1x1x128xf32, #tpu.memory_space<vmem>>, vector<1x1x128xf32>
    %44 = vector.shape_cast %43 : vector<1x1x128xf32> to vector<1x128xf32>
    %45 = vector.shape_cast %44 : vector<1x128xf32> to vector<1x1x128xf32>
    %46 = vector.broadcast %45 : vector<1x1x128xf32> to vector<8x16x128xf32>
    %47 = arith.mulf %42, %46 : vector<8x16x128xf32>
    %48 = arith.mulf %41, %41 : vector<8x16x128xf32>
    %c0_23 = arith.constant 0 : index
    %c0_24 = arith.constant 0 : index
    %c0_25 = arith.constant 0 : index
    %49 = vector.load %arg8[%c0_23, %c0_24, %c0_25] : memref<1x1x128xf32, #tpu.memory_space<vmem>>, vector<1x1x128xf32>
    %50 = vector.shape_cast %49 : vector<1x1x128xf32> to vector<1x128xf32>
    %51 = vector.shape_cast %50 : vector<1x128xf32> to vector<1x1x128xf32>
    %52 = vector.broadcast %51 : vector<1x1x128xf32> to vector<8x16x128xf32>
    %53 = arith.mulf %48, %52 : vector<8x16x128xf32>
    %54 = arith.addf %47, %53 : vector<8x16x128xf32>
    %cst_26 = arith.constant 0.000000e+00 : f32
    %55 = vector.broadcast %cst_26 : f32 to vector<8x16x128xf32>
    %56 = arith.subf %55, %54 : vector<8x16x128xf32>
    %57 = math.exp %56 : vector<8x16x128xf32>
    %58 = vector.broadcast %29 : vector<8x16x1xf32> to vector<8x16x128xf32>
    %59 = arith.mulf %57, %58 : vector<8x16x128xf32>
    %cst_27 = arith.constant dense<0.000000e+00> : vector<8x128xf32>
    %60 = vector.multi_reduction <add>, %59, %cst_27 [1] : vector<8x16x128xf32> to vector<8x128xf32>
    %61 = vector.extract_strided_slice %5 {offsets = [1, 0, 0], sizes = [1, 8, 16], strides = [1, 1, 1]} : vector<3x8x16xf32> to vector<1x8x16xf32>
    %62 = vector.shape_cast %61 : vector<1x8x16xf32> to vector<8x16xf32>
    %63 = vector.shape_cast %62 : vector<8x16xf32> to vector<8x16x1xf32>
    %64 = vector.extract_strided_slice %20 {offsets = [1, 0, 0], sizes = [1, 8, 16], strides = [1, 1, 1]} : vector<3x8x16xf32> to vector<1x8x16xf32>
    %65 = vector.shape_cast %64 : vector<1x8x16xf32> to vector<8x16xf32>
    %66 = vector.shape_cast %65 : vector<8x16xf32> to vector<8x16x1xf32>
    %67 = vector.extract_strided_slice %2 {offsets = [1, 0, 0], sizes = [1, 8, 16], strides = [1, 1, 1]} : vector<3x8x16xf32> to vector<1x8x16xf32>
    %68 = vector.shape_cast %67 : vector<1x8x16xf32> to vector<8x16xf32>
    %69 = vector.shape_cast %68 : vector<8x16xf32> to vector<8x16x1xf32>
    %c0_28 = arith.constant 0 : index
    %c0_29 = arith.constant 0 : index
    %c0_30 = arith.constant 0 : index
    %70 = vector.load %arg5[%c0_28, %c0_29, %c0_30] : memref<1x1x128xf32, #tpu.memory_space<vmem>>, vector<1x1x128xf32>
    %71 = vector.shape_cast %70 : vector<1x1x128xf32> to vector<1x128xf32>
    %72 = vector.shape_cast %71 : vector<1x128xf32> to vector<1x1x128xf32>
    %73 = vector.broadcast %63 : vector<8x16x1xf32> to vector<8x16x128xf32>
    %74 = vector.broadcast %72 : vector<1x1x128xf32> to vector<8x16x128xf32>
    %75 = arith.subf %73, %74 : vector<8x16x128xf32>
    %c0_31 = arith.constant 0 : index
    %c0_32 = arith.constant 0 : index
    %c0_33 = arith.constant 0 : index
    %76 = vector.load %arg6[%c0_31, %c0_32, %c0_33] : memref<1x1x128xf32, #tpu.memory_space<vmem>>, vector<1x1x128xf32>
    %77 = vector.shape_cast %76 : vector<1x1x128xf32> to vector<1x128xf32>
    %78 = vector.shape_cast %77 : vector<1x128xf32> to vector<1x1x128xf32>
    %79 = vector.broadcast %66 : vector<8x16x1xf32> to vector<8x16x128xf32>
    %80 = vector.broadcast %78 : vector<1x1x128xf32> to vector<8x16x128xf32>
    %81 = arith.subf %79, %80 : vector<8x16x128xf32>
    %82 = arith.mulf %75, %75 : vector<8x16x128xf32>
    %c0_34 = arith.constant 0 : index
    %c0_35 = arith.constant 0 : index
    %c0_36 = arith.constant 0 : index
    %83 = vector.load %arg7[%c0_34, %c0_35, %c0_36] : memref<1x1x128xf32, #tpu.memory_space<vmem>>, vector<1x1x128xf32>
    %84 = vector.shape_cast %83 : vector<1x1x128xf32> to vector<1x128xf32>
    %85 = vector.shape_cast %84 : vector<1x128xf32> to vector<1x1x128xf32>
    %86 = vector.broadcast %85 : vector<1x1x128xf32> to vector<8x16x128xf32>
    %87 = arith.mulf %82, %86 : vector<8x16x128xf32>
    %88 = arith.mulf %81, %81 : vector<8x16x128xf32>
    %c0_37 = arith.constant 0 : index
    %c0_38 = arith.constant 0 : index
    %c0_39 = arith.constant 0 : index
    %89 = vector.load %arg8[%c0_37, %c0_38, %c0_39] : memref<1x1x128xf32, #tpu.memory_space<vmem>>, vector<1x1x128xf32>
    %90 = vector.shape_cast %89 : vector<1x1x128xf32> to vector<1x128xf32>
    %91 = vector.shape_cast %90 : vector<1x128xf32> to vector<1x1x128xf32>
    %92 = vector.broadcast %91 : vector<1x1x128xf32> to vector<8x16x128xf32>
    %93 = arith.mulf %88, %92 : vector<8x16x128xf32>
    %94 = arith.addf %87, %93 : vector<8x16x128xf32>
    %cst_40 = arith.constant 0.000000e+00 : f32
    %95 = vector.broadcast %cst_40 : f32 to vector<8x16x128xf32>
    %96 = arith.subf %95, %94 : vector<8x16x128xf32>
    %97 = math.exp %96 : vector<8x16x128xf32>
    %98 = vector.broadcast %69 : vector<8x16x1xf32> to vector<8x16x128xf32>
    %99 = arith.mulf %97, %98 : vector<8x16x128xf32>
    %cst_41 = arith.constant dense<0.000000e+00> : vector<8x128xf32>
    %100 = vector.multi_reduction <add>, %99, %cst_41 [1] : vector<8x16x128xf32> to vector<8x128xf32>
    %101 = vector.extract_strided_slice %5 {offsets = [2, 0, 0], sizes = [1, 8, 16], strides = [1, 1, 1]} : vector<3x8x16xf32> to vector<1x8x16xf32>
    %102 = vector.shape_cast %101 : vector<1x8x16xf32> to vector<8x16xf32>
    %103 = vector.shape_cast %102 : vector<8x16xf32> to vector<8x16x1xf32>
    %104 = vector.extract_strided_slice %20 {offsets = [2, 0, 0], sizes = [1, 8, 16], strides = [1, 1, 1]} : vector<3x8x16xf32> to vector<1x8x16xf32>
    %105 = vector.shape_cast %104 : vector<1x8x16xf32> to vector<8x16xf32>
    %106 = vector.shape_cast %105 : vector<8x16xf32> to vector<8x16x1xf32>
    %107 = vector.extract_strided_slice %2 {offsets = [2, 0, 0], sizes = [1, 8, 16], strides = [1, 1, 1]} : vector<3x8x16xf32> to vector<1x8x16xf32>
    %108 = vector.shape_cast %107 : vector<1x8x16xf32> to vector<8x16xf32>
    %109 = vector.shape_cast %108 : vector<8x16xf32> to vector<8x16x1xf32>
    %c0_42 = arith.constant 0 : index
    %c0_43 = arith.constant 0 : index
    %c0_44 = arith.constant 0 : index
    %110 = vector.load %arg5[%c0_42, %c0_43, %c0_44] : memref<1x1x128xf32, #tpu.memory_space<vmem>>, vector<1x1x128xf32>
    %111 = vector.shape_cast %110 : vector<1x1x128xf32> to vector<1x128xf32>
    %112 = vector.shape_cast %111 : vector<1x128xf32> to vector<1x1x128xf32>
    %113 = vector.broadcast %103 : vector<8x16x1xf32> to vector<8x16x128xf32>
    %114 = vector.broadcast %112 : vector<1x1x128xf32> to vector<8x16x128xf32>
    %115 = arith.subf %113, %114 : vector<8x16x128xf32>
    %c0_45 = arith.constant 0 : index
    %c0_46 = arith.constant 0 : index
    %c0_47 = arith.constant 0 : index
    %116 = vector.load %arg6[%c0_45, %c0_46, %c0_47] : memref<1x1x128xf32, #tpu.memory_space<vmem>>, vector<1x1x128xf32>
    %117 = vector.shape_cast %116 : vector<1x1x128xf32> to vector<1x128xf32>
    %118 = vector.shape_cast %117 : vector<1x128xf32> to vector<1x1x128xf32>
    %119 = vector.broadcast %106 : vector<8x16x1xf32> to vector<8x16x128xf32>
    %120 = vector.broadcast %118 : vector<1x1x128xf32> to vector<8x16x128xf32>
    %121 = arith.subf %119, %120 : vector<8x16x128xf32>
    %122 = arith.mulf %115, %115 : vector<8x16x128xf32>
    %c0_48 = arith.constant 0 : index
    %c0_49 = arith.constant 0 : index
    %c0_50 = arith.constant 0 : index
    %123 = vector.load %arg7[%c0_48, %c0_49, %c0_50] : memref<1x1x128xf32, #tpu.memory_space<vmem>>, vector<1x1x128xf32>
    %124 = vector.shape_cast %123 : vector<1x1x128xf32> to vector<1x128xf32>
    %125 = vector.shape_cast %124 : vector<1x128xf32> to vector<1x1x128xf32>
    %126 = vector.broadcast %125 : vector<1x1x128xf32> to vector<8x16x128xf32>
    %127 = arith.mulf %122, %126 : vector<8x16x128xf32>
    %128 = arith.mulf %121, %121 : vector<8x16x128xf32>
    %c0_51 = arith.constant 0 : index
    %c0_52 = arith.constant 0 : index
    %c0_53 = arith.constant 0 : index
    %129 = vector.load %arg8[%c0_51, %c0_52, %c0_53] : memref<1x1x128xf32, #tpu.memory_space<vmem>>, vector<1x1x128xf32>
    %130 = vector.shape_cast %129 : vector<1x1x128xf32> to vector<1x128xf32>
    %131 = vector.shape_cast %130 : vector<1x128xf32> to vector<1x1x128xf32>
    %132 = vector.broadcast %131 : vector<1x1x128xf32> to vector<8x16x128xf32>
    %133 = arith.mulf %128, %132 : vector<8x16x128xf32>
    %134 = arith.addf %127, %133 : vector<8x16x128xf32>
    %cst_54 = arith.constant 0.000000e+00 : f32
    %135 = vector.broadcast %cst_54 : f32 to vector<8x16x128xf32>
    %136 = arith.subf %135, %134 : vector<8x16x128xf32>
    %137 = math.exp %136 : vector<8x16x128xf32>
    %138 = vector.broadcast %109 : vector<8x16x1xf32> to vector<8x16x128xf32>
    %139 = arith.mulf %137, %138 : vector<8x16x128xf32>
    %cst_55 = arith.constant dense<0.000000e+00> : vector<8x128xf32>
    %140 = vector.multi_reduction <add>, %139, %cst_55 [1] : vector<8x16x128xf32> to vector<8x128xf32>
    %c0_56 = arith.constant 0 : index
    %141 = memref.load %arg1[%c0_56] : memref<72xf32, #tpu.memory_space<smem>>
    %142 = vector.broadcast %141 : f32 to vector<8x128xf32>
    %143 = arith.mulf %140, %142 : vector<8x128xf32>
    %c1 = arith.constant 1 : index
    %144 = memref.load %arg1[%c1] : memref<72xf32, #tpu.memory_space<smem>>
    %145 = vector.broadcast %144 : f32 to vector<8x128xf32>
    %146 = arith.mulf %60, %145 : vector<8x128xf32>
    %147 = arith.addf %143, %146 : vector<8x128xf32>
    %c2 = arith.constant 2 : index
    %148 = memref.load %arg1[%c2] : memref<72xf32, #tpu.memory_space<smem>>
    %149 = vector.broadcast %148 : f32 to vector<8x128xf32>
    %150 = arith.mulf %100, %149 : vector<8x128xf32>
    %151 = arith.addf %147, %150 : vector<8x128xf32>
    %c3 = arith.constant 3 : index
    %152 = memref.load %arg1[%c3] : memref<72xf32, #tpu.memory_space<smem>>
    %153 = vector.broadcast %152 : f32 to vector<8x128xf32>
    %154 = arith.mulf %140, %153 : vector<8x128xf32>
    %c4 = arith.constant 4 : index
    %155 = memref.load %arg1[%c4] : memref<72xf32, #tpu.memory_space<smem>>
    %156 = vector.broadcast %155 : f32 to vector<8x128xf32>
    %157 = arith.mulf %60, %156 : vector<8x128xf32>
    %158 = arith.addf %154, %157 : vector<8x128xf32>
    %c5 = arith.constant 5 : index
    %159 = memref.load %arg1[%c5] : memref<72xf32, #tpu.memory_space<smem>>
    %160 = vector.broadcast %159 : f32 to vector<8x128xf32>
    %161 = arith.mulf %100, %160 : vector<8x128xf32>
    %162 = arith.addf %158, %161 : vector<8x128xf32>
    %163 = arith.maximumf %151, %162 : vector<8x128xf32>
    %c6 = arith.constant 6 : index
    %164 = memref.load %arg1[%c6] : memref<72xf32, #tpu.memory_space<smem>>
    %165 = vector.broadcast %164 : f32 to vector<8x128xf32>
    %166 = arith.mulf %140, %165 : vector<8x128xf32>
    %c7 = arith.constant 7 : index
    %167 = memref.load %arg1[%c7] : memref<72xf32, #tpu.memory_space<smem>>
    %168 = vector.broadcast %167 : f32 to vector<8x128xf32>
    %169 = arith.mulf %60, %168 : vector<8x128xf32>
    %170 = arith.addf %166, %169 : vector<8x128xf32>
    %c8 = arith.constant 8 : index
    %171 = memref.load %arg1[%c8] : memref<72xf32, #tpu.memory_space<smem>>
    %172 = vector.broadcast %171 : f32 to vector<8x128xf32>
    %173 = arith.mulf %100, %172 : vector<8x128xf32>
    %174 = arith.addf %170, %173 : vector<8x128xf32>
    %175 = arith.maximumf %163, %174 : vector<8x128xf32>
    %c9 = arith.constant 9 : index
    %176 = memref.load %arg1[%c9] : memref<72xf32, #tpu.memory_space<smem>>
    %177 = vector.broadcast %176 : f32 to vector<8x128xf32>
    %178 = arith.mulf %140, %177 : vector<8x128xf32>
    %c10 = arith.constant 10 : index
    %179 = memref.load %arg1[%c10] : memref<72xf32, #tpu.memory_space<smem>>
    %180 = vector.broadcast %179 : f32 to vector<8x128xf32>
    %181 = arith.mulf %60, %180 : vector<8x128xf32>
    %182 = arith.addf %178, %181 : vector<8x128xf32>
    %c11 = arith.constant 11 : index
    %183 = memref.load %arg1[%c11] : memref<72xf32, #tpu.memory_space<smem>>
    %184 = vector.broadcast %183 : f32 to vector<8x128xf32>
    %185 = arith.mulf %100, %184 : vector<8x128xf32>
    %186 = arith.addf %182, %185 : vector<8x128xf32>
    %187 = arith.maximumf %175, %186 : vector<8x128xf32>
    %c12 = arith.constant 12 : index
    %188 = memref.load %arg1[%c12] : memref<72xf32, #tpu.memory_space<smem>>
    %189 = vector.broadcast %188 : f32 to vector<8x128xf32>
    %190 = arith.mulf %140, %189 : vector<8x128xf32>
    %c13 = arith.constant 13 : index
    %191 = memref.load %arg1[%c13] : memref<72xf32, #tpu.memory_space<smem>>
    %192 = vector.broadcast %191 : f32 to vector<8x128xf32>
    %193 = arith.mulf %60, %192 : vector<8x128xf32>
    %194 = arith.addf %190, %193 : vector<8x128xf32>
    %c14 = arith.constant 14 : index
    %195 = memref.load %arg1[%c14] : memref<72xf32, #tpu.memory_space<smem>>
    %196 = vector.broadcast %195 : f32 to vector<8x128xf32>
    %197 = arith.mulf %100, %196 : vector<8x128xf32>
    %198 = arith.addf %194, %197 : vector<8x128xf32>
    %199 = arith.maximumf %187, %198 : vector<8x128xf32>
    %c15 = arith.constant 15 : index
    %200 = memref.load %arg1[%c15] : memref<72xf32, #tpu.memory_space<smem>>
    %201 = vector.broadcast %200 : f32 to vector<8x128xf32>
    %202 = arith.mulf %140, %201 : vector<8x128xf32>
    %c16 = arith.constant 16 : index
    %203 = memref.load %arg1[%c16] : memref<72xf32, #tpu.memory_space<smem>>
    %204 = vector.broadcast %203 : f32 to vector<8x128xf32>
    %205 = arith.mulf %60, %204 : vector<8x128xf32>
    %206 = arith.addf %202, %205 : vector<8x128xf32>
    %c17 = arith.constant 17 : index
    %207 = memref.load %arg1[%c17] : memref<72xf32, #tpu.memory_space<smem>>
    %208 = vector.broadcast %207 : f32 to vector<8x128xf32>
    %209 = arith.mulf %100, %208 : vector<8x128xf32>
    %210 = arith.addf %206, %209 : vector<8x128xf32>
    %211 = arith.maximumf %199, %210 : vector<8x128xf32>
    %c18 = arith.constant 18 : index
    %212 = memref.load %arg1[%c18] : memref<72xf32, #tpu.memory_space<smem>>
    %213 = vector.broadcast %212 : f32 to vector<8x128xf32>
    %214 = arith.mulf %140, %213 : vector<8x128xf32>
    %c19 = arith.constant 19 : index
    %215 = memref.load %arg1[%c19] : memref<72xf32, #tpu.memory_space<smem>>
    %216 = vector.broadcast %215 : f32 to vector<8x128xf32>
    %217 = arith.mulf %60, %216 : vector<8x128xf32>
    %218 = arith.addf %214, %217 : vector<8x128xf32>
    %c20 = arith.constant 20 : index
    %219 = memref.load %arg1[%c20] : memref<72xf32, #tpu.memory_space<smem>>
    %220 = vector.broadcast %219 : f32 to vector<8x128xf32>
    %221 = arith.mulf %100, %220 : vector<8x128xf32>
    %222 = arith.addf %218, %221 : vector<8x128xf32>
    %223 = arith.maximumf %211, %222 : vector<8x128xf32>
    %c21 = arith.constant 21 : index
    %224 = memref.load %arg1[%c21] : memref<72xf32, #tpu.memory_space<smem>>
    %225 = vector.broadcast %224 : f32 to vector<8x128xf32>
    %226 = arith.mulf %140, %225 : vector<8x128xf32>
    %c22 = arith.constant 22 : index
    %227 = memref.load %arg1[%c22] : memref<72xf32, #tpu.memory_space<smem>>
    %228 = vector.broadcast %227 : f32 to vector<8x128xf32>
    %229 = arith.mulf %60, %228 : vector<8x128xf32>
    %230 = arith.addf %226, %229 : vector<8x128xf32>
    %c23 = arith.constant 23 : index
    %231 = memref.load %arg1[%c23] : memref<72xf32, #tpu.memory_space<smem>>
    %232 = vector.broadcast %231 : f32 to vector<8x128xf32>
    %233 = arith.mulf %100, %232 : vector<8x128xf32>
    %234 = arith.addf %230, %233 : vector<8x128xf32>
    %235 = arith.maximumf %223, %234 : vector<8x128xf32>
    %c24 = arith.constant 24 : index
    %236 = memref.load %arg1[%c24] : memref<72xf32, #tpu.memory_space<smem>>
    %237 = vector.broadcast %236 : f32 to vector<8x128xf32>
    %238 = arith.mulf %60, %237 : vector<8x128xf32>
    %c25 = arith.constant 25 : index
    %239 = memref.load %arg1[%c25] : memref<72xf32, #tpu.memory_space<smem>>
    %240 = vector.broadcast %239 : f32 to vector<8x128xf32>
    %241 = arith.mulf %100, %240 : vector<8x128xf32>
    %242 = arith.addf %238, %241 : vector<8x128xf32>
    %c26 = arith.constant 26 : index
    %243 = memref.load %arg1[%c26] : memref<72xf32, #tpu.memory_space<smem>>
    %244 = vector.broadcast %243 : f32 to vector<8x128xf32>
    %245 = arith.mulf %140, %244 : vector<8x128xf32>
    %246 = arith.addf %242, %245 : vector<8x128xf32>
    %c27 = arith.constant 27 : index
    %247 = memref.load %arg1[%c27] : memref<72xf32, #tpu.memory_space<smem>>
    %248 = vector.broadcast %247 : f32 to vector<8x128xf32>
    %249 = arith.mulf %60, %248 : vector<8x128xf32>
    %c28 = arith.constant 28 : index
    %250 = memref.load %arg1[%c28] : memref<72xf32, #tpu.memory_space<smem>>
    %251 = vector.broadcast %250 : f32 to vector<8x128xf32>
    %252 = arith.mulf %100, %251 : vector<8x128xf32>
    %253 = arith.addf %249, %252 : vector<8x128xf32>
    %c29 = arith.constant 29 : index
    %254 = memref.load %arg1[%c29] : memref<72xf32, #tpu.memory_space<smem>>
    %255 = vector.broadcast %254 : f32 to vector<8x128xf32>
    %256 = arith.mulf %140, %255 : vector<8x128xf32>
    %257 = arith.addf %253, %256 : vector<8x128xf32>
    %258 = arith.maximumf %246, %257 : vector<8x128xf32>
    %c30 = arith.constant 30 : index
    %259 = memref.load %arg1[%c30] : memref<72xf32, #tpu.memory_space<smem>>
    %260 = vector.broadcast %259 : f32 to vector<8x128xf32>
    %261 = arith.mulf %60, %260 : vector<8x128xf32>
    %c31 = arith.constant 31 : index
    %262 = memref.load %arg1[%c31] : memref<72xf32, #tpu.memory_space<smem>>
    %263 = vector.broadcast %262 : f32 to vector<8x128xf32>
    %264 = arith.mulf %100, %263 : vector<8x128xf32>
    %265 = arith.addf %261, %264 : vector<8x128xf32>
    %c32 = arith.constant 32 : index
    %266 = memref.load %arg1[%c32] : memref<72xf32, #tpu.memory_space<smem>>
    %267 = vector.broadcast %266 : f32 to vector<8x128xf32>
    %268 = arith.mulf %140, %267 : vector<8x128xf32>
    %269 = arith.addf %265, %268 : vector<8x128xf32>
    %270 = arith.maximumf %258, %269 : vector<8x128xf32>
    %c33 = arith.constant 33 : index
    %271 = memref.load %arg1[%c33] : memref<72xf32, #tpu.memory_space<smem>>
    %272 = vector.broadcast %271 : f32 to vector<8x128xf32>
    %273 = arith.mulf %60, %272 : vector<8x128xf32>
    %c34 = arith.constant 34 : index
    %274 = memref.load %arg1[%c34] : memref<72xf32, #tpu.memory_space<smem>>
    %275 = vector.broadcast %274 : f32 to vector<8x128xf32>
    %276 = arith.mulf %100, %275 : vector<8x128xf32>
    %277 = arith.addf %273, %276 : vector<8x128xf32>
    %c35 = arith.constant 35 : index
    %278 = memref.load %arg1[%c35] : memref<72xf32, #tpu.memory_space<smem>>
    %279 = vector.broadcast %278 : f32 to vector<8x128xf32>
    %280 = arith.mulf %140, %279 : vector<8x128xf32>
    %281 = arith.addf %277, %280 : vector<8x128xf32>
    %282 = arith.maximumf %270, %281 : vector<8x128xf32>
    %c36 = arith.constant 36 : index
    %283 = memref.load %arg1[%c36] : memref<72xf32, #tpu.memory_space<smem>>
    %284 = vector.broadcast %283 : f32 to vector<8x128xf32>
    %285 = arith.mulf %60, %284 : vector<8x128xf32>
    %c37 = arith.constant 37 : index
    %286 = memref.load %arg1[%c37] : memref<72xf32, #tpu.memory_space<smem>>
    %287 = vector.broadcast %286 : f32 to vector<8x128xf32>
    %288 = arith.mulf %100, %287 : vector<8x128xf32>
    %289 = arith.addf %285, %288 : vector<8x128xf32>
    %c38 = arith.constant 38 : index
    %290 = memref.load %arg1[%c38] : memref<72xf32, #tpu.memory_space<smem>>
    %291 = vector.broadcast %290 : f32 to vector<8x128xf32>
    %292 = arith.mulf %140, %291 : vector<8x128xf32>
    %293 = arith.addf %289, %292 : vector<8x128xf32>
    %294 = arith.maximumf %282, %293 : vector<8x128xf32>
    %c39 = arith.constant 39 : index
    %295 = memref.load %arg1[%c39] : memref<72xf32, #tpu.memory_space<smem>>
    %296 = vector.broadcast %295 : f32 to vector<8x128xf32>
    %297 = arith.mulf %60, %296 : vector<8x128xf32>
    %c40 = arith.constant 40 : index
    %298 = memref.load %arg1[%c40] : memref<72xf32, #tpu.memory_space<smem>>
    %299 = vector.broadcast %298 : f32 to vector<8x128xf32>
    %300 = arith.mulf %100, %299 : vector<8x128xf32>
    %301 = arith.addf %297, %300 : vector<8x128xf32>
    %c41 = arith.constant 41 : index
    %302 = memref.load %arg1[%c41] : memref<72xf32, #tpu.memory_space<smem>>
    %303 = vector.broadcast %302 : f32 to vector<8x128xf32>
    %304 = arith.mulf %140, %303 : vector<8x128xf32>
    %305 = arith.addf %301, %304 : vector<8x128xf32>
    %306 = arith.maximumf %294, %305 : vector<8x128xf32>
    %c42 = arith.constant 42 : index
    %307 = memref.load %arg1[%c42] : memref<72xf32, #tpu.memory_space<smem>>
    %308 = vector.broadcast %307 : f32 to vector<8x128xf32>
    %309 = arith.mulf %60, %308 : vector<8x128xf32>
    %c43 = arith.constant 43 : index
    %310 = memref.load %arg1[%c43] : memref<72xf32, #tpu.memory_space<smem>>
    %311 = vector.broadcast %310 : f32 to vector<8x128xf32>
    %312 = arith.mulf %100, %311 : vector<8x128xf32>
    %313 = arith.addf %309, %312 : vector<8x128xf32>
    %c44 = arith.constant 44 : index
    %314 = memref.load %arg1[%c44] : memref<72xf32, #tpu.memory_space<smem>>
    %315 = vector.broadcast %314 : f32 to vector<8x128xf32>
    %316 = arith.mulf %140, %315 : vector<8x128xf32>
    %317 = arith.addf %313, %316 : vector<8x128xf32>
    %318 = arith.maximumf %306, %317 : vector<8x128xf32>
    %c45 = arith.constant 45 : index
    %319 = memref.load %arg1[%c45] : memref<72xf32, #tpu.memory_space<smem>>
    %320 = vector.broadcast %319 : f32 to vector<8x128xf32>
    %321 = arith.mulf %60, %320 : vector<8x128xf32>
    %c46 = arith.constant 46 : index
    %322 = memref.load %arg1[%c46] : memref<72xf32, #tpu.memory_space<smem>>
    %323 = vector.broadcast %322 : f32 to vector<8x128xf32>
    %324 = arith.mulf %100, %323 : vector<8x128xf32>
    %325 = arith.addf %321, %324 : vector<8x128xf32>
    %c47 = arith.constant 47 : index
    %326 = memref.load %arg1[%c47] : memref<72xf32, #tpu.memory_space<smem>>
    %327 = vector.broadcast %326 : f32 to vector<8x128xf32>
    %328 = arith.mulf %140, %327 : vector<8x128xf32>
    %329 = arith.addf %325, %328 : vector<8x128xf32>
    %330 = arith.maximumf %318, %329 : vector<8x128xf32>
    %c48 = arith.constant 48 : index
    %331 = memref.load %arg1[%c48] : memref<72xf32, #tpu.memory_space<smem>>
    %332 = vector.broadcast %331 : f32 to vector<8x128xf32>
    %333 = arith.mulf %100, %332 : vector<8x128xf32>
    %c49 = arith.constant 49 : index
    %334 = memref.load %arg1[%c49] : memref<72xf32, #tpu.memory_space<smem>>
    %335 = vector.broadcast %334 : f32 to vector<8x128xf32>
    %336 = arith.mulf %140, %335 : vector<8x128xf32>
    %337 = arith.addf %333, %336 : vector<8x128xf32>
    %c50 = arith.constant 50 : index
    %338 = memref.load %arg1[%c50] : memref<72xf32, #tpu.memory_space<smem>>
    %339 = vector.broadcast %338 : f32 to vector<8x128xf32>
    %340 = arith.mulf %60, %339 : vector<8x128xf32>
    %341 = arith.addf %337, %340 : vector<8x128xf32>
    %c51 = arith.constant 51 : index
    %342 = memref.load %arg1[%c51] : memref<72xf32, #tpu.memory_space<smem>>
    %343 = vector.broadcast %342 : f32 to vector<8x128xf32>
    %344 = arith.mulf %100, %343 : vector<8x128xf32>
    %c52 = arith.constant 52 : index
    %345 = memref.load %arg1[%c52] : memref<72xf32, #tpu.memory_space<smem>>
    %346 = vector.broadcast %345 : f32 to vector<8x128xf32>
    %347 = arith.mulf %140, %346 : vector<8x128xf32>
    %348 = arith.addf %344, %347 : vector<8x128xf32>
    %c53 = arith.constant 53 : index
    %349 = memref.load %arg1[%c53] : memref<72xf32, #tpu.memory_space<smem>>
    %350 = vector.broadcast %349 : f32 to vector<8x128xf32>
    %351 = arith.mulf %60, %350 : vector<8x128xf32>
    %352 = arith.addf %348, %351 : vector<8x128xf32>
    %353 = arith.maximumf %341, %352 : vector<8x128xf32>
    %c54 = arith.constant 54 : index
    %354 = memref.load %arg1[%c54] : memref<72xf32, #tpu.memory_space<smem>>
    %355 = vector.broadcast %354 : f32 to vector<8x128xf32>
    %356 = arith.mulf %100, %355 : vector<8x128xf32>
    %c55 = arith.constant 55 : index
    %357 = memref.load %arg1[%c55] : memref<72xf32, #tpu.memory_space<smem>>
    %358 = vector.broadcast %357 : f32 to vector<8x128xf32>
    %359 = arith.mulf %140, %358 : vector<8x128xf32>
    %360 = arith.addf %356, %359 : vector<8x128xf32>
    %c56 = arith.constant 56 : index
    %361 = memref.load %arg1[%c56] : memref<72xf32, #tpu.memory_space<smem>>
    %362 = vector.broadcast %361 : f32 to vector<8x128xf32>
    %363 = arith.mulf %60, %362 : vector<8x128xf32>
    %364 = arith.addf %360, %363 : vector<8x128xf32>
    %365 = arith.maximumf %353, %364 : vector<8x128xf32>
    %c57 = arith.constant 57 : index
    %366 = memref.load %arg1[%c57] : memref<72xf32, #tpu.memory_space<smem>>
    %367 = vector.broadcast %366 : f32 to vector<8x128xf32>
    %368 = arith.mulf %100, %367 : vector<8x128xf32>
    %c58 = arith.constant 58 : index
    %369 = memref.load %arg1[%c58] : memref<72xf32, #tpu.memory_space<smem>>
    %370 = vector.broadcast %369 : f32 to vector<8x128xf32>
    %371 = arith.mulf %140, %370 : vector<8x128xf32>
    %372 = arith.addf %368, %371 : vector<8x128xf32>
    %c59 = arith.constant 59 : index
    %373 = memref.load %arg1[%c59] : memref<72xf32, #tpu.memory_space<smem>>
    %374 = vector.broadcast %373 : f32 to vector<8x128xf32>
    %375 = arith.mulf %60, %374 : vector<8x128xf32>
    %376 = arith.addf %372, %375 : vector<8x128xf32>
    %377 = arith.maximumf %365, %376 : vector<8x128xf32>
    %c60 = arith.constant 60 : index
    %378 = memref.load %arg1[%c60] : memref<72xf32, #tpu.memory_space<smem>>
    %379 = vector.broadcast %378 : f32 to vector<8x128xf32>
    %380 = arith.mulf %100, %379 : vector<8x128xf32>
    %c61 = arith.constant 61 : index
    %381 = memref.load %arg1[%c61] : memref<72xf32, #tpu.memory_space<smem>>
    %382 = vector.broadcast %381 : f32 to vector<8x128xf32>
    %383 = arith.mulf %140, %382 : vector<8x128xf32>
    %384 = arith.addf %380, %383 : vector<8x128xf32>
    %c62 = arith.constant 62 : index
    %385 = memref.load %arg1[%c62] : memref<72xf32, #tpu.memory_space<smem>>
    %386 = vector.broadcast %385 : f32 to vector<8x128xf32>
    %387 = arith.mulf %60, %386 : vector<8x128xf32>
    %388 = arith.addf %384, %387 : vector<8x128xf32>
    %389 = arith.maximumf %377, %388 : vector<8x128xf32>
    %c63 = arith.constant 63 : index
    %390 = memref.load %arg1[%c63] : memref<72xf32, #tpu.memory_space<smem>>
    %391 = vector.broadcast %390 : f32 to vector<8x128xf32>
    %392 = arith.mulf %100, %391 : vector<8x128xf32>
    %c64 = arith.constant 64 : index
    %393 = memref.load %arg1[%c64] : memref<72xf32, #tpu.memory_space<smem>>
    %394 = vector.broadcast %393 : f32 to vector<8x128xf32>
    %395 = arith.mulf %140, %394 : vector<8x128xf32>
    %396 = arith.addf %392, %395 : vector<8x128xf32>
    %c65 = arith.constant 65 : index
    %397 = memref.load %arg1[%c65] : memref<72xf32, #tpu.memory_space<smem>>
    %398 = vector.broadcast %397 : f32 to vector<8x128xf32>
    %399 = arith.mulf %60, %398 : vector<8x128xf32>
    %400 = arith.addf %396, %399 : vector<8x128xf32>
    %401 = arith.maximumf %389, %400 : vector<8x128xf32>
    %c66 = arith.constant 66 : index
    %402 = memref.load %arg1[%c66] : memref<72xf32, #tpu.memory_space<smem>>
    %403 = vector.broadcast %402 : f32 to vector<8x128xf32>
    %404 = arith.mulf %100, %403 : vector<8x128xf32>
    %c67 = arith.constant 67 : index
    %405 = memref.load %arg1[%c67] : memref<72xf32, #tpu.memory_space<smem>>
    %406 = vector.broadcast %405 : f32 to vector<8x128xf32>
    %407 = arith.mulf %140, %406 : vector<8x128xf32>
    %408 = arith.addf %404, %407 : vector<8x128xf32>
    %c68 = arith.constant 68 : index
    %409 = memref.load %arg1[%c68] : memref<72xf32, #tpu.memory_space<smem>>
    %410 = vector.broadcast %409 : f32 to vector<8x128xf32>
    %411 = arith.mulf %60, %410 : vector<8x128xf32>
    %412 = arith.addf %408, %411 : vector<8x128xf32>
    %413 = arith.maximumf %401, %412 : vector<8x128xf32>
    %c69 = arith.constant 69 : index
    %414 = memref.load %arg1[%c69] : memref<72xf32, #tpu.memory_space<smem>>
    %415 = vector.broadcast %414 : f32 to vector<8x128xf32>
    %416 = arith.mulf %100, %415 : vector<8x128xf32>
    %c70 = arith.constant 70 : index
    %417 = memref.load %arg1[%c70] : memref<72xf32, #tpu.memory_space<smem>>
    %418 = vector.broadcast %417 : f32 to vector<8x128xf32>
    %419 = arith.mulf %140, %418 : vector<8x128xf32>
    %420 = arith.addf %416, %419 : vector<8x128xf32>
    %c71 = arith.constant 71 : index
    %421 = memref.load %arg1[%c71] : memref<72xf32, #tpu.memory_space<smem>>
    %422 = vector.broadcast %421 : f32 to vector<8x128xf32>
    %423 = arith.mulf %60, %422 : vector<8x128xf32>
    %424 = arith.addf %420, %423 : vector<8x128xf32>
    %425 = arith.maximumf %413, %424 : vector<8x128xf32>
    %426 = tpu.concatenate %235, %330, %425 in 1 : vector<8x128xf32>, vector<8x128xf32>, vector<8x128xf32> -> vector<8x384xf32>
    %c0_57 = arith.constant 0 : index
    %c0_58 = arith.constant 0 : index
    %427 = vector.load %arg9[%c0_57, %c0_58] : memref<384x75xf32, #tpu.memory_space<vmem>>, vector<384x75xf32>
    %cst_59 = arith.constant dense<0.000000e+00> : vector<8x75xf32>
    %428 = tpu.matmul %426, %427, %cst_59 {dimension_numbers = #tpu.dot_dimension_numbers<[1], [0], [0], [1], [0, 0, 1, 1], [], []>} : vector<8x384xf32>, vector<384x75xf32>, vector<8x75xf32> -> vector<8x75xf32>
    %c0_60 = arith.constant 0 : index
    %c0_61 = arith.constant 0 : index
    %429 = vector.load %arg10[%c0_60, %c0_61] : memref<1x75xf32, #tpu.memory_space<vmem>>, vector<1x75xf32>
    %430 = vector.broadcast %429 : vector<1x75xf32> to vector<8x75xf32>
    %431 = arith.addf %428, %430 : vector<8x75xf32>
    %c0_62 = arith.constant 0 : index
    %c0_63 = arith.constant 0 : index
    %432 = vector.load %arg11[%c0_62, %c0_63] : memref<75x75xf32, #tpu.memory_space<vmem>>, vector<75x75xf32>
    %cst_64 = arith.constant dense<0.000000e+00> : vector<8x75xf32>
    %433 = tpu.matmul %431, %432, %cst_64 {dimension_numbers = #tpu.dot_dimension_numbers<[1], [0], [0], [1], [0, 0, 1, 1], [], []>} : vector<8x75xf32>, vector<75x75xf32>, vector<8x75xf32> -> vector<8x75xf32>
    %c0_65 = arith.constant 0 : index
    %c0_66 = arith.constant 0 : index
    %434 = vector.load %arg12[%c0_65, %c0_66] : memref<1x75xf32, #tpu.memory_space<vmem>>, vector<1x75xf32>
    %435 = vector.broadcast %434 : vector<1x75xf32> to vector<8x75xf32>
    %436 = arith.addf %433, %435 : vector<8x75xf32>
    %cst_67 = arith.constant 0.000000e+00 : f32
    %437 = vector.broadcast %cst_67 : f32 to vector<8x75xf32>
    %438 = arith.maximumf %436, %437 : vector<8x75xf32>
    %c0_68 = arith.constant 0 : index
    %c0_69 = arith.constant 0 : index
    %439 = vector.load %arg13[%c0_68, %c0_69] : memref<75x512xf32, #tpu.memory_space<vmem>>, vector<75x512xf32>
    %cst_70 = arith.constant dense<0.000000e+00> : vector<8x512xf32>
    %440 = tpu.matmul %438, %439, %cst_70 {dimension_numbers = #tpu.dot_dimension_numbers<[1], [0], [0], [1], [0, 0, 1, 1], [], []>} : vector<8x75xf32>, vector<75x512xf32>, vector<8x512xf32> -> vector<8x512xf32>
    %c0_71 = arith.constant 0 : index
    %c0_72 = arith.constant 0 : index
    %441 = vector.load %arg14[%c0_71, %c0_72] : memref<1x512xf32, #tpu.memory_space<vmem>>, vector<1x512xf32>
    %442 = vector.broadcast %441 : vector<1x512xf32> to vector<8x512xf32>
    %443 = arith.addf %440, %442 : vector<8x512xf32>
    %c0_73 = arith.constant 0 : index
    %c0_74 = arith.constant 0 : index
    %444 = vector.load %arg15[%c0_73, %c0_74] : memref<512x256xf32, #tpu.memory_space<vmem>>, vector<512x256xf32>
    %cst_75 = arith.constant dense<0.000000e+00> : vector<8x256xf32>
    %445 = tpu.matmul %443, %444, %cst_75 {dimension_numbers = #tpu.dot_dimension_numbers<[1], [0], [0], [1], [0, 0, 1, 1], [], []>} : vector<8x512xf32>, vector<512x256xf32>, vector<8x256xf32> -> vector<8x256xf32>
    %c0_76 = arith.constant 0 : index
    %c0_77 = arith.constant 0 : index
    %446 = vector.load %arg16[%c0_76, %c0_77] : memref<1x256xf32, #tpu.memory_space<vmem>>, vector<1x256xf32>
    %447 = vector.broadcast %446 : vector<1x256xf32> to vector<8x256xf32>
    %448 = arith.addf %445, %447 : vector<8x256xf32>
    %c0_78 = arith.constant 0 : index
    %c0_79 = arith.constant 0 : index
    %449 = vector.load %arg17[%c0_78, %c0_79] : memref<8x256xf32, #tpu.memory_space<vmem>>, vector<8x256xf32>
    tpu.vector_store %arg17[%c0_78, %c0_79], %448 {strides = array<i32>} : memref<8x256xf32, #tpu.memory_space<vmem>>, vector<8x256xf32>,
    return
  }
  func.func @transform_0(%arg0: i32) -> i32 {
    %c0_i32 = arith.constant 0 : i32
    %c0_i32_0 = arith.constant 0 : i32
    return %c0_i32 : i32
  }
  func.func @transform_1(%arg0: i32) -> (i32, i32, i32) {
    %c0_i32 = arith.constant 0 : i32
    %c0_i32_0 = arith.constant 0 : i32
    %c0_i32_1 = arith.constant 0 : i32
    return %c0_i32, %arg0, %c0_i32_0 : i32, i32, i32
  }
  func.func @transform_2(%arg0: i32) -> (i32, i32, i32) {
    %c0_i32 = arith.constant 0 : i32
    %c0_i32_0 = arith.constant 0 : i32
    %c0_i32_1 = arith.constant 0 : i32
    return %c0_i32, %arg0, %c0_i32_0 : i32, i32, i32
  }
  func.func @transform_3(%arg0: i32) -> (i32, i32, i32) {
    %c0_i32 = arith.constant 0 : i32
    %c0_i32_0 = arith.constant 0 : i32
    %c0_i32_1 = arith.constant 0 : i32
    return %c0_i32, %arg0, %c0_i32_0 : i32, i32, i32
  }
  func.func @transform_4(%arg0: i32) -> (i32, i32, i32) {
    %c0_i32 = arith.constant 0 : i32
    %c0_i32_0 = arith.constant 0 : i32
    %c0_i32_1 = arith.constant 0 : i32
    %c0_i32_2 = arith.constant 0 : i32
    return %c0_i32, %c0_i32_0, %c0_i32_1 : i32, i32, i32
  }
  func.func @transform_5(%arg0: i32) -> (i32, i32, i32) {
    %c0_i32 = arith.constant 0 : i32
    %c0_i32_0 = arith.constant 0 : i32
    %c0_i32_1 = arith.constant 0 : i32
    %c0_i32_2 = arith.constant 0 : i32
    return %c0_i32, %c0_i32_0, %c0_i32_1 : i32, i32, i32
  }
  func.func @transform_6(%arg0: i32) -> (i32, i32, i32) {
    %c0_i32 = arith.constant 0 : i32
    %c0_i32_0 = arith.constant 0 : i32
    %c0_i32_1 = arith.constant 0 : i32
    %c0_i32_2 = arith.constant 0 : i32
    return %c0_i32, %c0_i32_0, %c0_i32_1 : i32, i32, i32
  }
  func.func @transform_7(%arg0: i32) -> (i32, i32, i32) {
    %c0_i32 = arith.constant 0 : i32
    %c0_i32_0 = arith.constant 0 : i32
    %c0_i32_1 = arith.constant 0 : i32
    %c0_i32_2 = arith.constant 0 : i32
    return %c0_i32, %c0_i32_0, %c0_i32_1 : i32, i32, i32
  }
  func.func @transform_8(%arg0: i32) -> (i32, i32) {
    %c0_i32 = arith.constant 0 : i32
    %c0_i32_0 = arith.constant 0 : i32
    %c0_i32_1 = arith.constant 0 : i32
    return %c0_i32, %c0_i32_0 : i32, i32
  }
  func.func @transform_9(%arg0: i32) -> (i32, i32) {
    %c0_i32 = arith.constant 0 : i32
    %c0_i32_0 = arith.constant 0 : i32
    %c0_i32_1 = arith.constant 0 : i32
    return %c0_i32, %c0_i32_0 : i32, i32
  }
  func.func @transform_10(%arg0: i32) -> (i32, i32) {
    %c0_i32 = arith.constant 0 : i32
    %c0_i32_0 = arith.constant 0 : i32
    %c0_i32_1 = arith.constant 0 : i32
    return %c0_i32, %c0_i32_0 : i32, i32
  }
  func.func @transform_11(%arg0: i32) -> (i32, i32) {
    %c0_i32 = arith.constant 0 : i32
    %c0_i32_0 = arith.constant 0 : i32
    %c0_i32_1 = arith.constant 0 : i32
    return %c0_i32, %c0_i32_0 : i32, i32
  }
  func.func @transform_12(%arg0: i32) -> (i32, i32) {
    %c0_i32 = arith.constant 0 : i32
    %c0_i32_0 = arith.constant 0 : i32
    %c0_i32_1 = arith.constant 0 : i32
    return %c0_i32, %c0_i32_0 : i32, i32
  }
  func.func @transform_13(%arg0: i32) -> (i32, i32) {
    %c0_i32 = arith.constant 0 : i32
    %c0_i32_0 = arith.constant 0 : i32
    %c0_i32_1 = arith.constant 0 : i32
    return %c0_i32, %c0_i32_0 : i32, i32
  }
  func.func @transform_14(%arg0: i32) -> (i32, i32) {
    %c0_i32 = arith.constant 0 : i32
    %c0_i32_0 = arith.constant 0 : i32
    %c0_i32_1 = arith.constant 0 : i32
    return %c0_i32, %c0_i32_0 : i32, i32
  }
  func.func @transform_15(%arg0: i32) -> (i32, i32) {
    %c0_i32 = arith.constant 0 : i32
    %c0_i32_0 = arith.constant 0 : i32
    %c0_i32_1 = arith.constant 0 : i32
    return %c0_i32, %c0_i32_0 : i32, i32
  }
  func.func @transform_16(%arg0: i32) -> (i32, i32) {
    %c0_i32 = arith.constant 0 : i32
    %c0_i32_0 = arith.constant 0 : i32
    return %arg0, %c0_i32 : i32, i32
  }
}

</mosaic_0001>

<bundles_post_ra>
// kernel: forward.1
= control target key start
LH: loop header
LB: loop body
LE: loop exit
PB: predicated region body
PF: predicated region fallthrough
CT: control target
= control target key end

     0   :  { %s7699_s0 = inlined_call_operand.vmem [shape: f32[72], index: 0, kind: input, shape index: {}]   ;;  %s7700_s1 = inlined_call_operand.vmem [shape: f32[3,8,16], index: 1, kind: input, shape index: {}]   ;;  %s7701_s2 = inlined_call_operand.vmem [shape: f32[3,8,16], index: 2, kind: input, shape index: {}]   ;;  %s7702_s3 = inlined_call_operand.vmem [shape: f32[3,8,16], index: 3, kind: input, shape index: {}]   ;;  %s7703_s4 = inlined_call_operand.vmem [shape: f32[1,1,128], index: 4, kind: input, shape index: {}]   ;;  %s7704_s5 = inlined_call_operand.vmem [shape: f32[1,1,128], index: 5, kind: input, shape index: {}]   ;;  %s7705_s6 = inlined_call_operand.vmem [shape: f32[1,1,128], index: 6, kind: input, shape index: {}]   ;;  %s7706_s7 = inlined_call_operand.vmem [shape: f32[1,1,128], index: 7, kind: input, shape index: {}]   ;;  %s7707_s8 = inlined_call_operand.vmem [shape: f32[384,75], index: 8, kind: input, shape index: {}]   ;;  %s7708_s9 = inlined_call_operand.vmem [shape: f32[1,75], index: 9, kind: input, shape index: {}]   ;;  %s7709_s10 = inlined_call_operand.vmem [shape: f32[75,75], index: 10, kind: input, shape index: {}]   ;;  %s7710_s11 = inlined_call_operand.vmem [shape: f32[1,75], index: 11, kind: input, shape index: {}]   ;;  %s7711_s12 = inlined_call_operand.vmem [shape: f32[75,512], index: 12, kind: input, shape index: {}]   ;;  %s7712_s13 = inlined_call_operand.vmem [shape: f32[1,512], index: 13, kind: input, shape index: {}]   ;;  %s7713_s14 = inlined_call_operand.hbm [shape: f32[512,256], index: 14, kind: input, shape index: {}]   ;;  %s7714_s15 = inlined_call_operand.vmem [shape: f32[1,256], index: 15, kind: input, shape index: {}]   ;;  %s7715_s16 = inlined_call_operand.vmem [shape: f32[8,256], index: 16, kind: output, shape index: {}]  }
   0x1   :  { %7905 = sst [smem:[#allocation138_spill]] %s7699_s0 }
   0x2   :  { %21 = vsyncpa [#allocation4], 0  ;;  %s7906_s23 = sld [smem:[#allocation138_spill]] }
   0x8   :  { %s28_s24 = sshll.u32 %s7906_s23, 4  ;;  %s29_s24 = int_to_ptr.vmem [resolvable:$true] %s28_s24 }
   0x9   :  { %22 = vsyncpa [#allocation3], 0  ;;  %s62_s27 = sshll.u32 %s7713_s14, 4  ;;  %s4016_s28 = smov [#allocation2]   ;;  %s63_s27 = int_to_ptr.hbm [resolvable:$true] %s62_s27 }
   0xa   :  { %31 = dma.vmem_to_smem %s29_s24, 16, %s4016_s28, [#allocation4]  }
   0xb   :  { %s4017_s29 = smov [#allocation5]   ;;  %s4018_s0 = smov 256  }
   0xc   :  { %s64_s30 = sshll.u32 %s4017_s29, 4  ;;  %s4019_s17 = smov 16   ;;  %s65_s30 = int_to_ptr.vmem [resolvable:$true] %s64_s30 }
   0xd   :  { %70 = dma.hbm_to_vmem [thread:$0]  %s63_s27, 16384, %s65_s30, [#allocation3], %s4018_s0, %s4018_s0, %s4019_s17  }
   0xe   :  { %4012 = dma.done.wait [#allocation4], 16  }
   0xf   :  { %4013 = vsyncadd [#allocation4], 4294967280 }
  0x10   :  { %4014 = dma.done.wait [#allocation3], 16384  }
  0x11   :  { %4015 = vsyncadd [#allocation3], 4294950912 }
  0x12   :  { %81 = sfence }
  0x13   :  { %v135_v0 = vlaneseq  ;;  %v82_v1 = vld [vmem:[%s7700_s1] sm:$0xff]  ;;  %v4020_v4 = vmov 0.1   ;;  %v4131_v16 = vld [vmem:[%s7700_s1 + $0x10] sm:$0xff]  ;;  %v83_v35 = vld [vmem:[%s7700_s1 + $0x8] sm:$0xff]  ;;  %s4749_s1 = sld [smem:[#allocation2 + $0x32]] }
  0x14   :  { %v85_v2 = vld [vmem:[%s7701_s2] sm:$0xff]  ;;  %3864 = vrcp.f32 %v4020_v4  ;;  %v4136_v17 = vld [vmem:[%s7701_s2 + $0x10] sm:$0xff]  ;;  %v86_v36 = vld [vmem:[%s7701_s2 + $0x8] sm:$0xff]  ;;  %s4753_s2 = sld [smem:[#allocation2 + $0x35]]  ;;  %vm3062_vm4 = vcmask 1041409   ;;  %vm3064_vm5 = vcmask 1042434  }
  0x15   :  { %v91_v3 = vadd.f32 %v85_v2, %v82_v1  ;;  %v4118_v5 = vshrl.u32 %v135_v0, 7  ;;  %v97_v7 = vsub.f32 %v85_v2, %v82_v1  ;;  %v99_v20 = vsub.f32 %v4136_v17, %v4131_v16  ;;  %v4211_v4 = vld [vmem:[%s7702_s3 + $0x8] sm:$0xff]  ;;  %s4763_s0 = sld [smem:[#allocation2 + $0x38]] }
  0x16   :  { %v92_v39 = vadd.f32 %v86_v36, %v83_v35  ;;  %v98_v40 = vsub.f32 %v86_v36, %v83_v35  ;;  %v93_v61 = vadd.f32 %v4136_v17, %v4131_v16  ;;  %s4781_s19 = sld [smem:[#allocation2 + $0x3e]]  ;;  %vm3066_vm6 = vcmask 1043459  }
  0x17   :  { %3799 = vset.pattern.permute.xlu2 %v4118_v5  ;;  %3798 = vset.pattern.permute.xlu1 %v4118_v5  ;;  %v4122_v6 = vmul.f32 0.70710677, %v91_v3  ;;  %v100_v13 = vmul.f32 0.70710677, %v97_v7  ;;  %v4143_v21 = vadd.s32 8, %v4118_v5  ;;  %v7719_v7 = vperm.slane %v4211_v4, 2 }
  0x18   :  { %3797 = vset.pattern.permute.xlu0 %v4118_v5  ;;  %v102_v25 = vmul.f32 0.70710677, %v99_v20  ;;  %v4164_v42 = vmul.f32 0.70710677, %v92_v39  ;;  %v101_v43 = vmul.f32 0.70710677, %v98_v40 }
  0x19   :  { %v160_v9 = vperm.slane %v4122_v6, 2  ;;  %v147_v10 = vperm.slane %v4122_v6, 1  ;;  %v134_v12 = vperm.slane %v4122_v6, 0  ;;  %v106_v18 = vmax.f32 %v100_v13, 1e-30  ;;  %7907 = vst [vmem:[#allocation8_spill] sm:$0xff] %v4143_v21 }
  0x1a   :  { %v3865_v8 = vpop.eup %3864  ;;  %v186_v23 = vperm.slane %v4122_v6, 4  ;;  %v108_v26 = vmax.f32 %v102_v25, 1e-30  ;;  %vm103_vm1 = vcmp.le.f32.partialorder %v100_v13, 0.1  ;;  %v173_v33 = vperm.slane %v4122_v6, 3 }
  0x1b   :  { %v110_v11 = vmul.f32 0.1, %v3865_v8  ;;  %vm114_vm0 = vweird.f32 %v3865_v8  ;;  %v707_v45 = vperm.slane %v4164_v42, 1  ;;  %v107_v46 = vmax.f32 %v101_v43, 1e-30  ;;  %s4787_s14 = sld [smem:[#allocation2 + $0x44]] }
  0x1c   :  { %v199_v47 = vperm.slane %v4122_v6, 5  ;;  %vm105_vm2 = vcmp.le.f32.partialorder %v102_v25, 0.1  ;;  %v212_v52 = vperm.slane %v4122_v6, 6  ;;  %v7730_v57 = vperm.slane %v4164_v42, 4  ;;  %s4790_s20 = sld [smem:[#allocation2 + $0x47]] }
  0x1d   :  { %v111_v14 = vsub.f32 1.0, %v110_v11  ;;  %v225_v58 = vperm.slane %v4122_v6, 7  ;;  %vm104_vm3 = vcmp.le.f32.partialorder %v101_v43, 0.1  ;;  %v4195_v0 = vmul.f32 0.70710677, %v93_v61 }
  0x1e   :  { %v7724_v61 = vperm.slane %v4164_v42, 7  ;;  %s4794_s21 = sld [smem:[#allocation2 + $0x1]]  ;;  %vm3068_vm7 = vcmask 1044484   ;;  %vm3070_vm8 = vcmask 1045509   ;;  %vm3072_vm9 = vcmask 1046534  }
  0x1f   :  { %165 = vperm.xlu2 %3799, %v160_v9   ;;  %152 = vperm.xlu1 %3798, %v147_v10   ;;  %v112_v15 = vmul.f32 %v3865_v8, %v111_v14  ;;  %v7723_v1 = vperm.slane %v4195_v0, 6  ;;  %v4236_v14 = vld [vmem:[%s7702_s3 + $0x10] sm:$0xff]  ;;  %s4798_s22 = sld [smem:[#allocation2 + $0x4]]  ;;  %vm3074_vm10 = vcmask 1047559   ;;  %vm3239_vm11 = vcmask 1042432  }
  0x20   :  { %139 = vperm.xlu0 %3797, %v134_v12   ;;  %7909 = vst [vmem:[#allocation10_spill] sm:$0xff] %v4236_v14  ;;  %s4927_s27 = sld [smem:[#allocation2 + $0xd]]  ;;  %vm3235_vm12 = vcmask 613376  }
  0x21   :  { %v113_v19 = vadd.f32 %v3865_v8, %v112_v15  ;;  %v7716_v15 = vperm.slane %v4236_v14, 7  ;;  %s5041_s28 = sld [smem:[#allocation2 + $0x10]] }
  0x22   :  { %s5098_s29 = sld [smem:[#allocation2 + $0x13]] }
  0x23   :  { %v115_v22 = vsel %vm114_vm0, %v3865_v8, %v113_v19  ;;  %s5114_s30 = sld [smem:[#allocation2 + $0x16]] }
  0x24   :  { %v116_v24 = vmul.f32 %v115_v22, %v106_v18  ;;  %v118_v29 = vmul.f32 %v115_v22, %v108_v26  ;;  %v117_v49 = vmul.f32 %v115_v22, %v107_v46  ;;  %s5127_s17 = sld [smem:[#allocation2 + $0x1b]] }
  0x25   :  { %s5129_s18 = sld [smem:[#allocation2 + $0x1e]] }
  0x26   :  { %3866 = vlog2.f32 %v116_v24  ;;  %s5193_s23 = sld [smem:[#allocation2 + $0x24]] }
  0x27   :  { %3802 = vset.pattern.permute.xlu2 %v4143_v21  ;;  %3800 = vset.pattern.permute.xlu1 %v4143_v21  ;;  %3868 = vlog2.f32 %v118_v29  ;;  %s5204_s24 = sld [smem:[#allocation2 + $0x27]] }
  0x28   :  { %191 = vperm.xlu0 %3797, %v186_v23   ;;  %3870 = vlog2.f32 %v117_v49  ;;  %s5208_s25 = sld [smem:[#allocation2 + $0x42]] }
  0x29   :  { %s5220_s26 = sld [smem:[#allocation2 + $0x45]] }
  0x2c   :  { %v3867_v27 = vpop.eup %3866 }
  0x2d   :  { %v120_v28 = vmul.f32 0.6931472, %v3867_v27  ;;  %v3869_v37 = vpop.eup %3868 }
  0x2e   :  { %v124_v41 = vmul.f32 0.6931472, %v3869_v37  ;;  %v3871_v53 = vpop.eup %3870  ;;  %v720_v37 = vperm.slane %v4164_v42, 2 }
  0x2f   :  { %171 = vperm.xlu2 %3802, %v160_v9   ;;  %158 = vperm.xlu1 %3800, %v147_v10   ;;  %v125_v30 = vmul.f32 0.1, %v120_v28  ;;  %v122_v55 = vmul.f32 0.6931472, %v3871_v53  ;;  %v7718_v9 = vperm.slane %v4211_v4, 4  ;;  %v4226_v10 = vld [vmem:[%s7702_s3] sm:$0xff] }
  0x30   :  { %v127_v44 = vmul.f32 0.1, %v124_v41  ;;  %7908 = vst [vmem:[#allocation9_spill] sm:$0xff] %v4226_v10  ;;  %v7717_v11 = vperm.slane %v4226_v10, 4  ;;  %v355_v29 = vperm.slane %v4226_v10, 1 }
  0x31   :  { %v128_v31 = vadd.f32 0.1, %v125_v30  ;;  %v126_v56 = vmul.f32 0.1, %v122_v55 }
  0x32   :  { %v130_v48 = vadd.f32 0.1, %v127_v44 }
  0x33   :  { %v4148_v32 = vsel %vm103_vm1, %v128_v31, %v100_v13  ;;  %v129_v59 = vadd.f32 0.1, %v126_v56 }
  0x34   :  { %v251_v34 = vperm.slane %v4148_v32, 1  ;;  %v316_v38 = vperm.slane %v4148_v32, 6  ;;  %v4172_v50 = vsel %vm105_vm2, %v130_v48, %v102_v25  ;;  %v238_v63 = vperm.slane %v4148_v32, 0 }
  0x35   :  { %v1342_v51 = vperm.slane %v4172_v50, 0  ;;  %v7732_v54 = vperm.slane %v4172_v50, 2  ;;  %v4189_v60 = vsel %vm104_vm3, %v129_v59, %v101_v43  ;;  %v7720_v2 = vperm.slane %v4172_v50, 7  ;;  %v4331_v59 = vld [vmem:[%s7703_s4] ss:$0 sm:$0xff] }
  0x36   :  { %256 = vperm.xlu0 %3797, %v251_v34   ;;  %v7725_v62 = vperm.slane %v4189_v60, 5  ;;  %v264_v3 = vperm.slane %v4148_v32, 2  ;;  %v277_v8 = vperm.slane %v4148_v32, 3  ;;  %v290_v13 = vperm.slane %v4148_v32, 4 }
  0x37   :  { %184 = vperm.xlu2 %3802, %v173_v33   ;;  %3801 = vset.pattern.permute.xlu1 %v4118_v5  ;;  %v303_v16 = vperm.slane %v4148_v32, 5  ;;  %v329_v22 = vperm.slane %v4148_v32, 7  ;;  %v342_v25 = vperm.slane %v4226_v10, 0  ;;  %v811_v32 = vperm.slane %v4189_v60, 1 }
  0x38   :  { %v7733_v40 = vperm.slane %v4189_v60, 3  ;;  %v798_v43 = vperm.slane %v4189_v60, 0  ;;  %v7726_v53 = vperm.slane %v4172_v50, 5 }
  0x3e   :  { %321 = vperm.xlu0 %3797, %v316_v38  }
  0x3f   :  { %3804 = vset.pattern.permute.xlu2 %v4118_v5  ;;  %178 = vperm.xlu1 %3801, %v173_v33   ;;  %v694_v33 = vperm.slane %v4164_v42, 0 }
  0x46   :  { %712 = vperm.xlu0 %3797, %v707_v45  }
  0x47   :  { %204 = vperm.xlu2 %3804, %v199_v47   ;;  %3803 = vset.pattern.permute.xlu1 %v4143_v21 }
  0x4e   :  { %1347 = vperm.xlu0 %3797, %v1342_v51  }
  0x4f   :  { %217 = vperm.xlu2 %3804, %v212_v52   ;;  %197 = vperm.xlu1 %3803, %v186_v23  }
  0x56   :  { %1373 = vperm.xlu0 %3797, %v7732_v54  }
  0x57   :  { %3806 = vset.pattern.permute.xlu2 %v4143_v21  ;;  %210 = vperm.xlu1 %3803, %v199_v47   ;;  %v7731_v47 = vperm.slane %v4195_v0, 4 }
  0x5e   :  { %751 = vperm.xlu0 %3797, %v7730_v57  }
  0x5f   :  { %236 = vperm.xlu2 %3806, %v225_v58   ;;  %3805 = vset.pattern.permute.xlu1 %v4118_v5 }
  0x66   :  { %868 = vperm.xlu0 %3797, %v7725_v62  }
  0x67   :  { %249 = vperm.xlu2 %3806, %v238_v63   ;;  %230 = vperm.xlu1 %3805, %v225_v58  }
  0x6e   :  { %1321 = vperm.xlu0 %3797, %v7723_v1  }
  0x6f   :  { %3808 = vset.pattern.permute.xlu2 %v4118_v5  ;;  %243 = vperm.xlu1 %3805, %v238_v63  }
  0x76   :  { %1438 = vperm.xlu0 %3797, %v7720_v2  }
  0x77   :  { %269 = vperm.xlu2 %3808, %v264_v3   ;;  %3807 = vset.pattern.permute.xlu1 %v4143_v21 }
  0x79   :  { %v4244_v18 = vpop.permute.xlu2 %165 }
  0x7e   :  { %933 = vperm.xlu0 %3797, %v7719_v7  }
  0x7f   :  { %282 = vperm.xlu2 %3808, %v277_v8   ;;  %262 = vperm.xlu1 %3807, %v251_v34  }
  0x86   :  { %959 = vperm.xlu0 %3797, %v7718_v9  }
  0x87   :  { %3810 = vset.pattern.permute.xlu2 %v4143_v21  ;;  %275 = vperm.xlu1 %3807, %v264_v3  }
  0x89   :  { %v4250_v20 = vpop.permute.xlu2 %171 }
  0x8e   :  { %399 = vperm.xlu0 %3797, %v7717_v11   ;;  %v7721_v11 = vperm.slane %v4211_v4, 3 }
  0x8f   :  { %301 = vperm.xlu2 %3810, %v290_v13   ;;  %3809 = vset.pattern.permute.xlu1 %v4118_v5 }
  0x91   :  { %v4258_v24 = vpop.permute.xlu2 %184  ;;  %v4267_v27 = vpop.permute.xlu1 %152 }
  0x92   :  { %v4240_v17 = vpop.permute.xlu0 %139 }
  0x93   :  { %v450_v63 = vsub.f32 %v4240_v17, %v4331_v59  ;;  %v4353_v17 = vld [vmem:[%s7705_s6] ss:$0 sm:$0xff] }
  0x96   :  { %1542 = vperm.xlu0 %3797, %v7716_v15  }
  0x97   :  { %314 = vperm.xlu2 %3810, %v303_v16   ;;  %295 = vperm.xlu1 %3809, %v290_v13   ;;  %v486_v13 = vmul.f32 %v450_v63, %v450_v63 }
  0x9a   :  { %v4247_v19 = vpop.permute.xlu0 %191 }
  0x9b   :  { %v458_v2 = vsub.f32 %v4247_v19, %v4331_v59 }
  0x9e   :  { %3855 = vset.pattern.permute.xlu0 %v4143_v21 }
  0x9f   :  { %3812 = vset.pattern.permute.xlu2 %v4118_v5  ;;  %308 = vperm.xlu1 %3809, %v303_v16  }
  0xa1   :  { %v4275_v6 = vpop.permute.xlu1 %158 }
  0xa6   :  { %145 = vperm.xlu0 %3855, %v134_v12   ;;  %v4269_v12 = vpop.permute.xlu2 %204 }
  0xa7   :  { %334 = vperm.xlu2 %3812, %v329_v22   ;;  %3811 = vset.pattern.permute.xlu1 %v4143_v21 }
  0xa8   :  { %v4256_v23 = vpop.permute.xlu0 %256 }
  0xae   :  { %223 = vperm.xlu0 %3855, %v212_v52   ;;  %v4277_v30 = vpop.permute.xlu2 %217 }
  0xaf   :  { %347 = vperm.xlu2 %3812, %v342_v25   ;;  %327 = vperm.xlu1 %3811, %v316_v38  }
  0xb0   :  { %v4265_v26 = vpop.permute.xlu0 %321 }
  0xb1   :  { %v4284_v34 = vpop.permute.xlu1 %178 }
  0xb6   :  { %288 = vperm.xlu0 %3855, %v277_v8   ;;  %v1238_v8 = vperm.slane %v4195_v0, 0 }
  0xb7   :  { %3814 = vset.pattern.permute.xlu2 %v4143_v21  ;;  %340 = vperm.xlu1 %3811, %v329_v22  }
  0xb8   :  { %v4272_v28 = vpop.permute.xlu0 %712 }
  0xb9   :  { %v4288_v36 = vpop.permute.xlu2 %236 }
  0xbe   :  { %353 = vperm.xlu0 %3855, %v342_v25  }
  0xbf   :  { %366 = vperm.xlu2 %3814, %v355_v29   ;;  %3813 = vset.pattern.permute.xlu1 %v4118_v5 }
  0xc0   :  { %v4280_v31 = vpop.permute.xlu0 %1347 }
  0xc1   :  { %v4291_v38 = vpop.permute.xlu1 %197  ;;  %v4299_v41 = vpop.permute.xlu2 %249 }
  0xc6   :  { %822 = vperm.xlu0 %3855, %v811_v32  }
  0xc7   :  { %705 = vperm.xlu2 %3814, %v694_v33   ;;  %360 = vperm.xlu1 %3813, %v355_v29   ;;  %v4358_v29 = vld [vmem:[%s7706_s7] ss:$0 sm:$0xff] }
  0xc8   :  { %v4286_v35 = vpop.permute.xlu0 %1373 }
  0xc9   :  { %v4302_v44 = vpop.permute.xlu1 %210 }
  0xce   :  { %731 = vperm.xlu0 %3855, %v720_v37  }
  0xcf   :  { %3816 = vset.pattern.permute.xlu2 %v4118_v5  ;;  %699 = vperm.xlu1 %3813, %v694_v33   ;;  %v506_v33 = vmul.f32 %v4353_v17, %v486_v13 }
  0xd0   :  { %v4296_v39 = vpop.permute.xlu0 %751 }
  0xd1   :  { %v4310_v48 = vpop.permute.xlu2 %269 }
  0xd6   :  { %848 = vperm.xlu0 %3855, %v7733_v40  }
  0xd7   :  { %803 = vperm.xlu2 %3816, %v798_v43   ;;  %3815 = vset.pattern.permute.xlu1 %v4143_v21 }
  0xd8   :  { %v4307_v46 = vpop.permute.xlu0 %868 }
  0xd9   :  { %v4312_v49 = vpop.permute.xlu1 %230  ;;  %v4323_v55 = vpop.permute.xlu2 %282 }
  0xde   :  { %1301 = vperm.xlu0 %3855, %v7731_v47  }
  0xdf   :  { %816 = vperm.xlu2 %3816, %v811_v32   ;;  %718 = vperm.xlu1 %3815, %v707_v45   ;;  %v4336_v45 = vld [vmem:[%s7704_s5] ss:$0 sm:$0xff]  ;;  %v7722_v32 = vperm.slane %v4211_v4, 1 }
  0xe0   :  { %v4318_v52 = vpop.permute.xlu0 %1321 }
  0xe1   :  { %v244_v56 = vpop.permute.xlu1 %243 }
  0xe2   :  { %v470_v3 = vsub.f32 %v244_v56, %v4336_v45  ;;  %v1251_v56 = vperm.slane %v4195_v0, 1 }
  0xe4   :  { %v522_v16 = vmul.f32 %v470_v3, %v470_v3 }
  0xe6   :  { %1418 = vperm.xlu0 %3855, %v7726_v53  }
  0xe7   :  { %3818 = vset.pattern.permute.xlu2 %v4143_v21  ;;  %809 = vperm.xlu1 %3815, %v798_v43   ;;  %v542_v43 = vmul.f32 %v4358_v29, %v522_v16 }
  0xe8   :  { %v4326_v58 = vpop.permute.xlu0 %1438 }
  0xe9   :  { %v4345_v22 = vpop.permute.xlu2 %301  ;;  %v558_v63 = vadd.f32 %v542_v43, %v506_v33  ;;  %v1355_v43 = vperm.slane %v4172_v50, 1 }
  0xeb   :  { %v574_v7 = vsub.f32 0.0, %v558_v63 }
  0xed   :  { %v590_v13 = vmul.f32 1.442695, %v574_v7  ;;  %v494_v7 = vmul.f32 %v458_v2, %v458_v2 }
  0xee   :  { %796 = vperm.xlu0 %3855, %v7724_v61  }
  0xef   :  { %1249 = vperm.xlu2 %3818, %v1238_v8   ;;  %3817 = vset.pattern.permute.xlu1 %v4118_v5  ;;  %3872 = vpow2.f32 %v590_v13  ;;  %v7729_v13 = vperm.slane %v4236_v14, 6  ;;  %v514_v62 = vmul.f32 %v4353_v17, %v494_v7 }
  0xf0   :  { %v4348_v25 = vpop.permute.xlu0 %933 }
  0xf1   :  { %7910 = vst [vmem:[#allocation11_spill] sm:$0xff] %v4348_v25  ;;  %v263_v3 = vpop.permute.xlu1 %262  ;;  %v4366_v15 = vpop.permute.xlu2 %314 }
  0xf6   :  { %926 = vperm.xlu0 %3855, %v7722_v32  }
  0xf7   :  { %1262 = vperm.xlu2 %3818, %v1251_v56   ;;  %1243 = vperm.xlu1 %3817, %v1238_v8   ;;  %v7727_v8 = vperm.slane %v4226_v10, 3 }
  0xf8   :  { %v4369_v9 = vpop.permute.xlu0 %959 }
  0xf9   :  { %7911 = vst [vmem:[#allocation12_spill] sm:$0xff] %v4369_v9  ;;  %v4374_v16 = vpop.permute.xlu1 %275 }
  0xfe   :  { %952 = vperm.xlu0 %3855, %v7721_v11  }
  0xff   :  { %3820 = vset.pattern.permute.xlu2 %v4118_v5  ;;  %1256 = vperm.xlu1 %3817, %v1251_v56   ;;  %v3873_v56 = vpop.eup %3872 }
 0x100   :  { %v400_v63 = vpop.permute.xlu0 %399 }
 0x101   :  { %v4376_v33 = vpop.permute.xlu2 %334 }
 0x106   :  { %392 = vperm.xlu0 %3855, %v7727_v8  }
 0x107   :  { %1360 = vperm.xlu2 %3820, %v1355_v43   ;;  %3819 = vset.pattern.permute.xlu1 %v4143_v21 }
 0x108   :  { %v4393_v8 = vpop.permute.xlu0 %1542 }
 0x109   :  { %v348_v11 = vpop.permute.xlu2 %347  ;;  %v296_v32 = vpop.permute.xlu1 %295  ;;  %7912 = vst [vmem:[#allocation13_spill] sm:$0xff] %v4393_v8 }
 0x10a   :  { %v4385_v1 = vmul.f32 %v3873_v56, %v348_v11  ;;  %v478_v61 = vsub.f32 %v296_v32, %v4336_v45  ;;  %v7728_v32 = vperm.slane %v4226_v10, 7 }
 0x10c   :  { %v530_v19 = vmul.f32 %v478_v61, %v478_v61  ;;  %v471_v61 = vsub.f32 %v4299_v41, %v4336_v45  ;;  %v824_v41 = vperm.slane %v4189_v60, 2 }
 0x10e   :  { %v550_v53 = vmul.f32 %v4358_v29, %v530_v19  ;;  %1535 = vperm.xlu0 %3855, %v7729_v13  }
 0x10f   :  { %725 = vperm.xlu2 %3820, %v720_v37   ;;  %1353 = vperm.xlu1 %3819, %v1342_v51   ;;  %v523_v37 = vmul.f32 %v471_v61, %v471_v61 }
 0x110   :  { %v566_v2 = vadd.f32 %v550_v53, %v514_v62  ;;  %v472_v62 = vsub.f32 %v4256_v23, %v4336_v45  ;;  %v473_v53 = vsub.f32 %v263_v3, %v4336_v45 }
 0x111   :  { %v4405_v19 = vpop.permute.xlu1 %308  ;;  %v543_v61 = vmul.f32 %v4358_v29, %v523_v37 }
 0x112   :  { %v582_v11 = vsub.f32 0.0, %v566_v2  ;;  %v524_v13 = vmul.f32 %v472_v62, %v472_v62  ;;  %v525_v23 = vmul.f32 %v473_v53, %v473_v53 }
 0x114   :  { %v606_v56 = vmul.f32 1.442695, %v582_v11 }
 0x116   :  { %3874 = vpow2.f32 %v606_v56  ;;  %444 = vperm.xlu0 %3855, %v7728_v32   ;;  %v452_v56 = vsub.f32 %v4267_v27, %v4331_v59 }
 0x117   :  { %3822 = vset.pattern.permute.xlu2 %v4143_v21  ;;  %1366 = vperm.xlu1 %3819, %v1355_v43   ;;  %v453_v43 = vsub.f32 %v4275_v6, %v4331_v59  ;;  %v544_v6 = vmul.f32 %v4358_v29, %v524_v13 }
 0x118   :  { %v146_v7 = vpop.permute.xlu0 %145 }
 0x119   :  { %v451_v51 = vsub.f32 %v146_v7, %v4331_v59  ;;  %v367_v3 = vpop.permute.xlu2 %366  ;;  %v489_v54 = vmul.f32 %v453_v43, %v453_v43 }
 0x11b   :  { %v487_v2 = vmul.f32 %v451_v51, %v451_v51  ;;  %v488_v51 = vmul.f32 %v452_v56, %v452_v56  ;;  %v509_v56 = vmul.f32 %v4353_v17, %v489_v54 }
 0x11c   :  { %v3875_v11 = vpop.eup %3874 }
 0x11d   :  { %v507_v32 = vmul.f32 %v4353_v17, %v487_v2  ;;  %v4418_v7 = vmul.f32 %v3875_v11, %v400_v63  ;;  %v545_v63 = vmul.f32 %v4358_v29, %v525_v23  ;;  %v508_v53 = vmul.f32 %v4353_v17, %v488_v51 }
 0x11f   :  { %7913 = vst [vmem:[#allocation14_spill] sm:$0xff] %v4418_v7  ;;  %v559_v57 = vadd.f32 %v543_v61, %v507_v32  ;;  %835 = vperm.xlu2 %3822, %v824_v41   ;;  %3821 = vset.pattern.permute.xlu1 %v4118_v5  ;;  %v1264_v32 = vperm.slane %v4195_v0, 2  ;;  %v560_v61 = vadd.f32 %v544_v6, %v508_v53 }
 0x120   :  { %v224_v47 = vpop.permute.xlu0 %223  ;;  %v561_v13 = vadd.f32 %v545_v63, %v509_v56  ;;  %v1008_v53 = vsub.f32 %v4272_v28, %v4331_v59 }
 0x121   :  { %v463_v27 = vsub.f32 %v224_v47, %v4331_v59  ;;  %v328_v40 = vpop.permute.xlu1 %327  ;;  %v575_v37 = vsub.f32 0.0, %v559_v57  ;;  %v706_v57 = vpop.permute.xlu2 %705 }
 0x122   :  { %v483_v2 = vsub.f32 %v328_v40, %v4336_v45  ;;  %v577_v51 = vsub.f32 0.0, %v561_v13 }
 0x123   :  { %v499_v62 = vmul.f32 %v463_v27, %v463_v27  ;;  %v592_v47 = vmul.f32 1.442695, %v575_v37  ;;  %v576_v27 = vsub.f32 0.0, %v560_v61 }
 0x124   :  { %v535_v11 = vmul.f32 %v483_v2, %v483_v2  ;;  %v596_v8 = vmul.f32 1.442695, %v577_v51 }
 0x125   :  { %v519_v43 = vmul.f32 %v4353_v17, %v499_v62  ;;  %3876 = vpow2.f32 %v592_v47  ;;  %v594_v2 = vmul.f32 1.442695, %v576_v27 }
 0x126   :  { %v555_v7 = vmul.f32 %v4358_v29, %v535_v11  ;;  %v1040_v11 = vmul.f32 %v1008_v53, %v1008_v53 }
 0x127   :  { %1275 = vperm.xlu2 %3822, %v1264_v32   ;;  %829 = vperm.xlu1 %3821, %v824_v41   ;;  %3878 = vpow2.f32 %v594_v2 }
 0x128   :  { %v4430_v40 = vadd.f32 %v555_v7, %v519_v43  ;;  %v4432_v23 = vpop.permute.xlu0 %288  ;;  %3880 = vpow2.f32 %v596_v8  ;;  %v733_v7 = vperm.slane %v4164_v42, 3 }
 0x129   :  { %v4435_v37 = vpop.permute.xlu1 %340 }
 0x12a   :  { %7914 = vst [vmem:[#allocation15_spill] sm:$0xff] %v4430_v40 }
 0x12b   :  { %v3877_v54 = vpop.eup %3876 }
 0x12f   :  { %3824 = vset.pattern.permute.xlu2 %v4118_v5  ;;  %1269 = vperm.xlu1 %3821, %v1264_v32   ;;  %v3879_v32 = vpop.eup %3878 }
 0x130   :  { %v354_v6 = vpop.permute.xlu0 %353  ;;  %v3881_v56 = vpop.eup %3880 }
 0x131   :  { %v623_v63 = vmul.f32 %v3877_v54, %v354_v6  ;;  %v804_v62 = vpop.permute.xlu2 %803  ;;  %v625_v47 = vmul.f32 %v3881_v56, %v367_v3  ;;  %v7915_v54 = vperm.slane %v4189_v60, 3  ;;  %v7916_v6 = vperm.slane %v4172_v50, 2 }
 0x132   :  { %v1022_v51 = vsub.f32 %v804_v62, %v4336_v45 }
 0x133   :  { %v4438_v41 = vadd.f32 %v623_v63, %v4385_v1  ;;  %v1056_v1 = vmul.f32 %v4353_v17, %v1040_v11 }
 0x134   :  { %v1070_v63 = vmul.f32 %v1022_v51, %v1022_v51 }
 0x136   :  { %v1086_v11 = vmul.f32 %v4358_v29, %v1070_v63 }
 0x137   :  { %738 = vperm.xlu2 %3824, %v733_v7   ;;  %3823 = vset.pattern.permute.xlu1 %v4143_v21 }
 0x139   :  { %v361_v43 = vpop.permute.xlu1 %360  ;;  %v817_v61 = vpop.permute.xlu2 %816 }
 0x13a   :  { %v624_v13 = vmul.f32 %v3879_v32, %v361_v43  ;;  %v1024_v8 = vsub.f32 %v817_v61, %v4336_v45  ;;  %v1277_v61 = vperm.slane %v4195_v0, 3 }
 0x13c   :  { %v4446_v27 = vadd.f32 %v625_v47, %v624_v13  ;;  %v1072_v2 = vmul.f32 %v1024_v8, %v1024_v8  ;;  %v1381_v13 = vperm.slane %v4172_v50, 3 }
 0x13e   :  { %v1088_v28 = vmul.f32 %v4358_v29, %v1072_v2 }
 0x13f   :  { %842 = vperm.xlu2 %3824, %v7915_v54   ;;  %1379 = vperm.xlu1 %3823, %v7916_v6  }
 0x140   :  { %v4454_v3 = vadd.f32 %v1088_v28, %v1056_v1  ;;  %v1007_v1 = vsub.f32 %v706_v57, %v4331_v59  ;;  %v1566_v57 = vsub.f32 %v4280_v31, %v4336_v45  ;;  %v7918_v31 = vperm.slane %v4164_v42, 4 }
 0x141   :  { %v700_v53 = vpop.permute.xlu1 %699 }
 0x142   :  { %v1006_v32 = vsub.f32 %v700_v53, %v4331_v59  ;;  %v1039_v2 = vmul.f32 %v1007_v1, %v1007_v1 }
 0x144   :  { %v1038_v56 = vmul.f32 %v1006_v32, %v1006_v32  ;;  %v1055_v54 = vmul.f32 %v4353_v17, %v1039_v2  ;;  %v850_v32 = vperm.slane %v4189_v60, 4 }
 0x146   :  { %v1054_v62 = vmul.f32 %v4353_v17, %v1038_v56 }
 0x147   :  { %3826 = vset.pattern.permute.xlu2 %v4143_v21  ;;  %744 = vperm.xlu1 %3823, %v733_v7  }
 0x148   :  { %v4460_v43 = vadd.f32 %v1086_v11, %v1054_v62  ;;  %v1614_v11 = vmul.f32 %v1566_v57, %v1566_v57 }
 0x149   :  { %v1250_v8 = vpop.permute.xlu2 %1249 }
 0x14a   :  { %v1630_v1 = vmul.f32 %v4358_v29, %v1614_v11 }
 0x14f   :  { %1288 = vperm.xlu2 %3826, %v1277_v61   ;;  %3825 = vset.pattern.permute.xlu1 %v4118_v5 }
 0x151   :  { %v4464_v47 = vpop.permute.xlu1 %718  ;;  %v1263_v63 = vpop.permute.xlu2 %1262 }
 0x157   :  { %1392 = vperm.xlu2 %3826, %v1381_v13   ;;  %1282 = vperm.xlu1 %3825, %v1277_v61  }
 0x159   :  { %v810_v51 = vpop.permute.xlu1 %809 }
 0x15a   :  { %v1023_v7 = vsub.f32 %v810_v51, %v4336_v45 }
 0x15c   :  { %v1071_v28 = vmul.f32 %v1023_v7, %v1023_v7  ;;  %v7917_v7 = vperm.slane %v4195_v0, 4 }
 0x15e   :  { %v1087_v6 = vmul.f32 %v4358_v29, %v1071_v28 }
 0x15f   :  { %3828 = vset.pattern.permute.xlu2 %v4118_v5  ;;  %1386 = vperm.xlu1 %3825, %v1381_v13  }
 0x160   :  { %v4472_v53 = vadd.f32 %v1087_v6, %v1055_v54 }
 0x161   :  { %v1361_v62 = vpop.permute.xlu2 %1360 }
 0x162   :  { %v1568_v13 = vsub.f32 %v1361_v62, %v4336_v45 }
 0x164   :  { %v1616_v54 = vmul.f32 %v1568_v13, %v1568_v13 }
 0x167   :  { %855 = vperm.xlu2 %3828, %v850_v32   ;;  %3827 = vset.pattern.permute.xlu1 %v4143_v21 }
 0x169   :  { %v1244_v56 = vpop.permute.xlu1 %1243  ;;  %v726_v62 = vpop.permute.xlu2 %725 }
 0x16a   :  { %v1550_v61 = vsub.f32 %v1244_v56, %v4331_v59  ;;  %v1632_v56 = vmul.f32 %v4358_v29, %v1616_v54 }
 0x16c   :  { %v1582_v51 = vmul.f32 %v1550_v61, %v1550_v61 }
 0x16e   :  { %v1598_v2 = vmul.f32 %v4353_v17, %v1582_v51 }
 0x16f   :  { %1295 = vperm.xlu2 %3828, %v7917_v7   ;;  %757 = vperm.xlu1 %3827, %v7918_v31   ;;  %v1394_v7 = vperm.slane %v4172_v50, 4 }
 0x170   :  { %v4486_v28 = vadd.f32 %v1630_v1, %v1598_v2  ;;  %v1551_v1 = vsub.f32 %v1250_v8, %v4331_v59 }
 0x171   :  { %v1257_v6 = vpop.permute.xlu1 %1256 }
 0x172   :  { %7919 = vst [vmem:[#allocation16_spill] sm:$0xff] %v4486_v28  ;;  %v1552_v57 = vsub.f32 %v1257_v6, %v4331_v59  ;;  %v1583_v31 = vmul.f32 %v1551_v1, %v1551_v1  ;;  %v759_v6 = vperm.slane %v4164_v42, 5 }
 0x174   :  { %v1584_v11 = vmul.f32 %v1552_v57, %v1552_v57 }
 0x176   :  { %v1600_v61 = vmul.f32 %v4353_v17, %v1584_v11 }
 0x177   :  { %3830 = vset.pattern.permute.xlu2 %v4143_v21  ;;  %861 = vperm.xlu1 %3827, %v850_v32   ;;  %v1599_v32 = vmul.f32 %v4353_v17, %v1583_v31 }
 0x178   :  { %v4492_v51 = vadd.f32 %v1632_v56, %v1600_v61  ;;  %v1553_v56 = vsub.f32 %v1263_v63, %v4331_v59 }
 0x179   :  { %v4497_v13 = vpop.permute.xlu2 %835 }
 0x17a   :  { %7920 = vst [vmem:[#allocation17_spill] sm:$0xff] %v4492_v51  ;;  %v1585_v25 = vmul.f32 %v1553_v56, %v1553_v56 }
 0x17f   :  { %1405 = vperm.xlu2 %3830, %v1394_v7   ;;  %3829 = vset.pattern.permute.xlu1 %v4118_v5 }
 0x181   :  { %v1354_v2 = vpop.permute.xlu1 %1353  ;;  %v1276_v9 = vpop.permute.xlu2 %1275 }
 0x182   :  { %v1567_v54 = vsub.f32 %v1354_v2, %v4336_v45  ;;  %v1601_v2 = vmul.f32 %v4353_v17, %v1585_v25 }
 0x184   :  { %v1615_v57 = vmul.f32 %v1567_v54, %v1567_v54 }
 0x186   :  { %v1631_v11 = vmul.f32 %v4358_v29, %v1615_v57 }
 0x187   :  { %770 = vperm.xlu2 %3830, %v759_v6   ;;  %1399 = vperm.xlu1 %3829, %v1394_v7   ;;  %v1303_v7 = vperm.slane %v4195_v0, 5 }
 0x188   :  { %v4504_v8 = vadd.f32 %v1631_v11, %v1599_v32  ;;  %v1010_v32 = vsub.f32 %v726_v62, %v4331_v59 }
 0x189   :  { %v1367_v61 = vpop.permute.xlu1 %1366 }
 0x18a   :  { %v1569_v1 = vsub.f32 %v1367_v61, %v4336_v45  ;;  %v1042_v61 = vmul.f32 %v1010_v32, %v1010_v32  ;;  %v7923_v32 = vperm.slane %v4189_v60, 5 }
 0x18c   :  { %v1617_v51 = vmul.f32 %v1569_v1, %v1569_v1  ;;  %v1570_v1 = vsub.f32 %v4286_v35, %v4336_v45  ;;  %v1058_v62 = vmul.f32 %v4353_v17, %v1042_v61 }
 0x18e   :  { %v1633_v54 = vmul.f32 %v4358_v29, %v1617_v51 }
 0x18f   :  { %3832 = vset.pattern.permute.xlu2 %v4118_v5  ;;  %764 = vperm.xlu1 %3829, %v759_v6  }
 0x190   :  { %v4510_v63 = vadd.f32 %v1633_v54, %v1601_v2 }
 0x191   :  { %v739_v31 = vpop.permute.xlu2 %738 }
 0x192   :  { %7921 = vst [vmem:[#allocation18_spill] sm:$0xff] %v4510_v63  ;;  %v1012_v57 = vsub.f32 %v739_v31, %v4331_v59  ;;  %v7922_v63 = vperm.slane %v4172_v50, 5 }
 0x194   :  { %v1044_v56 = vmul.f32 %v1012_v57, %v1012_v57 }
 0x196   :  { %v1060_v54 = vmul.f32 %v4353_v17, %v1044_v56 }
 0x197   :  { %1308 = vperm.xlu2 %3832, %v1303_v7   ;;  %3831 = vset.pattern.permute.xlu1 %v4143_v21 }
 0x199   :  { %v830_v11 = vpop.permute.xlu1 %829  ;;  %v843_v25 = vpop.permute.xlu2 %842 }
 0x19a   :  { %v1026_v51 = vsub.f32 %v830_v11, %v4336_v45  ;;  %v1028_v6 = vsub.f32 %v843_v25, %v4336_v45  ;;  %v1618_v11 = vmul.f32 %v1570_v1, %v1570_v1  ;;  %v772_v1 = vperm.slane %v4164_v42, 6 }
 0x19c   :  { %v1074_v2 = vmul.f32 %v1026_v51, %v1026_v51  ;;  %v1076_v31 = vmul.f32 %v1028_v6, %v1028_v6  ;;  %v1634_v61 = vmul.f32 %v4358_v29, %v1618_v11 }
 0x19e   :  { %v1090_v28 = vmul.f32 %v4358_v29, %v1074_v2  ;;  %v1092_v57 = vmul.f32 %v4358_v29, %v1076_v31 }
 0x19f   :  { %1412 = vperm.xlu2 %3832, %v7922_v63   ;;  %874 = vperm.xlu1 %3831, %v7923_v32  }
 0x1a0   :  { %v4528_v25 = vadd.f32 %v1090_v28, %v1058_v62  ;;  %v4530_v35 = vadd.f32 %v1092_v57, %v1060_v54  ;;  %v1555_v54 = vsub.f32 %v1276_v9, %v4331_v59 }
 0x1a1   :  { %v1270_v51 = vpop.permute.xlu1 %1269 }
 0x1a2   :  { %v1554_v56 = vsub.f32 %v1270_v51, %v4331_v59  ;;  %v1587_v11 = vmul.f32 %v1555_v54, %v1555_v54 }
 0x1a4   :  { %v1586_v6 = vmul.f32 %v1554_v56, %v1554_v56  ;;  %v876_v56 = vperm.slane %v4189_v60, 6 }
 0x1a6   :  { %v1602_v2 = vmul.f32 %v4353_v17, %v1586_v6 }
 0x1a7   :  { %3834 = vset.pattern.permute.xlu2 %v4143_v21  ;;  %1314 = vperm.xlu1 %3831, %v1303_v7  }
 0x1a8   :  { %v4536_v63 = vadd.f32 %v1634_v61, %v1602_v2 }
 0x1a9   :  { %v1289_v31 = vpop.permute.xlu2 %1288 }
 0x1aa   :  { %7924 = vst [vmem:[#allocation19_spill] sm:$0xff] %v4536_v63  ;;  %v1557_v28 = vsub.f32 %v1289_v31, %v4331_v59  ;;  %v1603_v31 = vmul.f32 %v4353_v17, %v1587_v11 }
 0x1ac   :  { %v1589_v62 = vmul.f32 %v1557_v28, %v1557_v28 }
 0x1ae   :  { %v1605_v6 = vmul.f32 %v4353_v17, %v1589_v62 }
 0x1af   :  { %783 = vperm.xlu2 %3834, %v772_v1   ;;  %3833 = vset.pattern.permute.xlu1 %v4118_v5 }
 0x1b1   :  { %v1380_v57 = vpop.permute.xlu1 %1379  ;;  %v1393_v32 = vpop.permute.xlu2 %1392 }
 0x1b2   :  { %v1571_v51 = vsub.f32 %v1380_v57, %v4336_v45  ;;  %v1573_v7 = vsub.f32 %v1393_v32, %v4336_v45  ;;  %v1014_v57 = vsub.f32 %v4296_v39, %v4331_v59 }
 0x1b4   :  { %v1619_v61 = vmul.f32 %v1571_v51, %v1571_v51  ;;  %v1621_v2 = vmul.f32 %v1573_v7, %v1573_v7  ;;  %v1046_v62 = vmul.f32 %v1014_v57, %v1014_v57  ;;  %v1420_v7 = vperm.slane %v4172_v50, 6 }
 0x1b6   :  { %v1635_v9 = vmul.f32 %v4358_v29, %v1619_v61  ;;  %v1637_v63 = vmul.f32 %v4358_v29, %v1621_v2  ;;  %v7927_v2 = vperm.slane %v4164_v42, 7  ;;  %v889_v42 = vperm.slane %v4189_v60, 7 }
 0x1b7   :  { %887 = vperm.xlu2 %3834, %v876_v56   ;;  %777 = vperm.xlu1 %3833, %v772_v1   ;;  %v1062_v1 = vmul.f32 %v4353_v17, %v1046_v62 }
 0x1b8   :  { %v4549_v28 = vadd.f32 %v1635_v9, %v1603_v31  ;;  %v4551_v54 = vadd.f32 %v1637_v63, %v1605_v6  ;;  %v7928_v31 = vperm.slane %v4195_v0, 6 }
 0x1b9   :  { %v4556_v32 = vpop.permute.xlu1 %744 }
 0x1ba   :  { %7925 = vst [vmem:[#allocation20_spill] sm:$0xff] %v4549_v28  ;;  %v7931_v28 = vperm.slane %v4211_v4, 1 }
 0x1bb   :  { %7926 = vst [vmem:[#allocation21_spill] sm:$0xff] %v4551_v54 }
 0x1bf   :  { %3836 = vset.pattern.permute.xlu2 %v4118_v5  ;;  %881 = vperm.xlu1 %3833, %v876_v56  }
 0x1c1   :  { %v856_v11 = vpop.permute.xlu2 %855 }
 0x1c2   :  { %v1030_v51 = vsub.f32 %v856_v11, %v4336_v45 }
 0x1c4   :  { %v1078_v61 = vmul.f32 %v1030_v51, %v1030_v51 }
 0x1c6   :  { %v1094_v63 = vmul.f32 %v4358_v29, %v1078_v61 }
 0x1c7   :  { %1425 = vperm.xlu2 %3836, %v1420_v7   ;;  %3835 = vset.pattern.permute.xlu1 %v4143_v21 }
 0x1c8   :  { %v4563_v39 = vadd.f32 %v1094_v63, %v1062_v1 }
 0x1c9   :  { %v1283_v6 = vpop.permute.xlu1 %1282  ;;  %v1296_v1 = vpop.permute.xlu2 %1295 }
 0x1ca   :  { %v1556_v56 = vsub.f32 %v1283_v6, %v4331_v59 }
 0x1cc   :  { %v1588_v57 = vmul.f32 %v1556_v56, %v1556_v56 }
 0x1ce   :  { %v1604_v51 = vmul.f32 %v4353_v17, %v1588_v57 }
 0x1cf   :  { %790 = vperm.xlu2 %3836, %v7927_v2   ;;  %1327 = vperm.xlu1 %3835, %v7928_v31   ;;  %v1329_v2 = vperm.slane %v4195_v0, 7 }
 0x1d1   :  { %v1387_v9 = vpop.permute.xlu1 %1386 }
 0x1d2   :  { %v1572_v62 = vsub.f32 %v1387_v9, %v4336_v45 }
 0x1d4   :  { %v1620_v11 = vmul.f32 %v1572_v62, %v1572_v62 }
 0x1d6   :  { %v1636_v61 = vmul.f32 %v4358_v29, %v1620_v11 }
 0x1d7   :  { %3838 = vset.pattern.permute.xlu2 %v4143_v21  ;;  %1431 = vperm.xlu1 %3835, %v1420_v7  }
 0x1d8   :  { %v4574_v63 = vadd.f32 %v1636_v61, %v1604_v51 }
 0x1d9   :  { %v4578_v6 = vpop.permute.xlu2 %1405 }
 0x1da   :  { %7929 = vst [vmem:[#allocation22_spill] sm:$0xff] %v4574_v63  ;;  %v1558_v63 = vsub.f32 %v1296_v1, %v4331_v59 }
 0x1df   :  { %900 = vperm.xlu2 %3838, %v889_v42   ;;  %3837 = vset.pattern.permute.xlu1 %v4118_v5 }
 0x1e1   :  { %v758_v56 = vpop.permute.xlu1 %757  ;;  %v771_v57 = vpop.permute.xlu2 %770 }
 0x1e2   :  { %v1015_v31 = vsub.f32 %v758_v56, %v4331_v59  ;;  %v902_v56 = vperm.slane %v4211_v4, 0 }
 0x1e4   :  { %v1047_v7 = vmul.f32 %v1015_v31, %v1015_v31 }
 0x1e6   :  { %v1063_v60 = vmul.f32 %v4353_v17, %v1047_v7 }
 0x1e7   :  { %1340 = vperm.xlu2 %3838, %v1329_v2   ;;  %894 = vperm.xlu1 %3837, %v889_v42  }
 0x1e9   :  { %v862_v9 = vpop.permute.xlu1 %861 }
 0x1ea   :  { %v1031_v62 = vsub.f32 %v862_v9, %v4336_v45 }
 0x1ec   :  { %v1079_v11 = vmul.f32 %v1031_v62, %v1031_v62  ;;  %v1590_v62 = vmul.f32 %v1558_v63, %v1558_v63  ;;  %v7932_v63 = vperm.slane %v4172_v50, 7 }
 0x1ee   :  { %v1095_v51 = vmul.f32 %v4358_v29, %v1079_v11  ;;  %v1606_v1 = vmul.f32 %v4353_v17, %v1590_v62 }
 0x1ef   :  { %3840 = vset.pattern.permute.xlu2 %v4118_v5  ;;  %1334 = vperm.xlu1 %3837, %v1329_v2  }
 0x1f0   :  { %v4586_v61 = vadd.f32 %v1095_v51, %v1063_v60  ;;  %v1032_v60 = vsub.f32 %v4307_v46, %v4336_v45 }
 0x1f1   :  { %v1309_v0 = vpop.permute.xlu2 %1308 }
 0x1f2   :  { %7930 = vst [vmem:[#allocation23_spill] sm:$0xff] %v4586_v61  ;;  %v1560_v42 = vsub.f32 %v1309_v0, %v4331_v59 }
 0x1f4   :  { %v1592_v31 = vmul.f32 %v1560_v42, %v1560_v42 }
 0x1f6   :  { %v1608_v61 = vmul.f32 %v4353_v17, %v1592_v31 }
 0x1f7   :  { %907 = vperm.xlu2 %3840, %v902_v56   ;;  %3839 = vset.pattern.permute.xlu1 %v4143_v21 }
 0x1f9   :  { %v1400_v9 = vpop.permute.xlu1 %1399  ;;  %v1413_v7 = vpop.permute.xlu2 %1412 }
 0x1fa   :  { %v1574_v11 = vsub.f32 %v1400_v9, %v4336_v45  ;;  %v1576_v2 = vsub.f32 %v1413_v7, %v4336_v45  ;;  %v1080_v9 = vmul.f32 %v1032_v60, %v1032_v60  ;;  %v1446_v60 = vperm.slane %v4236_v14, 0 }
 0x1fc   :  { %v1622_v51 = vmul.f32 %v1574_v11, %v1574_v11  ;;  %v1624_v0 = vmul.f32 %v1576_v2, %v1576_v2  ;;  %v1096_v62 = vmul.f32 %v4358_v29, %v1080_v9 }
 0x1fe   :  { %v1638_v54 = vmul.f32 %v4358_v29, %v1622_v51  ;;  %v1640_v42 = vmul.f32 %v4358_v29, %v1624_v0 }
 0x1ff   :  { %920 = vperm.xlu2 %3840, %v7931_v28   ;;  %1444 = vperm.xlu1 %3839, %v7932_v63  }
 0x200   :  { %v4604_v7 = vadd.f32 %v1638_v54, %v1606_v1  ;;  %v4606_v46 = vadd.f32 %v1640_v42, %v1608_v61  ;;  %v1017_v61 = vsub.f32 %v771_v57, %v4331_v59 }
 0x201   :  { %v765_v11 = vpop.permute.xlu1 %764 }
 0x202   :  { %7933 = vst [vmem:[#allocation24_spill] sm:$0xff] %v4604_v7  ;;  %v1016_v31 = vsub.f32 %v765_v11, %v4331_v59  ;;  %v1049_v63 = vmul.f32 %v1017_v61, %v1017_v61  ;;  %v1459_v11 = vperm.slane %v4236_v14, 1 }
 0x203   :  { %7934 = vst [vmem:[#allocation25_spill] sm:$0xff] %v4606_v46 }
 0x204   :  { %v1048_v2 = vmul.f32 %v1016_v31, %v1016_v31  ;;  %v4621_v31 = vpop.permute.xlu0 %822  ;;  %v1065_v57 = vmul.f32 %v4353_v17, %v1049_v63 }
 0x206   :  { %v1064_v51 = vmul.f32 %v4353_v17, %v1048_v2 }
 0x207   :  { %3842 = vset.pattern.permute.xlu2 %v4143_v21  ;;  %913 = vperm.xlu1 %3839, %v902_v56  }
 0x208   :  { %v4612_v28 = vadd.f32 %v1096_v62, %v1064_v51 }
 0x209   :  { %v784_v50 = vpop.permute.xlu2 %783 }
 0x20a   :  { %7935 = vst [vmem:[#allocation26_spill] sm:$0xff] %v4612_v28  ;;  %v1019_v54 = vsub.f32 %v784_v50, %v4331_v59 }
 0x20c   :  { %v1051_v0 = vmul.f32 %v1019_v54, %v1019_v54  ;;  %v4633_v28 = vpop.permute.xlu0 %731 }
 0x20e   :  { %v1067_v2 = vmul.f32 %v4353_v17, %v1051_v0 }
 0x20f   :  { %1457 = vperm.xlu2 %3842, %v1446_v60   ;;  %3841 = vset.pattern.permute.xlu1 %v4118_v5 }
 0x211   :  { %v875_v1 = vpop.permute.xlu1 %874  ;;  %v888_v42 = vpop.permute.xlu2 %887 }
 0x212   :  { %v1033_v9 = vsub.f32 %v875_v1, %v4336_v45  ;;  %v1035_v56 = vsub.f32 %v888_v42, %v4336_v45  ;;  %v1562_v42 = vsub.f32 %v4318_v52, %v4331_v59  ;;  %v454_v52 = vsub.f32 %v4244_v18, %v4331_v59 }
 0x214   :  { %v1081_v62 = vmul.f32 %v1033_v9, %v1033_v9  ;;  %v1083_v51 = vmul.f32 %v1035_v56, %v1035_v56  ;;  %v1594_v0 = vmul.f32 %v1562_v42, %v1562_v42 }
 0x216   :  { %v1097_v50 = vmul.f32 %v4358_v29, %v1081_v62  ;;  %v1099_v54 = vmul.f32 %v4358_v29, %v1083_v51  ;;  %v1610_v62 = vmul.f32 %v4353_v17, %v1594_v0  ;;  %v455_v0 = vsub.f32 %v4250_v20, %v4331_v59 }
 0x217   :  { %1470 = vperm.xlu2 %3842, %v1459_v11   ;;  %1451 = vperm.xlu1 %3841, %v1446_v60   ;;  %v1472_v60 = vperm.slane %v4236_v14, 2  ;;  %v7939_v20 = vperm.slane %v4211_v4, 3 }
 0x218   :  { %v4627_v61 = vadd.f32 %v1097_v50, %v1065_v57  ;;  %v4629_v1 = vadd.f32 %v1099_v54, %v1067_v2  ;;  %v482_v50 = vsub.f32 %v4265_v26, %v4336_v45  ;;  %v462_v54 = vsub.f32 %v4277_v30, %v4331_v59 }
 0x219   :  { %v4636_v63 = vpop.permute.xlu1 %1314  ;;  %v491_v14 = vmul.f32 %v455_v0, %v455_v0  ;;  %v460_v30 = vsub.f32 %v4269_v12, %v4331_v59 }
 0x21a   :  { %7936 = vst [vmem:[#allocation27_spill] sm:$0xff] %v4627_v61  ;;  %v498_v18 = vmul.f32 %v462_v54, %v462_v54 }
 0x21b   :  { %7937 = vst [vmem:[#allocation28_spill] sm:$0xff] %v4629_v1 }
 0x21c   :  { %v518_v12 = vmul.f32 %v4353_v17, %v498_v18 }
 0x21f   :  { %3844 = vset.pattern.permute.xlu2 %v4118_v5  ;;  %1464 = vperm.xlu1 %3841, %v1459_v11   ;;  %v4645_v11 = vpop.permute.xlu0 %848 }
 0x221   :  { %v1426_v9 = vpop.permute.xlu2 %1425 }
 0x222   :  { %v1578_v56 = vsub.f32 %v1426_v9, %v4336_v45  ;;  %v457_v9 = vsub.f32 %v4258_v24, %v4331_v59  ;;  %v7940_v24 = vperm.slane %v4211_v4, 2 }
 0x224   :  { %v1626_v2 = vmul.f32 %v1578_v56, %v1578_v56  ;;  %v490_v56 = vmul.f32 %v454_v52, %v454_v52  ;;  %v493_v26 = vmul.f32 %v457_v9, %v457_v9  ;;  %v461_v9 = vsub.f32 %v4302_v44, %v4331_v59 }
 0x225   :  { %v475_v44 = vsub.f32 %v4374_v16, %v4336_v45  ;;  %v480_v16 = vsub.f32 %v4405_v19, %v4336_v45  ;;  %v1025_v19 = vsub.f32 %v4621_v31, %v4336_v45  ;;  %v477_v31 = vsub.f32 %v4432_v23, %v4336_v45 }
 0x226   :  { %v1642_v51 = vmul.f32 %v4358_v29, %v1626_v2  ;;  %v534_v2 = vmul.f32 %v482_v50, %v482_v50  ;;  %v510_v52 = vmul.f32 %v4353_v17, %v490_v56  ;;  %v479_v50 = vsub.f32 %v4345_v22, %v4336_v45 }
 0x227   :  { %1477 = vperm.xlu2 %3844, %v1472_v60   ;;  %3843 = vset.pattern.permute.xlu1 %v4143_v21  ;;  %v4686_v18 = vmul.f32 %v4353_v17, %v493_v26 }
 0x228   :  { %v4647_v57 = vadd.f32 %v1642_v51, %v1610_v62  ;;  %v474_v62 = vsub.f32 %v4310_v48, %v4336_v45  ;;  %v456_v48 = vsub.f32 %v4284_v34, %v4331_v59  ;;  %v554_v54 = vmul.f32 %v4358_v29, %v534_v2 }
 0x229   :  { %v778_v42 = vpop.permute.xlu1 %777  ;;  %v511_v2 = vmul.f32 %v4353_v17, %v491_v14  ;;  %v4688_v1 = vpop.permute.xlu2 %790  ;;  %v531_v61 = vmul.f32 %v479_v50, %v479_v50  ;;  %v497_v14 = vmul.f32 %v461_v9, %v461_v9  ;;  %v464_v50 = vsub.f32 %v4312_v49, %v4331_v59 }
 0x22a   :  { %7938 = vst [vmem:[#allocation29_spill] sm:$0xff] %v4647_v57  ;;  %v1018_v51 = vsub.f32 %v778_v42, %v4331_v59  ;;  %v476_v57 = vsub.f32 %v4323_v55, %v4336_v45  ;;  %v459_v55 = vsub.f32 %v4291_v38, %v4331_v59  ;;  %v481_v42 = vsub.f32 %v4366_v15, %v4336_v45 }
 0x22b   :  { %v526_v56 = vmul.f32 %v474_v62, %v474_v62  ;;  %v492_v15 = vmul.f32 %v456_v48, %v456_v48  ;;  %v570_v46 = vadd.f32 %v554_v54, %v518_v12  ;;  %v551_v54 = vmul.f32 %v4358_v29, %v531_v61 }
 0x22c   :  { %v1050_v34 = vmul.f32 %v1018_v51, %v1018_v51  ;;  %v528_v38 = vmul.f32 %v476_v57, %v476_v57  ;;  %v495_v7 = vmul.f32 %v459_v55, %v459_v55  ;;  %v533_v51 = vmul.f32 %v481_v42, %v481_v42 }
 0x22d   :  { %v546_v26 = vmul.f32 %v4358_v29, %v526_v56  ;;  %v527_v12 = vmul.f32 %v475_v44, %v475_v44  ;;  %v586_v42 = vsub.f32 0.0, %v570_v46  ;;  %v517_v49 = vmul.f32 %v4353_v17, %v497_v14  ;;  %v4717_v46 = vld [vmem:[%s7702_s3 + $0x10] sm:$0xff] }
 0x22e   :  { %v548_v48 = vmul.f32 %v4358_v29, %v528_v38  ;;  %v515_v9 = vmul.f32 %v4353_v17, %v495_v7  ;;  %v553_v56 = vmul.f32 %v4358_v29, %v533_v51  ;;  %v500_v61 = vmul.f32 %v464_v50, %v464_v50 }
 0x22f   :  { %946 = vperm.xlu2 %3844, %v7939_v20   ;;  %939 = vperm.xlu1 %3843, %v7940_v24   ;;  %v4681_v20 = vpop.permute.xlu0 %1301  ;;  %v496_v24 = vmul.f32 %v460_v30, %v460_v30  ;;  %v1066_v30 = vmul.f32 %v4353_v17, %v1050_v34  ;;  %v1485_v7 = vperm.slane %v4717_v46, 3  ;;  %v465_v44 = vsub.f32 %v4288_v36, %v4331_v59 }
 0x230   :  { %v614_v51 = vmul.f32 1.442695, %v586_v42  ;;  %v639_v36 = vrot.slane %v4438_v41, 4  ;;  %v520_v23 = vmul.f32 %v4353_v17, %v500_v61  ;;  %v1118_v61 = vsub.f32 0.0, %v4460_v43 }
 0x231   :  { %v882_v0 = vpop.permute.xlu1 %881  ;;  %v516_v50 = vmul.f32 %v4353_v17, %v496_v24  ;;  %v646_v43 = vrot.slane %v4446_v27, 4 }
 0x232   :  { %v1034_v22 = vsub.f32 %v882_v0, %v4336_v45  ;;  %v484_v0 = vsub.f32 %v4376_v33, %v4336_v45  ;;  %v512_v33 = vmul.f32 %v4353_v17, %v492_v15  ;;  %v532_v15 = vmul.f32 %v480_v16, %v480_v16 }
 0x233   :  { %3882 = vpow2.f32 %v614_v51  ;;  %v640_v24 = vadd.f32 %v639_v36, %v4438_v41 }
 0x234   :  { %v1082_v62 = vmul.f32 %v1034_v22, %v1034_v22  ;;  %v536_v34 = vmul.f32 %v484_v0, %v484_v0  ;;  %v562_v22 = vadd.f32 %v546_v26, %v510_v52  ;;  %v564_v38 = vadd.f32 %v548_v48, %v512_v33 }
 0x235   :  { %v567_v52 = vadd.f32 %v551_v54, %v515_v9  ;;  %v569_v0 = vadd.f32 %v553_v56, %v517_v49  ;;  %v485_v26 = vsub.f32 %v4435_v37, %v4336_v45  ;;  %v552_v33 = vmul.f32 %v4358_v29, %v532_v15 }
 0x236   :  { %v1098_v57 = vmul.f32 %v4358_v29, %v1082_v62  ;;  %v547_v62 = vmul.f32 %v4358_v29, %v527_v12  ;;  %v556_v14 = vmul.f32 %v4358_v29, %v536_v34  ;;  %v580_v16 = vsub.f32 0.0, %v564_v38 }
 0x237   :  { %3846 = vset.pattern.permute.xlu2 %v4143_v21  ;;  %1483 = vperm.xlu1 %3843, %v1472_v60   ;;  %v1009_v60 = vsub.f32 %v4464_v47, %v4331_v59  ;;  %v4725_v47 = vpop.permute.xlu0 %1418  ;;  %v1073_v59 = vmul.f32 %v1025_v19, %v1025_v19  ;;  %v501_v54 = vmul.f32 %v465_v44, %v465_v44  ;;  %v583_v12 = vsub.f32 0.0, %v567_v52 }
 0x238   :  { %v4705_v55 = vadd.f32 %v1098_v57, %v1066_v30  ;;  %v578_v57 = vsub.f32 0.0, %v562_v22  ;;  %v563_v45 = vadd.f32 %v547_v62, %v511_v2  ;;  %v529_v37 = vmul.f32 %v477_v31, %v477_v31  ;;  %v4744_v2 = vld [vmem:[%s7702_s3] sm:$0xff] }
 0x239   :  { %v4730_v30 = vpop.permute.xlu2 %900  ;;  %v1041_v48 = vmul.f32 %v1009_v60, %v1009_v60  ;;  %v585_v42 = vsub.f32 0.0, %v569_v0  ;;  %v572_v9 = vadd.f32 %v556_v14, %v520_v23  ;;  %v537_v56 = vmul.f32 %v485_v26, %v485_v26 }
 0x23a   :  { %v598_v49 = vmul.f32 1.442695, %v578_v57  ;;  %v1089_v22 = vmul.f32 %v4358_v29, %v1073_v59  ;;  %v602_v60 = vmul.f32 1.442695, %v580_v16  ;;  %v568_v38 = vadd.f32 %v552_v33, %v516_v50  ;;  %v4765_v59 = vpop.eup %3882 }
 0x23b   :  { %v1057_v19 = vmul.f32 %v4353_v17, %v1041_v48  ;;  %v368_v15 = vperm.slane %v4744_v2, 2  ;;  %v521_v44 = vmul.f32 %v4353_v17, %v501_v54  ;;  %v608_v52 = vmul.f32 1.442695, %v583_v12  ;;  %v4760_v17 = vld [vmem:[%s7703_s4] ss:$0 sm:$0xff]  ;;  %7941 = vst [vmem:[#allocation30_spill] sm:$0xff] %v4765_v59 }
 0x23c   :  { %v579_v62 = vsub.f32 0.0, %v563_v45  ;;  %v549_v41 = vmul.f32 %v4358_v29, %v529_v37  ;;  %v612_v31 = vmul.f32 1.442695, %v585_v42  ;;  %v588_v51 = vsub.f32 0.0, %v572_v9  ;;  %s4778_s4 = sld [smem:[#allocation2 + $0x3b]] }
 0x23d   :  { %v557_v0 = vmul.f32 %v4358_v29, %v537_v56  ;;  %v641_v14 = vrot.slane %v640_v24, 2  ;;  %v1105_v26 = vadd.f32 %v1089_v22, %v1057_v19  ;;  %3884 = vpow2.f32 %v598_v49  ;;  %v4770_v29 = vld [vmem:[%s7704_s5] ss:$0 sm:$0xff]  ;;  %s4784_s5 = sld [smem:[#allocation2 + $0x41]] }
 0x23e   :  { %3886 = vpow2.f32 %v602_v60  ;;  %v1580_v48 = vsub.f32 %v4326_v58, %v4770_v29  ;;  %v584_v50 = vsub.f32 0.0, %v568_v38  ;;  %v1134_v16 = vmul.f32 1.442695, %v1118_v61 }
 0x23f   :  { %1496 = vperm.xlu2 %3846, %v1485_v7   ;;  %3845 = vset.pattern.permute.xlu1 %v4118_v5  ;;  %v4755_v57 = vpop.permute.xlu0 %796  ;;  %3888 = vpow2.f32 %v608_v52  ;;  %v600_v33 = vmul.f32 1.442695, %v579_v62  ;;  %v565_v54 = vadd.f32 %v549_v41, %v4686_v18  ;;  %v618_v12 = vmul.f32 1.442695, %v588_v51  ;;  %v4805_v52 = vld [vmem:[%s7705_s6] ss:$0 sm:$0xff] }
 0x240   :  { %3890 = vpow2.f32 %v612_v31  ;;  %v573_v45 = vadd.f32 %v557_v0, %v521_v44  ;;  %v647_v58 = vadd.f32 %v646_v43, %v4446_v27  ;;  %v642_v42 = vadd.f32 %v641_v14, %v640_v24  ;;  %v4811_v41 = vld [vmem:[%s7706_s7] ss:$0 sm:$0xff]  ;;  %s4825_s6 = sld [smem:[#allocation2 + $0x7]] }
 0x241   :  { %v1328_v34 = vpop.permute.xlu1 %1327  ;;  %v4776_v23 = vpop.permute.xlu2 %1340  ;;  %v610_v49 = vmul.f32 1.442695, %v584_v50  ;;  %3892 = vpow2.f32 %v1134_v16  ;;  %v1120_v18 = vsub.f32 0.0, %v4454_v3  ;;  %v581_v27 = vsub.f32 0.0, %v565_v54  ;;  %s4840_s7 = sld [smem:[#allocation2 + $0xa]] }
 0x242   :  { %v1563_v36 = vsub.f32 %v1328_v34, %v4760_v17  ;;  %v1628_v34 = vmul.f32 %v1580_v48, %v1580_v48  ;;  %3894 = vpow2.f32 %v600_v33  ;;  %v589_v60 = vsub.f32 0.0, %v573_v45 }
 0x243   :  { %v4792_v22 = vpop.eup %3884  ;;  %3896 = vpow2.f32 %v618_v12  ;;  %v648_v38 = vrot.slane %v647_v58, 2  ;;  %v643_v3 = vrot.slane %v642_v42, 1  ;;  %v1138_v43 = vmul.f32 1.442695, %v1120_v18 }
 0x244   :  { %v1595_v9 = vmul.f32 %v1563_v36, %v1563_v36  ;;  %7942 = vst [vmem:[#allocation31_spill] sm:$0xff] %v4792_v22  ;;  %v4796_v24 = vpop.eup %3886  ;;  %v4817_v0 = vmul.f32 %v4811_v41, %v1628_v34  ;;  %3898 = vpow2.f32 %v610_v49  ;;  %v4823_v14 = vstv %s4749_s1  ;;  %s5311_s1 = sld [smem:[#allocation2 + $0xe]] }
 0x245   :  { %7943 = vst [vmem:[#allocation32_spill] sm:$0xff] %v4796_v24  ;;  %v4800_v61 = vpop.eup %3888  ;;  %v4830_v50 = vstv %s4753_s2  ;;  %v4833_v16 = vstv %s4763_s0  ;;  %v620_v54 = vmul.f32 1.442695, %v589_v60  ;;  %v649_v12 = vadd.f32 %v648_v38, %v647_v58  ;;  %s5120_s0 = sld [smem:[#allocation2 + $0x18]] }
 0x246   :  { %7944 = vst [vmem:[#allocation33_spill] sm:$0xff] %v4800_v61  ;;  %v1611_v62 = vmul.f32 %v4805_v52, %v1595_v9  ;;  %v4814_v51 = vpop.eup %3890  ;;  %v4844_v9 = vadd.f32 %v643_v3, %v642_v42  ;;  %v4849_v58 = vstv %s4781_s19  ;;  %v7736_v49 = vperm.slane %v4717_v46, 4  ;;  %s5140_s19 = sld [smem:[#allocation2 + $0x30]] }
 0x247   :  { %379 = vperm.xlu2 %3846, %v368_v15   ;;  %1490 = vperm.xlu1 %3845, %v1485_v7   ;;  %v1121_v7 = vsub.f32 0.0, %v1105_v26  ;;  %7945 = vst [vmem:[#allocation34_spill] sm:$0xff] %v4814_v51  ;;  %v604_v26 = vmul.f32 1.442695, %v581_v27  ;;  %v927_v36 = vpop.permute.xlu0 %926  ;;  %v3893_v33 = vpop.eup %3892  ;;  %v4856_v18 = vstv %s4784_s5  ;;  %v4859_v27 = vstv %s4787_s14  ;;  %s5145_s5 = sld [smem:[#allocation2 + $0x33]] }
 0x248   :  { %7946 = vst [vmem:[#allocation35_spill] sm:$0xff] %v4823_v14  ;;  %v4862_v42 = vstv %s4790_s20  ;;  %v650_v38 = vrot.slane %v649_v12, 1  ;;  %v4920_v22 = vstv %s4840_s7  ;;  %s5156_s14 = sld [smem:[#allocation2 + $0x36]] }
 0x249   :  { %v1432_v37 = vpop.permute.xlu1 %1431  ;;  %v1140_v44 = vmul.f32 1.442695, %v1121_v7  ;;  %7947 = vst [vmem:[#allocation36_spill] sm:$0xff] %v4830_v50  ;;  %v4842_v7 = vpop.eup %3894  ;;  %v4914_v40 = vmul.f32 %v4862_v42, %v4844_v9  ;;  %s5169_s20 = sld [smem:[#allocation2 + $0x39]] }
 0x24a   :  { %v1579_v56 = vsub.f32 %v1432_v37, %v4770_v29  ;;  %7948 = vst [vmem:[#allocation37_spill] sm:$0xff] %v4833_v16  ;;  %v4838_v37 = vstv %s4778_s4  ;;  %v4851_v34 = vpop.eup %3896  ;;  %s5135_s4 = sld [smem:[#allocation2 + $0x21]] }
 0x24b   :  { %7949 = vst [vmem:[#allocation38_spill] sm:$0xff] %v4838_v37  ;;  %3900 = vpow2.f32 %v1140_v44  ;;  %v4867_v60 = vpop.eup %3898  ;;  %v4870_v44 = vstv %s4798_s22  ;;  %s5181_s22 = sld [smem:[#allocation2 + $0x3f]] }
 0x24c   :  { %v1627_v19 = vmul.f32 %v1579_v56, %v1579_v56  ;;  %7950 = vst [vmem:[#allocation39_spill] sm:$0xff] %v4842_v7  ;;  %3902 = vpow2.f32 %v1138_v43  ;;  %v4878_v43 = vmul.f32 %v4823_v14, %v4844_v9  ;;  %s5247_s7 = sld [smem:[#allocation2 + $0x5]] }
 0x24d   :  { %7951 = vst [vmem:[#allocation40_spill] sm:$0xff] %v4844_v9  ;;  %3904 = vpow2.f32 %v604_v26  ;;  %v4882_v26 = vmul.f32 %v4830_v50, %v4844_v9  ;;  %s5315_s2 = sld [smem:[#allocation2 + $0x31]] }
 0x24e   :  { %v1643_v31 = vmul.f32 %v4811_v41, %v1627_v19  ;;  %7952 = vst [vmem:[#allocation41_spill] sm:$0xff] %v4849_v58  ;;  %v4865_v19 = vstv %s4794_s21  ;;  %3906 = vpow2.f32 %v620_v54  ;;  %v4900_v54 = vstv %s4825_s6  ;;  %s5173_s21 = sld [smem:[#allocation2 + $0x3c]] }
 0x24f   :  { %3848 = vset.pattern.permute.xlu2 %v4118_v5  ;;  %373 = vperm.xlu1 %3845, %v368_v15   ;;  %v1011_v15 = vsub.f32 %v4633_v28, %v4760_v17  ;;  %7953 = vst [vmem:[#allocation42_spill] sm:$0xff] %v4851_v34  ;;  %v4906_v28 = vmul.f32 %v4856_v18, %v4844_v9  ;;  %s5228_s6 = sld [smem:[#allocation2 + $0x2]] }
 0x250   :  { %v4827_v48 = vadd.f32 %v1643_v31, %v1611_v62  ;;  %7954 = vst [vmem:[#allocation43_spill] sm:$0xff] %v4856_v18  ;;  %v1027_v62 = vsub.f32 %v4497_v13, %v4770_v29  ;;  %v1020_v31 = vsub.f32 %v4688_v1, %v4760_v17  ;;  %v4889_v13 = vmul.f32 %v4833_v16, %v4844_v9 }
 0x251   :  { %v908_v45 = vpop.permute.xlu2 %907  ;;  %7955 = vst [vmem:[#allocation44_spill] sm:$0xff] %v4859_v27  ;;  %v1043_v3 = vmul.f32 %v1011_v15, %v1011_v15  ;;  %v4893_v1 = vmul.f32 %v4838_v37, %v4844_v9  ;;  %v3901_v15 = vpop.eup %3900  ;;  %v4916_v34 = vadd.f32 %v650_v38, %v649_v12  ;;  %v1663_v38 = vsub.f32 0.0, %v4504_v8 }
 0x252   :  { %v4846_v56 = vmul.f32 %v3893_v33, %v908_v45  ;;  %7956 = vst [vmem:[#allocation45_spill] sm:$0xff] %v4862_v42  ;;  %v4897_v33 = vmul.f32 %v4849_v58, %v4844_v9  ;;  %v1029_v45 = vsub.f32 %v4645_v11, %v4770_v29  ;;  %v1169_v61 = vmul.f32 %v3901_v15, %v927_v36 }
 0x253   :  { %7957 = vst [vmem:[#allocation46_spill] sm:$0xff] %v4865_v19  ;;  %v1059_v59 = vmul.f32 %v4805_v52, %v1043_v3  ;;  %v4934_v36 = vmul.f32 %v4865_v19, %v4844_v9  ;;  %v4938_v3 = vmul.f32 %v4870_v44, %v4844_v9  ;;  %v4950_v8 = vmul.f32 %v4823_v14, %v4916_v34 }
 0x254   :  { %7958 = vst [vmem:[#allocation47_spill] sm:$0xff] %v4867_v60  ;;  %v3903_v60 = vpop.eup %3902  ;;  %v1680_v14 = vmul.f32 1.442695, %v1663_v38 }
 0x255   :  { %7959 = vst [vmem:[#allocation48_spill] sm:$0xff] %v4870_v44  ;;  %v4922_v24 = vpop.eup %3904 }
 0x256   :  { %7960 = vst [vmem:[#allocation49_spill] sm:$0xff] %v4893_v1  ;;  %v4929_v12 = vpop.eup %3906  ;;  %3908 = vpow2.f32 %v1680_v14 }
 0x257   :  { %1503 = vperm.xlu2 %3848, %v7736_v49   ;;  %3847 = vset.pattern.permute.xlu1 %v4143_v21  ;;  %7961 = vst [vmem:[#allocation50_spill] sm:$0xff] %v4897_v33  ;;  %v4910_v49 = vmul.f32 %v4859_v27, %v4844_v9  ;;  %v1075_v33 = vmul.f32 %v1027_v62, %v1027_v62 }
 0x258   :  { %7962 = vst [vmem:[#allocation51_spill] sm:$0xff] %v4900_v54  ;;  %v4942_v62 = vmul.f32 %v4900_v54, %v4844_v9 }
 0x259   :  { %7963 = vst [vmem:[#allocation52_spill] sm:$0xff] %v4906_v28  ;;  %v921_v51 = vpop.permute.xlu2 %920  ;;  %v895_v11 = vpop.permute.xlu1 %894 }
 0x25a   :  { %7964 = vst [vmem:[#allocation53_spill] sm:$0xff] %v4910_v49  ;;  %v4924_v28 = vpop.permute.xlu0 %952  ;;  %v1052_v49 = vmul.f32 %v1020_v31, %v1020_v31  ;;  %v1168_v1 = vmul.f32 %v3903_v60, %v921_v51  ;;  %v1036_v7 = vsub.f32 %v895_v11, %v4770_v29  ;;  %v1077_v51 = vmul.f32 %v1029_v45, %v1029_v45 }
 0x25b   :  { %7965 = vst [vmem:[#allocation54_spill] sm:$0xff] %v4914_v40  ;;  %v1013_v60 = vsub.f32 %v4556_v32, %v4760_v17  ;;  %v4954_v11 = vmul.f32 %v4830_v50, %v4916_v34  ;;  %v4962_v45 = vmul.f32 %v4920_v22, %v4844_v9  ;;  %v1091_v32 = vmul.f32 %v4811_v41, %v1075_v33 }
 0x25c   :  { %7966 = vst [vmem:[#allocation55_spill] sm:$0xff] %v4916_v34  ;;  %v4946_v31 = vadd.f32 %v1169_v61, %v1168_v1  ;;  %v1084_v15 = vmul.f32 %v1036_v7, %v1036_v7  ;;  %v1068_v61 = vmul.f32 %v4805_v52, %v1052_v49  ;;  %v4969_v1 = vmul.f32 %v4838_v37, %v4916_v34 }
 0x25d   :  { %7967 = vst [vmem:[#allocation56_spill] sm:$0xff] %v4920_v22  ;;  %v1559_v50 = vsub.f32 %v4681_v20, %v4760_v17  ;;  %v4979_v49 = vmul.f32 %v4849_v58, %v4916_v34  ;;  %v4983_v33 = vmul.f32 %v4856_v18, %v4916_v34  ;;  %v1045_v37 = vmul.f32 %v1013_v60, %v1013_v60  ;;  %v7979_v58 = vld [vmem:[#allocation18_spill] sm:$0xff] }
 0x25e   :  { %7968 = vst [vmem:[#allocation57_spill] sm:$0xff] %v4934_v36  ;;  %v1100_v7 = vmul.f32 %v4811_v41, %v1084_v15  ;;  %v1093_v15 = vmul.f32 %v4811_v41, %v1077_v51  ;;  %v5000_v18 = vmul.f32 %v4865_v19, %v4916_v34  ;;  %v5004_v51 = vmul.f32 %v4870_v44, %v4916_v34  ;;  %v7980_v19 = vld [vmem:[#allocation16_spill] sm:$0xff] }
 0x25f   :  { %7969 = vst [vmem:[#allocation58_spill] sm:$0xff] %v4938_v3  ;;  %v4958_v3 = vmul.f32 %v4833_v16, %v4916_v34  ;;  %v7972_v16 = vperm.slane %v4226_v10, 3  ;;  %v1119_v60 = vsub.f32 0.0, %v4472_v53  ;;  %v1061_v44 = vmul.f32 %v4805_v52, %v1045_v37 }
 0x260   :  { %7970 = vst [vmem:[#allocation59_spill] sm:$0xff] %v4942_v62  ;;  %v7973_v62 = vperm.slane %v4211_v4, 4  ;;  %v4986_v20 = vadd.f32 %v1100_v7, %v1068_v61  ;;  %v1575_v4 = vsub.f32 %v4578_v6, %v4770_v29  ;;  %v1107_v61 = vadd.f32 %v1091_v32, %v1059_v59 }
 0x261   :  { %7971 = vst [vmem:[#allocation60_spill] sm:$0xff] %v4962_v45  ;;  %386 = vperm.xlu2 %3848, %v7972_v16   ;;  %v4990_v16 = vmul.f32 %v4859_v27, %v4916_v34  ;;  %v1335_v38 = vpop.permute.xlu1 %1334  ;;  %v5009_v27 = vstv %s4927_s27  ;;  %v1591_v6 = vmul.f32 %v1559_v50, %v1559_v50  ;;  %v1665_v45 = vsub.f32 0.0, %v7979_v58  ;;  %v7982_v50 = vld [vmem:[#allocation17_spill] sm:$0xff]  ;;  %s5266_s27 = sld [smem:[#allocation2 + $0x8]] }
 0x262   :  { %965 = vperm.xlu1 %3847, %v7973_v62   ;;  %v4996_v62 = vmul.f32 %v4862_v42, %v4916_v34  ;;  %7976 = vst [vmem:[#allocation63_spill] sm:$0xff] %v5000_v18  ;;  %v1564_v7 = vsub.f32 %v1335_v38, %v4760_v17  ;;  %v1577_v42 = vsub.f32 %v4725_v47, %v4770_v29  ;;  %v1662_v18 = vsub.f32 0.0, %v7980_v19 }
 0x263   :  { %7974 = vst [vmem:[#allocation61_spill] sm:$0xff] %v4990_v16  ;;  %v5018_v53 = vmul.f32 %v4900_v54, %v4916_v34  ;;  %v1021_v59 = vsub.f32 %v4755_v57, %v4760_v17  ;;  %v1664_v32 = vsub.f32 0.0, %v7982_v50  ;;  %v1623_v38 = vmul.f32 %v1575_v4, %v1575_v4 }
 0x264   :  { %7975 = vst [vmem:[#allocation62_spill] sm:$0xff] %v4996_v62  ;;  %v393_v62 = vpop.permute.xlu0 %392  ;;  %v5025_v47 = vmul.f32 %v5009_v27, %v4844_v9  ;;  %v1136_v14 = vmul.f32 1.442695, %v1119_v60  ;;  %v1123_v58 = vsub.f32 0.0, %v1107_v61  ;;  %v5030_v37 = vmul.f32 %v4920_v22, %v4916_v34  ;;  %v3909_v22 = vpop.eup %3908 }
 0x265   :  { %7977 = vst [vmem:[#allocation64_spill] sm:$0xff] %v5004_v51  ;;  %v1596_v51 = vmul.f32 %v1564_v7, %v1564_v7  ;;  %v1607_v7 = vmul.f32 %v4805_v52, %v1591_v6  ;;  %v1625_v54 = vmul.f32 %v1577_v42, %v1577_v42  ;;  %v1122_v57 = vsub.f32 0.0, %v4528_v25 }
 0x266   :  { %7978 = vst [vmem:[#allocation65_spill] sm:$0xff] %v5009_v27  ;;  %v7985_v4 = vperm.slane %v4717_v46, 4  ;;  %v1678_v50 = vmul.f32 1.442695, %v1662_v18  ;;  %v1124_v60 = vsub.f32 0.0, %v4530_v35  ;;  %v1109_v61 = vadd.f32 %v1093_v15, %v1061_v44  ;;  %v5052_v44 = vld [vmem:[%s7702_s3 + $0x8] sm:$0xff] }
 0x267   :  { %7981 = vst [vmem:[#allocation18_spill] sm:$0xff] %v5018_v53  ;;  %v1612_v19 = vmul.f32 %v4805_v52, %v1596_v51  ;;  %v1684_v53 = vmul.f32 1.442695, %v1665_v45  ;;  %v1053_v6 = vmul.f32 %v1021_v59, %v1021_v59  ;;  %v1682_v42 = vmul.f32 1.442695, %v1664_v32  ;;  %v7986_v45 = vld [vmem:[#allocation19_spill] sm:$0xff] }
 0x268   :  { %7983 = vst [vmem:[#allocation16_spill] sm:$0xff] %v5025_v47  ;;  %v1666_v47 = vsub.f32 0.0, %v7986_v45  ;;  %v1639_v25 = vmul.f32 %v4811_v41, %v1623_v38  ;;  %3910 = vpow2.f32 %v1136_v14  ;;  %v1144_v40 = vmul.f32 1.442695, %v1123_v58 }
 0x269   :  { %7984 = vst [vmem:[#allocation17_spill] sm:$0xff] %v5030_v37  ;;  %3850 = vset.pattern.permute.xlu2 %v4143_v21  ;;  %v5039_v51 = vadd.f32 %v4817_v0, %v1612_v19  ;;  %v1458_v37 = vpop.permute.xlu2 %1457  ;;  %v1561_v18 = vsub.f32 %v4636_v63, %v4760_v17  ;;  %3912 = vpow2.f32 %v1684_v53  ;;  %v1142_v0 = vmul.f32 1.442695, %v1122_v57 }
 0x26a   :  { %1509 = vperm.xlu1 %3847, %v7985_v4   ;;  %v5047_v35 = vmul.f32 %v3909_v22, %v1458_v37  ;;  %v7762_v15 = vperm.slane %v5052_v44, 5  ;;  %v5057_v59 = vmul.f32 %v5009_v27, %v4916_v34  ;;  %v1641_v32 = vmul.f32 %v4811_v41, %v1625_v54  ;;  %v7989_v4 = vld [vmem:[#allocation20_spill] sm:$0xff] }
 0x26b   :  { %3914 = vpow2.f32 %v1678_v50  ;;  %v1146_v38 = vmul.f32 1.442695, %v1124_v60  ;;  %v1125_v63 = vsub.f32 0.0, %v1109_v61  ;;  %v1686_v22 = vmul.f32 1.442695, %v1666_v47  ;;  %v7990_v50 = vld [vmem:[#allocation21_spill] sm:$0xff] }
 0x26c   :  { %7987 = vst [vmem:[#allocation19_spill] sm:$0xff] %v5057_v59  ;;  %3916 = vpow2.f32 %v1682_v42  ;;  %v1126_v53 = vsub.f32 0.0, %v4563_v39  ;;  %v1655_v14 = vadd.f32 %v1639_v25, %v1607_v7  ;;  %v5062_v58 = vmul.f32 %v4805_v52, %v1053_v6  ;;  %v5064_v19 = vpop.permute.xlu0 %1535  ;;  %v7997_v59 = vld [vmem:[#allocation26_spill] sm:$0xff] }
 0x26d   :  { %3918 = vpow2.f32 %v1144_v40  ;;  %v1593_v37 = vmul.f32 %v1561_v18, %v1561_v18  ;;  %v1565_v57 = vsub.f32 %v4776_v23, %v4760_v17  ;;  %v5069_v54 = vmul.f32 %v4922_v24, %v393_v62  ;;  %v7992_v24 = vld [vmem:[#allocation22_spill] sm:$0xff] }
 0x26e   :  { %3920 = vpow2.f32 %v1142_v0  ;;  %v1667_v47 = vsub.f32 0.0, %v7989_v4  ;;  %v1037_v39 = vsub.f32 %v4730_v30, %v4770_v29  ;;  %v3911_v7 = vpop.eup %3910  ;;  %v1148_v40 = vmul.f32 1.442695, %v1125_v63 }
 0x26f   :  { %7988 = vst [vmem:[#allocation66_spill] sm:$0xff] %v5069_v54  ;;  %3922 = vpow2.f32 %v1146_v38  ;;  %v1669_v60 = vsub.f32 0.0, %v7990_v50  ;;  %v5079_v17 = vstv %s5041_s28  ;;  %v3913_v23 = vpop.eup %3912  ;;  %v1668_v62 = vsub.f32 0.0, %v7992_v24  ;;  %v7993_v50 = vld [vmem:[#allocation23_spill] sm:$0xff]  ;;  %s5297_s28 = sld [smem:[#allocation2 + $0xb]] }
 0x270   :  { %7991 = vst [vmem:[#allocation20_spill] sm:$0xff] %v5079_v17  ;;  %3924 = vpow2.f32 %v1686_v22  ;;  %v1150_v61 = vmul.f32 1.442695, %v1126_v53  ;;  %v1671_v6 = vsub.f32 0.0, %v1655_v14  ;;  %v1609_v25 = vmul.f32 %v4805_v52, %v1593_v37 }
 0x271   :  { %978 = vperm.xlu2 %3850, %v7762_v15   ;;  %v1471_v42 = vpop.permute.xlu2 %1470  ;;  %v1445_v30 = vpop.permute.xlu1 %1444  ;;  %v1597_v18 = vmul.f32 %v1565_v57, %v1565_v57  ;;  %v1688_v4 = vmul.f32 1.442695, %v1667_v47  ;;  %v1127_v22 = vsub.f32 0.0, %v7993_v50  ;;  %v1085_v15 = vmul.f32 %v1037_v39, %v1037_v39 }
 0x272   :  { %3849 = vset.pattern.permute.xlu1 %v4118_v5  ;;  %v5082_v45 = vpop.eup %3914  ;;  %v5085_v0 = vmul.f32 %v3913_v23, %v1471_v42  ;;  %v1581_v38 = vsub.f32 %v1445_v30, %v4770_v29  ;;  %3926 = vpow2.f32 %v1148_v40  ;;  %v1692_v24 = vmul.f32 1.442695, %v1669_v60  ;;  %v7995_v23 = vld [vmem:[#allocation24_spill] sm:$0xff]  ;;  %v7996_v30 = vld [vmem:[#allocation25_spill] sm:$0xff] }
 0x273   :  { %v5088_v63 = vpop.eup %3916  ;;  %v5096_v37 = vmul.f32 %v5079_v17, %v4844_v9  ;;  %v1690_v57 = vmul.f32 1.442695, %v1668_v62  ;;  %3928 = vpow2.f32 %v1150_v61  ;;  %v1696_v47 = vmul.f32 1.442695, %v1671_v6 }
 0x274   :  { %v5092_v14 = vpop.eup %3918  ;;  %v1629_v27 = vmul.f32 %v1581_v38, %v1581_v38  ;;  %v1670_v42 = vsub.f32 0.0, %v7995_v23  ;;  %v1672_v50 = vsub.f32 0.0, %v7996_v30  ;;  %v1657_v53 = vadd.f32 %v1641_v32, %v1609_v25  ;;  %v445_v32 = vpop.permute.xlu0 %444 }
 0x275   :  { %7994 = vst [vmem:[#allocation21_spill] sm:$0xff] %v5096_v37  ;;  %v3921_v29 = vpop.eup %3920  ;;  %v1613_v40 = vmul.f32 %v4805_v52, %v1597_v18  ;;  %3930 = vpow2.f32 %v1688_v4  ;;  %v1152_v37 = vmul.f32 1.442695, %v1127_v22  ;;  %v1128_v54 = vsub.f32 0.0, %v7997_v59  ;;  %v8000_v52 = vld [vmem:[#allocation27_spill] sm:$0xff] }
 0x276   :  { %v5101_v39 = vpop.eup %3922  ;;  %v1645_v60 = vmul.f32 %v4811_v41, %v1629_v27  ;;  %v1101_v62 = vmul.f32 %v4811_v41, %v1085_v15  ;;  %v7998_v61 = vperm.slane %v4717_v46, 5  ;;  %v7999_v6 = vperm.slane %v5052_v44, 5  ;;  %v8001_v15 = vld [vmem:[#allocation28_spill] sm:$0xff] }
 0x277   :  { %v5106_v38 = vpop.eup %3924  ;;  %3932 = vpow2.f32 %v1692_v24  ;;  %v1129_v27 = vsub.f32 0.0, %v8000_v52  ;;  %v1190_v25 = vrot.slane %v4946_v31, 4  ;;  %v1694_v41 = vmul.f32 1.442695, %v1670_v42  ;;  %v8004_v52 = vld [vmem:[#allocation29_spill] sm:$0xff] }
 0x278   :  { %v5118_v18 = vadd.f32 %v1645_v60, %v1613_v40  ;;  %3934 = vpow2.f32 %v1690_v57  ;;  %v1131_v59 = vsub.f32 0.0, %v8001_v15  ;;  %v5125_v22 = vmul.f32 %v5079_v17, %v4916_v34  ;;  %v3927_v24 = vpop.eup %3926 }
 0x279   :  { %1522 = vperm.xlu2 %3850, %v7998_v61   ;;  %v914_v4 = vpop.permute.xlu1 %913  ;;  %3936 = vpow2.f32 %v1696_v47  ;;  %v1698_v23 = vmul.f32 1.442695, %v1672_v50  ;;  %v1673_v30 = vsub.f32 0.0, %v1657_v53  ;;  %v3929_v40 = vpop.eup %3928  ;;  %v5132_v57 = vmul.f32 %v4929_v12, %v445_v32 }
 0x27a   :  { %972 = vperm.xlu1 %3849, %v7999_v6   ;;  %8002 = vst [vmem:[#allocation22_spill] sm:$0xff] %v5125_v22  ;;  %v1167_v61 = vmul.f32 %v3911_v7, %v914_v4  ;;  %3938 = vpow2.f32 %v1152_v37  ;;  %v1154_v42 = vmul.f32 1.442695, %v1128_v54  ;;  %v1117_v60 = vadd.f32 %v1101_v62, %v5062_v58  ;;  %v8006_v62 = vld [vmem:[#allocation11_spill] sm:$0xff] }
 0x27b   :  { %8003 = vst [vmem:[#allocation23_spill] sm:$0xff] %v5132_v57  ;;  %v1156_v6 = vmul.f32 1.442695, %v1129_v27  ;;  %v1674_v15 = vsub.f32 0.0, %v8004_v52  ;;  %v1191_v47 = vadd.f32 %v1190_v25, %v4946_v31  ;;  %v5142_v53 = vpop.eup %3930  ;;  %3940 = vpow2.f32 %v1694_v41  ;;  %v8009_v41 = vld [vmem:[#allocation12_spill] sm:$0xff] }
 0x27c   :  { %v1182_v7 = vadd.f32 %v1167_v61, %v4846_v56  ;;  %v1160_v12 = vmul.f32 1.442695, %v1131_v59  ;;  %v1130_v37 = vsub.f32 0.0, %v4705_v55  ;;  %v5148_v58 = vstv %s5098_s29  ;;  %s5324_s29 = sld [smem:[#allocation2 + $0x34]] }
 0x27d   :  { %8005 = vst [vmem:[#allocation24_spill] sm:$0xff] %v5148_v58  ;;  %v5150_v54 = vpop.eup %3932  ;;  %3942 = vpow2.f32 %v1698_v23  ;;  %v1700_v50 = vmul.f32 1.442695, %v1673_v30  ;;  %v1675_v31 = vsub.f32 0.0, %v4827_v48  ;;  %v5154_v56 = vmul.f32 %v3921_v29, %v8006_v62 }
 0x27e   :  { %v5158_v32 = vpop.eup %3934  ;;  %3944 = vpow2.f32 %v1154_v42  ;;  %v1133_v27 = vsub.f32 0.0, %v1117_v60  ;;  %v8008_v55 = vperm.slane %v4717_v46, 5  ;;  %v5164_v25 = vmul.f32 %v3927_v24, %v4924_v28 }
 0x27f   :  { %8007 = vst [vmem:[#allocation25_spill] sm:$0xff] %v5158_v32  ;;  %v5167_v48 = vmul.f32 %v3929_v40, %v8009_v41  ;;  %v5171_v29 = vpop.eup %3936  ;;  %3946 = vpow2.f32 %v1156_v6  ;;  %v1702_v59 = vmul.f32 1.442695, %v1674_v15  ;;  %v1192_v4 = vrot.slane %v1191_v47, 2 }
 0x280   :  { %8011 = vst [vmem:[#allocation27_spill] sm:$0xff] %v5171_v29  ;;  %v5177_v46 = vmul.f32 %v5148_v58, %v4844_v9  ;;  %v5179_v23 = vpop.eup %3938  ;;  %3948 = vpow2.f32 %v1160_v12  ;;  %v1158_v28 = vmul.f32 1.442695, %v1130_v37  ;;  %v1183_v24 = vrot.slane %v1182_v7, 4 }
 0x281   :  { %3852 = vset.pattern.permute.xlu2 %v4118_v5  ;;  %8010 = vst [vmem:[#allocation26_spill] sm:$0xff] %v5167_v48  ;;  %v1478_v30 = vpop.permute.xlu2 %1477  ;;  %v5184_v61 = vstv %s5114_s30  ;;  %3950 = vpow2.f32 %v1700_v50  ;;  %v1704_v40 = vmul.f32 1.442695, %v1675_v31  ;;  %v5191_v60 = vmul.f32 %v5148_v58, %v4916_v34  ;;  %v5195_v6 = vpop.eup %3940  ;;  %s5343_s30 = sld [smem:[#allocation2 + $0x37]] }
 0x282   :  { %1516 = vperm.xlu1 %3849, %v8008_v55   ;;  %8012 = vst [vmem:[#allocation28_spill] sm:$0xff] %v5177_v46  ;;  %v5187_v42 = vmul.f32 %v5106_v38, %v1478_v30  ;;  %v1164_v52 = vmul.f32 1.442695, %v1133_v27  ;;  %v7765_v15 = vperm.slane %v5052_v44, 6  ;;  %v5199_v12 = vstv %s5120_s0  ;;  %s5360_s0 = sld [smem:[#allocation2 + $0x3a]] }
 0x283   :  { %8013 = vst [vmem:[#allocation29_spill] sm:$0xff] %v5179_v23  ;;  %v5202_v37 = vstv %s5127_s17  ;;  %v5206_v50 = vpop.eup %3942  ;;  %3952 = vpow2.f32 %v1702_v59  ;;  %v1193_v38 = vadd.f32 %v1192_v4, %v1191_v47  ;;  %v5212_v31 = vmul.f32 %v5184_v61, %v4844_v9  ;;  %s5377_s17 = sld [smem:[#allocation2 + $0x3d]] }
 0x284   :  { %8014 = vst [vmem:[#allocation11_spill] sm:$0xff] %v5184_v61  ;;  %v5215_v62 = vstv %s5129_s18  ;;  %v5217_v27 = vpop.eup %3944  ;;  %3954 = vpow2.f32 %v1158_v28  ;;  %v1676_v55 = vsub.f32 0.0, %v5039_v51  ;;  %v1184_v41 = vadd.f32 %v1183_v24, %v1182_v7  ;;  %s5388_s18 = sld [smem:[#allocation2 + $0x40]] }
 0x285   :  { %8015 = vst [vmem:[#allocation12_spill] sm:$0xff] %v5191_v60  ;;  %v5224_v47 = vmul.f32 %v5184_v61, %v4916_v34  ;;  %v5226_v59 = vpop.eup %3946  ;;  %3956 = vpow2.f32 %v1704_v40  ;;  %v5232_v4 = vmul.f32 %v5199_v12, %v4844_v9  ;;  %v5236_v51 = vmul.f32 %v5199_v12, %v4916_v34 }
 0x286   :  { %8016 = vst [vmem:[#allocation67_spill] sm:$0xff] %v5195_v6  ;;  %v5240_v7 = vmul.f32 %v5202_v37, %v4844_v9  ;;  %v5242_v28 = vpop.eup %3948  ;;  %3958 = vpow2.f32 %v1164_v52  ;;  %v5251_v24 = vmul.f32 %v5202_v37, %v4916_v34  ;;  %v5255_v30 = vmul.f32 %v5215_v62, %v4844_v9 }
 0x287   :  { %8017 = vst [vmem:[#allocation68_spill] sm:$0xff] %v5199_v12  ;;  %v5258_v40 = vstv %s5135_s4  ;;  %v5260_v52 = vpop.eup %3950  ;;  %v5283_v46 = vstv %s5169_s20  ;;  %v5295_v58 = vstv %s5181_s22  ;;  %v5300_v57 = vstv %s5193_s23  ;;  %s5406_s4 = sld [smem:[#allocation2 + $0x43]] }
 0x288   :  { %8018 = vst [vmem:[#allocation69_spill] sm:$0xff] %v5202_v37  ;;  %v1677_v29 = vsub.f32 0.0, %v5118_v18  ;;  %s5535_s20 = sld [smem:[#allocation2 + $0x6]] }
 0x289   :  { %8019 = vst [vmem:[#allocation70_spill] sm:$0xff] %v5206_v50  ;;  %985 = vperm.xlu2 %3852, %v7765_v15   ;;  %v1194_v15 = vrot.slane %v1193_v38, 1  ;;  %v947_v37 = vpop.permute.xlu2 %946  ;;  %v1452_v12 = vpop.permute.xlu1 %1451  ;;  %v5318_v50 = vstv %s5208_s25  ;;  %s6044_s25 = sld [smem:[#allocation2 + $0xf]] }
 0x28a   :  { %8020 = vst [vmem:[#allocation71_spill] sm:$0xff] %v5212_v31  ;;  %3851 = vset.pattern.permute.xlu1 %v4143_v21  ;;  %v5276_v31 = vstv %s5156_s14  ;;  %v1172_v61 = vmul.f32 %v5101_v39, %v947_v37  ;;  %v1710_v60 = vmul.f32 %v5082_v45, %v1452_v12  ;;  %v5303_v39 = vstv %s5204_s24  ;;  %s5530_s14 = sld [smem:[#allocation2 + $0x3]] }
 0x28b   :  { %8021 = vst [vmem:[#allocation72_spill] sm:$0xff] %v5215_v62  ;;  %v5305_v12 = vadd.f32 %v1194_v15, %v1193_v38  ;;  %v5322_v15 = vmul.f32 %v5258_v40, %v4916_v34  ;;  %s5606_s24 = sld [smem:[#allocation2 + $0xc]] }
 0x28c   :  { %8022 = vst [vmem:[#allocation73_spill] sm:$0xff] %v5217_v27  ;;  %v1726_v17 = vadd.f32 %v5047_v35, %v1710_v60  ;;  %v5327_v35 = vstv %s5220_s26  ;;  %v8052_v60 = vld [vmem:[#allocation10_spill] sm:$0xff]  ;;  %s7303_s22 = sld [smem:[#allocation2 + $0x25]] }
 0x28d   :  { %8023 = vst [vmem:[#allocation74_spill] sm:$0xff] %v5224_v47  ;;  %v5273_v47 = vstv %s5145_s5  ;;  %v5396_v27 = vmul.f32 %v5327_v35, %v5305_v12  ;;  %s5433_s5 = sld [smem:[#allocation2]] }
 0x28e   :  { %8024 = vst [vmem:[#allocation75_spill] sm:$0xff] %v5226_v59  ;;  %v1727_v38 = vrot.slane %v1726_v17, 4  ;;  %v5413_v59 = vstv %s5311_s1  ;;  %s7307_s23 = sld [smem:[#allocation2 + $0x26]] }
 0x28f   :  { %8025 = vst [vmem:[#allocation76_spill] sm:$0xff] %v5232_v4  ;;  %v1185_v4 = vrot.slane %v1184_v41, 2  ;;  %s7399_s26 = sld [smem:[#allocation2 + $0x2b]] }
 0x290   :  { %8026 = vst [vmem:[#allocation77_spill] sm:$0xff] %v5236_v51  ;;  %v5264_v51 = vstv %s5140_s19  ;;  %s5418_s19 = sld [smem:[#allocation2 + $0x46]] }
 0x291   :  { %8027 = vst [vmem:[#allocation78_spill] sm:$0xff] %v5240_v7  ;;  %v1132_v7 = vsub.f32 0.0, %v4986_v20  ;;  %v5278_v20 = vpop.eup %3952 }
 0x292   :  { %8028 = vst [vmem:[#allocation79_spill] sm:$0xff] %v5242_v28  ;;  %v1186_v28 = vadd.f32 %v1185_v4, %v1184_v41  ;;  %v8053_v41 = vperm.slane %v8052_v60, 6  ;;  %v8054_v4 = vperm.slane %v4226_v10, 4  ;;  %v407_v60 = vperm.slane %v4744_v2, 5 }
 0x293   :  { %8029 = vst [vmem:[#allocation80_spill] sm:$0xff] %v5251_v24  ;;  %v5270_v24 = vmul.f32 %v5215_v62, %v4916_v34  ;;  %v5292_v62 = vstv %s5173_s21  ;;  %v1162_v37 = vmul.f32 1.442695, %v1132_v7  ;;  %s5586_s21 = sld [smem:[#allocation2 + $0x9]] }
 0x294   :  { %8030 = vst [vmem:[#allocation81_spill] sm:$0xff] %v5255_v30  ;;  %v1706_v30 = vmul.f32 1.442695, %v1676_v55  ;;  %v5289_v55 = vpop.eup %3954  ;;  %1529 = vperm.xlu2 %3852, %v8053_v41   ;;  %405 = vperm.xlu1 %3851, %v8054_v4   ;;  %v1728_v41 = vadd.f32 %v1727_v38, %v1726_v17  ;;  %v5358_v4 = vmul.f32 %v5264_v51, %v5305_v12 }
 0x295   :  { %8031 = vst [vmem:[#allocation82_spill] sm:$0xff] %v5258_v40  ;;  %v3957_v45 = vpop.eup %3956  ;;  %v5375_v17 = vmul.f32 %v5283_v46, %v5305_v12 }
 0x296   :  { %8032 = vst [vmem:[#allocation83_spill] sm:$0xff] %v5260_v52  ;;  %v5313_v22 = vpop.eup %3958  ;;  %3960 = vpow2.f32 %v1706_v30  ;;  %v5341_v7 = vmul.f32 %v3957_v45, %v5064_v19  ;;  %v5346_v30 = vstv %s5247_s7  ;;  %v5363_v19 = vstv %s5266_s27  ;;  %s6676_s7 = sld [smem:[#allocation2 + $0x14]] }
 0x297   :  { %8033 = vst [vmem:[#allocation84_spill] sm:$0xff] %v5264_v51  ;;  %3962 = vpow2.f32 %v1162_v37  ;;  %v1187_v45 = vrot.slane %v1186_v28, 1  ;;  %v1729_v37 = vrot.slane %v1728_v41, 2  ;;  %v5410_v52 = vmul.f32 %v5346_v30, %v5305_v12  ;;  %s7454_s27 = sld [smem:[#allocation2 + $0x2f]] }
 0x298   :  { %8034 = vst [vmem:[#allocation85_spill] sm:$0xff] %v5270_v24  ;;  %v5287_v24 = vmul.f32 %v5258_v40, %v4844_v9  ;;  %v1465_v40 = vpop.permute.xlu1 %1464 }
 0x299   :  { %8035 = vst [vmem:[#allocation86_spill] sm:$0xff] %v5273_v47  ;;  %v1712_v38 = vmul.f32 %v5088_v63, %v1465_v40  ;;  %v5403_v40 = vstv %s5297_s28  ;;  %v5416_v48 = vadd.f32 %v1187_v45, %v1186_v28 }
 0x29a   :  { %8036 = vst [vmem:[#allocation87_spill] sm:$0xff] %v5276_v31  ;;  %v5437_v28 = vmul.f32 %v5403_v40, %v5305_v12 }
 0x29b   :  { %8037 = vst [vmem:[#allocation88_spill] sm:$0xff] %v5278_v20  ;;  %v1730_v20 = vadd.f32 %v1729_v37, %v1728_v41  ;;  %v5422_v41 = vmul.f32 %v5363_v19, %v5305_v12  ;;  %v2632_v10 = vmul.f32 %v5264_v51, %v5416_v48 }
 0x29c   :  { %8038 = vst [vmem:[#allocation89_spill] sm:$0xff] %v5283_v46  ;;  %3854 = vset.pattern.permute.xlu2 %v4143_v21 }
 0x29d   :  { %8039 = vst [vmem:[#allocation90_spill] sm:$0xff] %v5287_v24  ;;  %v5308_v24 = vadd.f32 %v5164_v25, %v1172_v61  ;;  %v5330_v25 = vstv %s5228_s6  ;;  %v5334_v61 = vmul.f32 %v5300_v57, %v4844_v9  ;;  %s7446_s6 = sld [smem:[#allocation2 + $0x2e]] }
 0x29e   :  { %8040 = vst [vmem:[#allocation91_spill] sm:$0xff] %v5289_v55  ;;  %v5400_v63 = vmul.f32 %v5330_v25, %v5305_v12  ;;  %v1733_v55 = vadd.f32 %v5085_v0, %v1712_v38  ;;  %v5426_v0 = vmul.f32 %v5303_v39, %v4916_v34  ;;  %v1731_v38 = vrot.slane %v1730_v20, 1 }
 0x29f   :  { %8041 = vst [vmem:[#allocation92_spill] sm:$0xff] %v5292_v62  ;;  %v1204_v45 = vrot.slane %v5308_v24, 4 }
 0x2a0   :  { %8042 = vst [vmem:[#allocation93_spill] sm:$0xff] %v5295_v58  ;;  %v1734_v23 = vrot.slane %v1733_v55, 4 }
 0x2a1   :  { %8043 = vst [vmem:[#allocation94_spill] sm:$0xff] %v5300_v57 }
 0x2a2   :  { %8044 = vst [vmem:[#allocation95_spill] sm:$0xff] %v5303_v39 }
 0x2a3   :  { %8045 = vst [vmem:[#allocation96_spill] sm:$0xff] %v5305_v12 }
 0x2a4   :  { %8046 = vst [vmem:[#allocation97_spill] sm:$0xff] %v5313_v22  ;;  %v3961_v22 = vpop.eup %3960  ;;  %418 = vperm.xlu2 %3854, %v407_v60  }
 0x2a5   :  { %8047 = vst [vmem:[#allocation98_spill] sm:$0xff] %v5318_v50  ;;  %v5428_v37 = vpop.eup %3962 }
 0x2a6   :  { %8048 = vst [vmem:[#allocation99_spill] sm:$0xff] %v5322_v15  ;;  %v5350_v15 = vmul.f32 %v5300_v57, %v4916_v34  ;;  %v5382_v57 = vmul.f32 %v5292_v62, %v5305_v12  ;;  %v5447_v34 = vstv %s5324_s29 }
 0x2a7   :  { %8049 = vst [vmem:[#allocation100_spill] sm:$0xff] %v5327_v35 }
 0x2a8   :  { %8050 = vst [vmem:[#allocation101_spill] sm:$0xff] %v5330_v25 }
 0x2a9   :  { %8051 = vst [vmem:[#allocation102_spill] sm:$0xff] %v5334_v61  ;;  %v5354_v61 = vmul.f32 %v5303_v39, %v4844_v9  ;;  %v5386_v9 = vmul.f32 %v5295_v58, %v5305_v12  ;;  %v5444_v39 = vstv %s5315_s2 }
 0x2aa   :  { %8055 = vst [vmem:[#allocation103_spill] sm:$0xff] %v5341_v7  ;;  %v5392_v7 = vmul.f32 %v5318_v50, %v5305_v12 }
 0x2ab   :  { %8056 = vst [vmem:[#allocation104_spill] sm:$0xff] %v5346_v30 }
 0x2ac   :  { %8057 = vst [vmem:[#allocation105_spill] sm:$0xff] %v5350_v15  ;;  %v5367_v15 = vmul.f32 %v5273_v47, %v5305_v12 }
 0x2ad   :  { %8058 = vst [vmem:[#allocation106_spill] sm:$0xff] %v5354_v61  ;;  %v5371_v61 = vmul.f32 %v5276_v31, %v5305_v12 }
 0x2ae   :  { %8059 = vst [vmem:[#allocation107_spill] sm:$0xff] %v5363_v19 }
 0x2af   :  { %8060 = vst [vmem:[#allocation108_spill] sm:$0xff] %v5396_v27  ;;  %v5494_v27 = vstv %s5418_s19  ;;  %s7167_s19 = sld [smem:[#allocation2 + $0x1f]] }
 0x2b0   :  { %8061 = vst [vmem:[#allocation109_spill] sm:$0xff] %v5400_v63  ;;  %v5467_v63 = vstv %s5377_s17  ;;  %s7072_s17 = sld [smem:[#allocation2 + $0x1a]] }
 0x2b1   :  { %8062 = vst [vmem:[#allocation110_spill] sm:$0xff] %v5410_v52  ;;  %v8068_v52 = vld [vmem:[#allocation13_spill] sm:$0xff] }
 0x2b2   :  { %8063 = vst [vmem:[#allocation111_spill] sm:$0xff] %v5413_v59  ;;  %v5431_v18 = vmul.f32 %v3961_v22, %v8068_v52  ;;  %v5451_v22 = vmul.f32 %v5413_v59, %v5305_v12  ;;  %v5453_v52 = vadd.f32 %v1731_v38, %v1730_v20  ;;  %v2732_v38 = vmul.f32 %v5276_v31, %v5416_v48 }
 0x2b3   :  { %8064 = vst [vmem:[#allocation112_spill] sm:$0xff] %v5416_v48  ;;  %v5497_v31 = vstv %s5433_s5  ;;  %s6730_s5 = sld [smem:[#allocation2 + $0x12]] }
 0x2b4   :  { %8065 = vst [vmem:[#allocation113_spill] sm:$0xff] %v5422_v41  ;;  %v5461_v41 = vmul.f32 1.442695, %v1677_v29  ;;  %v2678_v29 = vmul.f32 %v5273_v47, %v5416_v48  ;;  %v2688_v2 = vmul.f32 %v5447_v34, %v5453_v52 }
 0x2b5   :  { %8066 = vst [vmem:[#allocation114_spill] sm:$0xff] %v5426_v0  ;;  %v8071_v0 = vperm.slane %v5052_v44, 6 }
 0x2b6   :  { %8067 = vst [vmem:[#allocation115_spill] sm:$0xff] %v5428_v37  ;;  %v5456_v37 = vstv %s5343_s30  ;;  %v2696_v21 = vadd.f32 %v2688_v2, %v2678_v29  ;;  %v2948_v2 = vmul.f32 %v5318_v50, %v5416_v48  ;;  %s7028_s30 = sld [smem:[#allocation2 + $0x17]] }
 0x2b7   :  { %8069 = vst [vmem:[#allocation13_spill] sm:$0xff] %v5431_v18  ;;  %991 = vperm.xlu1 %3851, %v8071_v0   ;;  %v1735_v18 = vadd.f32 %v1734_v23, %v1733_v55  ;;  %v1497_v0 = vpop.permute.xlu2 %1496  ;;  %v2642_v23 = vmul.f32 %v5444_v39, %v5453_v52  ;;  %v1205_v55 = vadd.f32 %v1204_v45, %v5308_v24 }
 0x2b8   :  { %8070 = vst [vmem:[#allocation116_spill] sm:$0xff] %v5437_v28  ;;  %v5459_v28 = vstv %s5360_s0  ;;  %v5470_v20 = vmul.f32 %v5150_v54, %v1497_v0  ;;  %v2742_v54 = vmul.f32 %v5456_v37, %v5453_v52  ;;  %s7067_s0 = sld [smem:[#allocation2 + $0x19]] }
 0x2b9   :  { %8072 = vst [vmem:[#allocation117_spill] sm:$0xff] %v5444_v39  ;;  %v1736_v12 = vrot.slane %v1735_v18, 2  ;;  %v2796_v24 = vmul.f32 %v5459_v28, %v5453_v52 }
 0x2ba   :  { %8073 = vst [vmem:[#allocation118_spill] sm:$0xff] %v5447_v34  ;;  %v2750_v16 = vadd.f32 %v2742_v54, %v2732_v38  ;;  %v940_v54 = vpop.permute.xlu1 %939 }
 0x2bb   :  { %8074 = vst [vmem:[#allocation119_spill] sm:$0xff] %v5451_v22  ;;  %v1737_v0 = vadd.f32 %v1736_v12, %v1735_v18  ;;  %v5484_v22 = vstv %s5388_s18  ;;  %v1206_v12 = vrot.slane %v1205_v55, 2  ;;  %v2786_v18 = vmul.f32 %v5283_v46, %v5416_v48  ;;  %s7110_s18 = sld [smem:[#allocation2 + $0x1c]] }
 0x2bc   :  { %8075 = vst [vmem:[#allocation120_spill] sm:$0xff] %v5453_v52  ;;  %v5516_v46 = vmul.f32 %v5327_v35, %v5416_v48 }
 0x2bd   :  { %8076 = vst [vmem:[#allocation121_spill] sm:$0xff] %v5456_v37  ;;  %v1738_v45 = vrot.slane %v1737_v0, 1  ;;  %v2804_v32 = vadd.f32 %v2796_v24, %v2786_v18  ;;  %v1207_v6 = vadd.f32 %v1206_v12, %v1205_v55  ;;  %v8087_v12 = vld [vmem:[#allocation49_spill] sm:$0xff] }
 0x2be   :  { %8077 = vst [vmem:[#allocation122_spill] sm:$0xff] %v5459_v28 }
 0x2bf   :  { %8078 = vst [vmem:[#allocation123_spill] sm:$0xff] %v5461_v41  ;;  %v2650_v41 = vadd.f32 %v2642_v23, %v2632_v10  ;;  %3853 = vset.pattern.permute.xlu1 %v4118_v5  ;;  %v2714_v10 = vadd.f32 %v4882_v26, %v2696_v21  ;;  %v2850_v23 = vmul.f32 %v5467_v63, %v5453_v52  ;;  %v380_v38 = vpop.permute.xlu2 %379 }
 0x2c0   :  { %8079 = vst [vmem:[#allocation124_spill] sm:$0xff] %v5467_v63  ;;  %v5505_v29 = vadd.f32 %v1738_v45, %v1737_v0  ;;  %v2768_v26 = vadd.f32 %v4889_v13, %v2750_v16  ;;  %v8086_v0 = vld [vmem:[#allocation39_spill] sm:$0xff] }
 0x2c1   :  { %8080 = vst [vmem:[#allocation125_spill] sm:$0xff] %v5470_v20  ;;  %v5487_v20 = vstv %s5406_s4  ;;  %v2668_v36 = vadd.f32 %v4878_v43, %v2650_v41  ;;  %v2840_v43 = vmul.f32 %v5292_v62, %v5416_v48  ;;  %v2894_v41 = vmul.f32 %v5295_v58, %v5416_v48  ;;  %s7116_s4 = sld [smem:[#allocation2 + $0x1d]] }
 0x2c2   :  { %8081 = vst [vmem:[#allocation126_spill] sm:$0xff] %v5484_v22  ;;  %v5519_v45 = vmul.f32 %v8086_v0, %v380_v38  ;;  %v1171_v62 = vmul.f32 %v5092_v14, %v940_v54  ;;  %v2643_v58 = vmul.f32 %v5444_v39, %v5505_v29  ;;  %v2689_v50 = vmul.f32 %v5447_v34, %v5505_v29  ;;  %v1484_v0 = vpop.permute.xlu1 %1483 }
 0x2c3   :  { %8082 = vst [vmem:[#allocation127_spill] sm:$0xff] %v5487_v20  ;;  %v2722_v21 = vmax.f32 %v2668_v36, %v2714_v10  ;;  %v2743_v13 = vmul.f32 %v5456_v37, %v5505_v29  ;;  %v2797_v36 = vmul.f32 %v5459_v28, %v5505_v29  ;;  %v2858_v16 = vadd.f32 %v2850_v23, %v2840_v43 }
 0x2c4   :  { %8083 = vst [vmem:[#allocation128_spill] sm:$0xff] %v5494_v27  ;;  %v1196_v24 = vadd.f32 %v1171_v62, %v5154_v56  ;;  %v2651_v14 = vadd.f32 %v2643_v58, %v5358_v4  ;;  %v2697_v10 = vadd.f32 %v2689_v50, %v5367_v15  ;;  %v2822_v38 = vadd.f32 %v8087_v12, %v2804_v32 }
 0x2c5   :  { %8084 = vst [vmem:[#allocation129_spill] sm:$0xff] %v5497_v31  ;;  %v2776_v18 = vmax.f32 %v2722_v21, %v2768_v26  ;;  %v2751_v55 = vadd.f32 %v2743_v13, %v5371_v61  ;;  %v2851_v54 = vmul.f32 %v5467_v63, %v5505_v29  ;;  %v2904_v23 = vmul.f32 %v5484_v22, %v5453_v52  ;;  %v8089_v61 = vld [vmem:[#allocation50_spill] sm:$0xff] }
 0x2c6   :  { %8085 = vst [vmem:[#allocation130_spill] sm:$0xff] %v5505_v29  ;;  %v1197_v43 = vrot.slane %v1196_v24, 4  ;;  %v2669_v56 = vadd.f32 %v4950_v8, %v2651_v14  ;;  %v2715_v58 = vadd.f32 %v4954_v11, %v2697_v10  ;;  %v2805_v50 = vadd.f32 %v2797_v36, %v5375_v17 }
 0x2c7   :  { %v1208_v62 = vrot.slane %v1207_v6, 1  ;;  %v8088_v15 = vperm.slane %v5052_v44, 7  ;;  %412 = vperm.xlu1 %3853, %v407_v60   ;;  %v2876_v32 = vadd.f32 %v8089_v61, %v2858_v16  ;;  %v5551_v4 = vmul.f32 %v5330_v25, %v5416_v48 }
 0x2c8   :  { %v5555_v21 = vmul.f32 %v5346_v30, %v5416_v48  ;;  %v1198_v8 = vadd.f32 %v1197_v43, %v1196_v24  ;;  %v2723_v11 = vmax.f32 %v2669_v56, %v2715_v58  ;;  %v2769_v17 = vadd.f32 %v4958_v3, %v2751_v55 }
 0x2c9   :  { %1004 = vperm.xlu2 %3854, %v8088_v15   ;;  %v2830_v26 = vmax.f32 %v2776_v18, %v2822_v38  ;;  %v2859_v60 = vadd.f32 %v2851_v54, %v5382_v57  ;;  %v2905_v13 = vmul.f32 %v5484_v22, %v5505_v29  ;;  %v2912_v36 = vadd.f32 %v2904_v23, %v2894_v41 }
 0x2ca   :  { %v2958_v16 = vmul.f32 %v5487_v20, %v5453_v52  ;;  %v1199_v14 = vrot.slane %v1198_v8, 2  ;;  %v1715_v10 = vmul.f32 %v5142_v53, %v1484_v0  ;;  %v2777_v12 = vmax.f32 %v2723_v11, %v2769_v17  ;;  %v1504_v17 = vpop.permute.xlu2 %1503 }
 0x2cb   :  { %v2823_v24 = vadd.f32 %v4969_v1, %v2805_v50  ;;  %v5565_v43 = vadd.f32 %v1208_v62, %v1207_v6  ;;  %v5568_v3 = vstv %s5530_s14  ;;  %v5572_v57 = vmul.f32 %v5363_v19, %v5416_v48  ;;  %v8093_v50 = vld [vmem:[#allocation52_spill] sm:$0xff]  ;;  %s6544_s14 = sld [smem:[#allocation2 + $0x2a]] }
 0x2cc   :  { %8091 = vst [vmem:[#allocation49_spill] sm:$0xff] %v5568_v3  ;;  %v5576_v41 = vmul.f32 %v5403_v40, %v5416_v48  ;;  %v1740_v18 = vadd.f32 %v1715_v10, %v5187_v42  ;;  %v2884_v38 = vmax.f32 %v2830_v26, %v2876_v32  ;;  %v5580_v53 = vstv %s5535_s20  ;;  %v8096_v10 = vld [vmem:[#allocation67_spill] sm:$0xff]  ;;  %s7251_s20 = sld [smem:[#allocation2 + $0x22]] }
 0x2cd   :  { %8090 = vst [vmem:[#allocation39_spill] sm:$0xff] %v5565_v43  ;;  %v2831_v55 = vmax.f32 %v2777_v12, %v2823_v24  ;;  %v2877_v1 = vadd.f32 %v4979_v49, %v2859_v60  ;;  %v2913_v6 = vadd.f32 %v2905_v13, %v5386_v9  ;;  %v2959_v54 = vmul.f32 %v5487_v20, %v5505_v29  ;;  %v5597_v9 = vld [vmem:[%s7702_s3] sm:$0xff]  ;;  %v8095_v60 = vld [vmem:[#allocation53_spill] sm:$0xff]  ;;  %s5669_s3 = sld [smem:[#allocation2 + $0x11]] }
 0x2ce   :  { %8092 = vst [vmem:[#allocation50_spill] sm:$0xff] %v5580_v53  ;;  %v2966_v23 = vadd.f32 %v2958_v16, %v2948_v2  ;;  %v1200_v56 = vadd.f32 %v1199_v14, %v1198_v8  ;;  %v1741_v58 = vrot.slane %v1740_v18, 4  ;;  %v2930_v62 = vadd.f32 %v8093_v50, %v2912_v36 }
 0x2cf   :  { %v3012_v42 = vmul.f32 %v5494_v27, %v5453_v52  ;;  %998 = vperm.xlu1 %3853, %v8088_v15   ;;  %v5602_v2 = vmul.f32 %v5264_v51, %v5565_v43  ;;  %v3013_v61 = vmul.f32 %v5494_v27, %v5505_v29  ;;  %v5614_v32 = vmul.f32 %v5273_v47, %v5565_v43  ;;  %v8103_v15 = vld [vmem:[#allocation57_spill] sm:$0xff] }
 0x2d0   :  { %v1742_v44 = vadd.f32 %v1741_v58, %v1740_v18  ;;  %v2885_v8 = vmax.f32 %v2831_v55, %v2877_v1  ;;  %v2938_v11 = vmax.f32 %v2884_v38, %v2930_v62  ;;  %v2931_v26 = vadd.f32 %v4983_v33, %v2913_v6  ;;  %v8098_v18 = vld [vmem:[#allocation87_spill] sm:$0xff]  ;;  %v8099_v33 = vld [vmem:[#allocation89_spill] sm:$0xff]  ;;  %v8100_v38 = vld [vmem:[#allocation92_spill] sm:$0xff] }
 0x2d1   :  { %3857 = vset.pattern.permute.xlu2 %v4118_v5  ;;  %v5610_v5 = vmul.f32 %v5413_v59, %v5416_v48  ;;  %v2967_v0 = vadd.f32 %v2959_v54, %v5392_v7  ;;  %v2984_v13 = vadd.f32 %v8095_v60, %v2966_v23  ;;  %v1784_v36 = vmul.f32 %v5497_v31, %v5453_v52  ;;  %v8101_v6 = vld [vmem:[#allocation108_spill] sm:$0xff]  ;;  %v8102_v23 = vld [vmem:[#allocation93_spill] sm:$0xff] }
 0x2d2   :  { %v1201_v16 = vrot.slane %v1200_v56, 1  ;;  %v1743_v14 = vrot.slane %v1742_v44, 2  ;;  %v5622_v12 = vmul.f32 %v8096_v10, %v1504_v17  ;;  %v3020_v24 = vadd.f32 %v3012_v42, %v5516_v46 }
 0x2d3   :  { %8094 = vst [vmem:[#allocation52_spill] sm:$0xff] %v5610_v5  ;;  %v5627_v55 = vmul.f32 %v8098_v18, %v5565_v43  ;;  %v5631_v7 = vmul.f32 %v8099_v33, %v5565_v43  ;;  %v5635_v1 = vmul.f32 %v8100_v38, %v5565_v43  ;;  %v3021_v54 = vadd.f32 %v3013_v61, %v8101_v6  ;;  %v8106_v61 = vld [vmem:[#allocation98_spill] sm:$0xff]  ;;  %v1491_v5 = vpop.permute.xlu1 %1490 }
 0x2d4   :  { %8097 = vst [vmem:[#allocation53_spill] sm:$0xff] %v5622_v12  ;;  %v5640_v58 = vmul.f32 %v8102_v23, %v5565_v43  ;;  %v2939_v50 = vmax.f32 %v2885_v8, %v2931_v26  ;;  %v2992_v46 = vmax.f32 %v2938_v11, %v2984_v13  ;;  %v1785_v62 = vmul.f32 %v5497_v31, %v5505_v29  ;;  %v8108_v8 = vld [vmem:[#allocation61_spill] sm:$0xff]  ;;  %v8109_v11 = vld [vmem:[#allocation54_spill] sm:$0xff]  ;;  %v8118_v12 = vld [vmem:[#allocation32_spill] sm:$0xff] }
 0x2d5   :  { %v1744_v42 = vadd.f32 %v1743_v14, %v1742_v44  ;;  %v1802_v17 = vadd.f32 %v8103_v15, %v1784_v36  ;;  %v1830_v60 = vmul.f32 %v5568_v3, %v5453_v52  ;;  %v5648_v10 = vstv %s5586_s21  ;;  %v8111_v44 = vld [vmem:[#allocation8_spill] sm:$0xff]  ;;  %v8113_v14 = vld [vmem:[#allocation62_spill] sm:$0xff]  ;;  %s7255_s21 = sld [smem:[#allocation2 + $0x23]] }
 0x2d6   :  { %8104 = vst [vmem:[#allocation67_spill] sm:$0xff] %v5648_v10  ;;  %v5650_v49 = vadd.f32 %v1201_v16, %v1200_v56  ;;  %v5654_v6 = vmul.f32 %v8106_v61, %v5565_v43  ;;  %v2985_v26 = vadd.f32 %v8108_v8, %v2967_v0  ;;  %v3038_v13 = vadd.f32 %v8109_v11, %v3020_v24  ;;  %v8115_v8 = vld [vmem:[#allocation63_spill] sm:$0xff] }
 0x2d7   :  { %v8110_v48 = vperm.slane %v5597_v9, 6  ;;  %3856 = vset.pattern.permute.xlu1 %v8111_v44  ;;  %v5663_v36 = vmul.f32 %v5327_v35, %v5565_v43  ;;  %v3039_v56 = vadd.f32 %v8113_v14, %v3021_v54  ;;  %v5667_v16 = vstv %s5606_s24  ;;  %v387_v44 = vpop.permute.xlu2 %386  ;;  %v8117_v14 = vld [vmem:[#allocation58_spill] sm:$0xff]  ;;  %s7347_s24 = sld [smem:[#allocation2 + $0x28]] }
 0x2d8   :  { %8105 = vst [vmem:[#allocation108_spill] sm:$0xff] %v5650_v49  ;;  %v2993_v15 = vmax.f32 %v2939_v50, %v2985_v26  ;;  %v3046_v0 = vmax.f32 %v2992_v46, %v3038_v13  ;;  %v1803_v24 = vadd.f32 %v8115_v8, %v1785_v62  ;;  %v1745_v11 = vrot.slane %v1744_v42, 1  ;;  %v8119_v46 = vld [vmem:[#allocation25_spill] sm:$0xff] }
 0x2d9   :  { %8107 = vst [vmem:[#allocation57_spill] sm:$0xff] %v5654_v6  ;;  %425 = vperm.xlu2 %3857, %v8110_v48   ;;  %v5674_v48 = vmul.f32 %v5330_v25, %v5565_v43  ;;  %v5677_v59 = vadd.f32 %v5551_v4, %v1802_v17  ;;  %v1831_v54 = vmul.f32 %v5568_v3, %v5505_v29 }
 0x2da   :  { %8112 = vst [vmem:[#allocation61_spill] sm:$0xff] %v5663_v36  ;;  %v1848_v36 = vadd.f32 %v8117_v14, %v1830_v60  ;;  %v628_v50 = vmul.f32 %v8118_v12, %v387_v44  ;;  %v1716_v26 = vmul.f32 %v8119_v46, %v1491_v5  ;;  %v2634_v62 = vmul.f32 %v5264_v51, %v5650_v49  ;;  %v8120_v60 = vld [vmem:[#allocation66_spill] sm:$0xff]  ;;  %v8121_v44 = vld [vmem:[#allocation125_spill] sm:$0xff] }
 0x2db   :  { %8114 = vst [vmem:[#allocation54_spill] sm:$0xff] %v5667_v16  ;;  %v2680_v13 = vmul.f32 %v5273_v47, %v5650_v49  ;;  %v2734_v8 = vmul.f32 %v8098_v18, %v5650_v49  ;;  %v2788_v4 = vmul.f32 %v8099_v33, %v5650_v49  ;;  %v2842_v17 = vmul.f32 %v8100_v38, %v5650_v49  ;;  %v8123_v18 = vld [vmem:[#allocation64_spill] sm:$0xff] }
 0x2dc   :  { %8116 = vst [vmem:[#allocation8_spill] sm:$0xff] %v5674_v48  ;;  %v2896_v12 = vmul.f32 %v8102_v23, %v5650_v49  ;;  %v659_v5 = vadd.f32 %v8120_v60, %v628_v50  ;;  %v1747_v14 = vadd.f32 %v8121_v44, %v1716_v26  ;;  %v2950_v46 = vmul.f32 %v8106_v61, %v5650_v49  ;;  %v8125_v26 = vld [vmem:[#allocation109_spill] sm:$0xff] }
 0x2dd   :  { %v3047_v47 = vmax.f32 %v2993_v15, %v3039_v56  ;;  %v5700_v51 = vadd.f32 %v1745_v11, %v1744_v42  ;;  %v3004_v33 = vmul.f32 %v5327_v35, %v5650_v49  ;;  %v1849_v48 = vadd.f32 %v8123_v18, %v1831_v54  ;;  %v8126_v56 = vld [vmem:[#allocation9_spill] sm:$0xff]  ;;  %v8128_v15 = vld [vmem:[#allocation10_spill] sm:$0xff] }
 0x2de   :  { %v5706_v38 = vadd.f32 %v5555_v21, %v1848_v36  ;;  %v660_v23 = vrot.slane %v659_v5, 4  ;;  %v1748_v6 = vrot.slane %v1747_v14, 4  ;;  %v5710_v50 = vmul.f32 %v5330_v25, %v5650_v49 }
 0x2df   :  { %8122 = vst [vmem:[#allocation62_spill] sm:$0xff] %v5700_v51  ;;  %v5713_v60 = vadd.f32 %v8125_v26, %v1803_v24  ;;  %v8127_v42 = vperm.slane %v8126_v56, 7  ;;  %v8129_v11 = vperm.slane %v8128_v15, 7  ;;  %v5721_v18 = vmul.f32 %v5346_v30, %v5650_v49 }
 0x2e0   :  { %8124 = vst [vmem:[#allocation63_spill] sm:$0xff] %v5710_v50  ;;  %v5725_v21 = vmul.f32 %v5346_v30, %v5565_v43  ;;  %v1884_v36 = vmul.f32 %v5580_v53, %v5453_v52  ;;  %v5730_v54 = vstv %s5669_s3  ;;  %v661_v24 = vadd.f32 %v660_v23, %v659_v5  ;;  %s7351_s3 = sld [smem:[#allocation2 + $0x29]] }
 0x2e1   :  { %438 = vperm.xlu2 %3857, %v8127_v42   ;;  %1548 = vperm.xlu1 %3856, %v8129_v11   ;;  %8130 = vst [vmem:[#allocation58_spill] sm:$0xff] %v5721_v18  ;;  %v1749_v44 = vadd.f32 %v1748_v6, %v1747_v14  ;;  %v5733_v26 = vsel %vm3062_vm4, %v3047_v47, %v3046_v0  ;;  %v374_v42 = vpop.permute.xlu1 %373  ;;  %v8134_v11 = vld [vmem:[#allocation110_spill] sm:$0xff]  ;;  %v8136_v0 = vld [vmem:[#allocation31_spill] sm:$0xff] }
 0x2e2   :  { %8131 = vst [vmem:[#allocation32_spill] sm:$0xff] %v5725_v21  ;;  %v1885_v56 = vmul.f32 %v5580_v53, %v5505_v29  ;;  %v2644_v15 = vmul.f32 %v5444_v39, %v5700_v51  ;;  %v5740_v30 = vadd.f32 %v8134_v11, %v1849_v48  ;;  %v1874_v25 = vmax.f32 %v5677_v59, %v5706_v38 }
 0x2e3   :  { %8132 = vst [vmem:[#allocation25_spill] sm:$0xff] %v5730_v54  ;;  %v5746_v23 = vmul.f32 %v5363_v19, %v5650_v49  ;;  %v662_v6 = vrot.slane %v661_v24, 2  ;;  %v1750_v47 = vrot.slane %v1749_v44, 2  ;;  %v626_v5 = vmul.f32 %v8136_v0, %v374_v42  ;;  %v8137_v42 = vld [vmem:[#allocation59_spill] sm:$0xff] }
 0x2e4   :  { %8133 = vst [vmem:[#allocation66_spill] sm:$0xff] %v5733_v26  ;;  %v2690_v14 = vmul.f32 %v5447_v34, %v5700_v51  ;;  %v2744_v54 = vmul.f32 %v5456_v37, %v5700_v51  ;;  %v2798_v48 = vmul.f32 %v5459_v28, %v5700_v51  ;;  %v2852_v59 = vmul.f32 %v5467_v63, %v5700_v51 }
 0x2e5   :  { %8135 = vst [vmem:[#allocation125_spill] sm:$0xff] %v5746_v23  ;;  %v2906_v38 = vmul.f32 %v5484_v22, %v5700_v51  ;;  %v663_v11 = vadd.f32 %v662_v6, %v661_v24  ;;  %v1751_v23 = vadd.f32 %v1750_v47, %v1749_v44  ;;  %v652_v35 = vadd.f32 %v5519_v45, %v626_v5 }
 0x2e6   :  { %v1902_v0 = vadd.f32 %v8137_v42, %v1884_v36  ;;  %v5761_v61 = vadd.f32 %v2644_v15, %v2634_v62  ;;  %v2960_v21 = vmul.f32 %v5487_v20, %v5700_v51  ;;  %v3014_v26 = vmul.f32 %v5494_v27, %v5700_v51 }
 0x2e7   :  { %v5769_v18 = vmul.f32 %v5363_v19, %v5565_v43  ;;  %v664_v50 = vrot.slane %v663_v11, 1  ;;  %v1752_v16 = vrot.slane %v1751_v23, 1  ;;  %v653_v24 = vrot.slane %v652_v35, 4 }
 0x2e8   :  { %v2698_v44 = vadd.f32 %v2690_v14, %v2680_v13  ;;  %v8139_v45 = vperm.slane %v5597_v9, 6  ;;  %v5773_v36 = vadd.f32 %v2744_v54, %v2734_v8  ;;  %v5775_v62 = vadd.f32 %v2798_v48, %v2788_v4  ;;  %v8144_v14 = vld [vmem:[#allocation36_spill] sm:$0xff] }
 0x2e9   :  { %8138 = vst [vmem:[#allocation64_spill] sm:$0xff] %v5769_v18  ;;  %v5777_v15 = vadd.f32 %v2852_v59, %v2842_v17  ;;  %v5779_v6 = vadd.f32 %v2906_v38, %v2896_v12  ;;  %v5781_v47 = vadd.f32 %v664_v50, %v663_v11  ;;  %v5783_v5 = vadd.f32 %v1752_v16, %v1751_v23 }
 0x2ea   :  { %431 = vperm.xlu1 %3856, %v8139_v45   ;;  %v654_v42 = vadd.f32 %v653_v24, %v652_v35  ;;  %v5787_v18 = vmul.f32 %v5497_v31, %v5700_v51  ;;  %v5789_v13 = vadd.f32 %v2960_v21, %v2950_v46  ;;  %v5791_v9 = vadd.f32 %v3014_v26, %v3004_v33  ;;  %v8142_v35 = vld [vmem:[#allocation18_spill] sm:$0xff]  ;;  %v8143_v26 = vld [vmem:[#allocation35_spill] sm:$0xff] }
 0x2eb   :  { %8140 = vst [vmem:[#allocation109_spill] sm:$0xff] %v5781_v47  ;;  %v5795_v8 = vmul.f32 %v5568_v3, %v5700_v51  ;;  %v1875_v4 = vmax.f32 %v5713_v60, %v5740_v30  ;;  %v2645_v16 = vmul.f32 %v5444_v39, %v5783_v5  ;;  %v1903_v12 = vadd.f32 %v8142_v35, %v1885_v56 }
 0x2ec   :  { %8141 = vst [vmem:[#allocation9_spill] sm:$0xff] %v5783_v5  ;;  %v655_v17 = vrot.slane %v654_v42, 2  ;;  %v1920_v50 = vadd.f32 %v5572_v57, %v1902_v0  ;;  %v2691_v46 = vmul.f32 %v5447_v34, %v5783_v5  ;;  %v2745_v33 = vmul.f32 %v5456_v37, %v5783_v5 }
 0x2ed   :  { %v1938_v21 = vmul.f32 %v5648_v10, %v5453_v52  ;;  %v1939_v30 = vmul.f32 %v5648_v10, %v5505_v29  ;;  %v2653_v54 = vadd.f32 %v2645_v16, %v5602_v2  ;;  %v2663_v56 = vmul.f32 %v8143_v26, %v5781_v47  ;;  %v8145_v2 = vld [vmem:[#allocation113_spill] sm:$0xff] }
 0x2ee   :  { %v656_v60 = vadd.f32 %v655_v17, %v654_v42  ;;  %v2799_v57 = vmul.f32 %v5459_v28, %v5783_v5  ;;  %v2699_v23 = vadd.f32 %v2691_v46, %v5614_v32  ;;  %v2709_v48 = vmul.f32 %v8144_v14, %v5781_v47  ;;  %v5827_v42 = vpop.permute.xlu2 %978  ;;  %v8146_v32 = vld [vmem:[#allocation37_spill] sm:$0xff] }
 0x2ef   :  { %v2753_v59 = vadd.f32 %v2745_v33, %v5627_v55  ;;  %v5822_v38 = vmul.f32 %v5580_v53, %v5700_v51  ;;  %v2671_v0 = vadd.f32 %v2663_v56, %v2653_v54  ;;  %v1921_v24 = vadd.f32 %v8145_v2, %v1903_v12  ;;  %v8148_v12 = vld [vmem:[#allocation60_spill] sm:$0xff]  ;;  %v966_v56 = vpop.permute.xlu1 %965  ;;  %v8150_v2 = vld [vmem:[#allocation38_spill] sm:$0xff] }
 0x2f0   :  { %v657_v11 = vrot.slane %v656_v60, 1  ;;  %v5825_v45 = vmax.f32 %v1874_v25, %v1920_v50  ;;  %v2717_v17 = vadd.f32 %v2709_v48, %v2699_v23  ;;  %v2763_v16 = vmul.f32 %v8146_v32, %v5781_v47  ;;  %v8149_v50 = vld [vmem:[#allocation17_spill] sm:$0xff] }
 0x2f1   :  { %v2807_v35 = vadd.f32 %v2799_v57, %v5631_v7  ;;  %v2853_v55 = vmul.f32 %v5467_v63, %v5783_v5  ;;  %v5838_v33 = vmul.f32 %v5648_v10, %v5700_v51  ;;  %v1956_v25 = vadd.f32 %v8148_v12, %v1938_v21  ;;  %v8151_v57 = vld [vmem:[#allocation29_spill] sm:$0xff] }
 0x2f2   :  { %v5834_v46 = vadd.f32 %v657_v11, %v656_v60  ;;  %v1957_v54 = vadd.f32 %v8149_v50, %v1939_v30  ;;  %v2725_v23 = vmax.f32 %v2671_v0, %v2717_v17  ;;  %v2771_v48 = vadd.f32 %v2763_v16, %v2753_v59 }
 0x2f3   :  { %v2817_v28 = vmul.f32 %v8150_v2, %v5781_v47  ;;  %v5844_v7 = vmax.f32 %v1875_v4, %v1921_v24  ;;  %v1175_v63 = vmul.f32 %v8151_v57, %v966_v56  ;;  %v2907_v21 = vmul.f32 %v5484_v22, %v5783_v5  ;;  %v8152_v4 = vld [vmem:[#allocation26_spill] sm:$0xff]  ;;  %v8153_v56 = vld [vmem:[#allocation41_spill] sm:$0xff] }
 0x2f4   :  { %8147 = vst [vmem:[#allocation10_spill] sm:$0xff] %v5834_v46  ;;  %v2662_v60 = vmul.f32 %v8143_v26, %v5834_v46  ;;  %v2708_v11 = vmul.f32 %v8144_v14, %v5834_v46  ;;  %v2762_v30 = vmul.f32 %v8146_v32, %v5834_v46  ;;  %v2779_v59 = vmax.f32 %v2725_v23, %v2771_v48 }
 0x2f5   :  { %v2825_v0 = vadd.f32 %v2817_v28, %v2807_v35  ;;  %v2861_v17 = vadd.f32 %v2853_v55, %v5635_v1  ;;  %v1210_v24 = vadd.f32 %v1175_v63, %v8152_v4  ;;  %v2816_v50 = vmul.f32 %v8150_v2, %v5834_v46 }
 0x2f6   :  { %v2670_v16 = vadd.f32 %v2662_v60, %v5761_v61  ;;  %v2716_v12 = vadd.f32 %v2708_v11, %v2698_v44  ;;  %v2870_v57 = vmul.f32 %v8153_v56, %v5834_v46  ;;  %v2871_v14 = vmul.f32 %v8153_v56, %v5781_v47  ;;  %v8154_v60 = vld [vmem:[#allocation116_spill] sm:$0xff] }
 0x2f7   :  { %v5866_v23 = vmul.f32 %v5403_v40, %v5650_v49  ;;  %v5870_v28 = vmul.f32 %v5403_v40, %v5565_v43  ;;  %v1211_v63 = vrot.slane %v1210_v24, 4  ;;  %v2770_v61 = vadd.f32 %v2762_v30, %v5773_v36 }
 0x2f8   :  { %v2724_v1 = vmax.f32 %v2670_v16, %v2716_v12  ;;  %v2833_v44 = vmax.f32 %v2779_v59, %v2825_v0  ;;  %v2915_v35 = vadd.f32 %v2907_v21, %v5640_v58  ;;  %v2961_v55 = vmul.f32 %v5487_v20, %v5783_v5  ;;  %v1523_v16 = vpop.permute.xlu2 %1522  ;;  %v1510_v12 = vpop.permute.xlu1 %1509  ;;  %v8155_v58 = vld [vmem:[#allocation43_spill] sm:$0xff] }
 0x2f9   :  { %v5877_v48 = vadd.f32 %v5576_v41, %v1956_v25  ;;  %v5880_v11 = vadd.f32 %v8154_v60, %v1957_v54  ;;  %v1212_v4 = vadd.f32 %v1211_v63, %v1210_v24  ;;  %v2824_v2 = vadd.f32 %v2816_v50, %v5775_v62  ;;  %v8156_v41 = vld [vmem:[#allocation54_spill] sm:$0xff]  ;;  %v8157_v59 = vld [vmem:[#allocation27_spill] sm:$0xff]  ;;  %v8158_v62 = vld [vmem:[#allocation57_spill] sm:$0xff] }
 0x2fa   :  { %v2778_v56 = vmax.f32 %v2724_v1, %v2770_v61  ;;  %v2879_v32 = vadd.f32 %v2871_v14, %v2861_v17  ;;  %v2878_v36 = vadd.f32 %v2870_v57, %v5777_v15  ;;  %v2924_v21 = vmul.f32 %v8155_v58, %v5834_v46  ;;  %v8159_v57 = vld [vmem:[#allocation53_spill] sm:$0xff] }
 0x2fb   :  { %v2925_v30 = vmul.f32 %v8155_v58, %v5781_v47  ;;  %v1992_v25 = vmul.f32 %v8156_v41, %v5453_v52  ;;  %v1213_v54 = vrot.slane %v1212_v4, 2  ;;  %v1719_v0 = vmul.f32 %v8157_v59, %v1510_v12  ;;  %v8193_v52 = vld [vmem:[#allocation101_spill] sm:$0xff] }
 0x2fc   :  { %v2832_v24 = vmax.f32 %v2778_v56, %v2824_v2  ;;  %v2887_v63 = vmax.f32 %v2833_v44, %v2879_v32  ;;  %v2969_v14 = vadd.f32 %v2961_v55, %v8158_v62  ;;  %v3015_v17 = vmul.f32 %v5494_v27, %v5783_v5  ;;  %v8160_v56 = vld [vmem:[#allocation44_spill] sm:$0xff] }
 0x2fd   :  { %v1993_v50 = vmul.f32 %v8156_v41, %v5505_v29  ;;  %v1754_v1 = vadd.f32 %v1719_v0, %v8159_v57  ;;  %v2933_v60 = vadd.f32 %v2925_v30, %v2915_v35  ;;  %v5901_v12 = vmul.f32 %v8156_v41, %v5700_v51  ;;  %v8162_v57 = vld [vmem:[#allocation61_spill] sm:$0xff] }
 0x2fe   :  { %v2886_v61 = vmax.f32 %v2832_v24, %v2878_v36  ;;  %v1214_v32 = vadd.f32 %v1213_v54, %v1212_v4  ;;  %v2932_v2 = vadd.f32 %v2924_v21, %v5779_v6  ;;  %v2978_v44 = vmul.f32 %v8160_v56, %v5834_v46  ;;  %v8161_v36 = vld [vmem:[#allocation16_spill] sm:$0xff]  ;;  %v8163_v6 = vld [vmem:[#allocation46_spill] sm:$0xff] }
 0x2ff   :  { %v2979_v55 = vmul.f32 %v8160_v56, %v5781_v47  ;;  %v1755_v59 = vrot.slane %v1754_v1, 4  ;;  %v2941_v62 = vmax.f32 %v2887_v63, %v2933_v60  ;;  %v5911_v35 = vadd.f32 %v8161_v36, %v1992_v25  ;;  %v8164_v60 = vld [vmem:[#allocation48_spill] sm:$0xff] }
 0x300   :  { %v2940_v30 = vmax.f32 %v2886_v61, %v2932_v2  ;;  %v3023_v4 = vadd.f32 %v3015_v17, %v8162_v57  ;;  %v1796_v21 = vmul.f32 %v8163_v6, %v5834_v46  ;;  %v1787_v15 = vmul.f32 %v5497_v31, %v5783_v5  ;;  %v986_v25 = vpop.permute.xlu2 %985  ;;  %v8166_v2 = vld [vmem:[#allocation19_spill] sm:$0xff] }
 0x301   :  { %v2987_v24 = vadd.f32 %v2979_v55, %v2969_v14  ;;  %v1756_v54 = vadd.f32 %v1755_v59, %v1754_v1  ;;  %v1797_v63 = vmul.f32 %v8163_v6, %v5781_v47  ;;  %v1842_v0 = vmul.f32 %v8164_v60, %v5834_v46  ;;  %v8165_v14 = vld [vmem:[#allocation45_spill] sm:$0xff]  ;;  %v8167_v57 = vld [vmem:[#allocation111_spill] sm:$0xff] }
 0x302   :  { %v1215_v56 = vrot.slane %v1214_v32, 1  ;;  %v2986_v61 = vadd.f32 %v2978_v44, %v5789_v13  ;;  %v3032_v17 = vmul.f32 %v8165_v14, %v5834_v46  ;;  %v5926_v55 = vadd.f32 %v8166_v2, %v1993_v50 }
 0x303   :  { %v1757_v1 = vrot.slane %v1756_v54, 2  ;;  %v2995_v59 = vmax.f32 %v2941_v62, %v2987_v24  ;;  %v3033_v36 = vmul.f32 %v8165_v14, %v5781_v47  ;;  %v5932_v6 = vmul.f32 %v8167_v57, %v5650_v49  ;;  %v8169_v24 = vld [vmem:[#allocation75_spill] sm:$0xff] }
 0x304   :  { %v2994_v58 = vmax.f32 %v2940_v30, %v2986_v61  ;;  %v1804_v26 = vadd.f32 %v1796_v21, %v5787_v18  ;;  %v1833_v13 = vmul.f32 %v5568_v3, %v5783_v5  ;;  %v1843_v44 = vmul.f32 %v8164_v60, %v5781_v47  ;;  %v8172_v21 = vld [vmem:[#allocation83_spill] sm:$0xff]  ;;  %v8186_v60 = vld [vmem:[#allocation93_spill] sm:$0xff] }
 0x305   :  { %8168 = vst [vmem:[#allocation110_spill] sm:$0xff] %v5932_v6  ;;  %v1758_v50 = vadd.f32 %v1757_v1, %v1756_v54  ;;  %v3041_v2 = vadd.f32 %v3033_v36, %v3023_v4  ;;  %v1805_v51 = vadd.f32 %v1797_v63, %v1787_v15  ;;  %v1850_v62 = vadd.f32 %v1842_v0, %v5795_v8  ;;  %v8173_v15 = vld [vmem:[#allocation63_spill] sm:$0xff]  ;;  %v8175_v0 = vld [vmem:[#allocation58_spill] sm:$0xff]  ;;  %v8179_v36 = vld [vmem:[#allocation84_spill] sm:$0xff] }
 0x306   :  { %v1177_v14 = vmul.f32 %v8169_v24, %v5827_v42  ;;  %v5942_v29 = vadd.f32 %v1215_v56, %v1214_v32  ;;  %v3040_v30 = vadd.f32 %v3032_v17, %v5791_v9  ;;  %v5947_v18 = vmul.f32 %v8167_v57, %v5565_v43  ;;  %v8174_v56 = vld [vmem:[#allocation8_spill] sm:$0xff]  ;;  %v8177_v1 = vld [vmem:[#allocation91_spill] sm:$0xff]  ;;  %v8187_v6 = vld [vmem:[#allocation66_spill] sm:$0xff] }
 0x307   :  { %v1721_v61 = vmul.f32 %v8172_v21, %v1523_v16  ;;  %v3049_v49 = vmax.f32 %v2995_v59, %v3041_v2  ;;  %v5951_v54 = vadd.f32 %v8173_v15, %v1804_v26  ;;  %v1851_v8 = vadd.f32 %v1843_v44, %v1833_v13  ;;  %v8176_v16 = vld [vmem:[#allocation51_spill] sm:$0xff]  ;;  %v973_v26 = vpop.permute.xlu1 %972  ;;  %v8180_v44 = vld [vmem:[#allocation86_spill] sm:$0xff]  ;;  %v8183_v21 = vld [vmem:[#allocation73_spill] sm:$0xff] }
 0x308   :  { %8170 = vst [vmem:[#allocation31_spill] sm:$0xff] %v5942_v29  ;;  %v3048_v4 = vmax.f32 %v2994_v58, %v3040_v30  ;;  %v1887_v42 = vmul.f32 %v5580_v53, %v5783_v5  ;;  %v1759_v32 = vrot.slane %v1758_v50, 1  ;;  %v5956_v9 = vadd.f32 %v8174_v56, %v1805_v51  ;;  %v1530_v58 = vpop.permute.xlu2 %1529  ;;  %v8181_v51 = vld [vmem:[#allocation87_spill] sm:$0xff]  ;;  %v8182_v30 = vld [vmem:[#allocation88_spill] sm:$0xff]  ;;  %v8184_v56 = vld [vmem:[#allocation89_spill] sm:$0xff] }
 0x309   :  { %8171 = vst [vmem:[#allocation59_spill] sm:$0xff] %v5947_v18  ;;  %v5959_v63 = vadd.f32 %v8175_v0, %v1850_v62  ;;  %v1896_v17 = vmul.f32 %v8176_v16, %v5834_v46  ;;  %v5964_v59 = vmul.f32 %v8177_v1, %v986_v25  ;;  %v2636_v13 = vmul.f32 %v8179_v36, %v5942_v29  ;;  %v8185_v25 = vld [vmem:[#allocation92_spill] sm:$0xff] }
 0x30a   :  { %v2682_v2 = vmul.f32 %v8180_v44, %v5942_v29  ;;  %v2736_v24 = vmul.f32 %v8181_v51, %v5942_v29  ;;  %v1722_v62 = vmul.f32 %v8182_v30, %v1530_v58  ;;  %v1176_v15 = vmul.f32 %v8183_v21, %v973_v26  ;;  %v8190_v26 = vld [vmem:[#allocation103_spill] sm:$0xff]  ;;  %v8191_v51 = vld [vmem:[#allocation98_spill] sm:$0xff]  ;;  %v8192_v36 = vld [vmem:[#allocation100_spill] sm:$0xff] }
 0x30b   :  { %8178 = vst [vmem:[#allocation18_spill] sm:$0xff] %v5964_v59  ;;  %v2790_v0 = vmul.f32 %v8184_v56, %v5942_v29  ;;  %v2844_v1 = vmul.f32 %v8185_v25, %v5942_v29  ;;  %v2898_v43 = vmul.f32 %v8186_v60, %v5942_v29  ;;  %v3102_v18 = vsel %vm3064_vm5, %v3048_v4, %v8187_v6  ;;  %v8188_v59 = vld [vmem:[#allocation32_spill] sm:$0xff] }
 0x30c   :  { %v5983_v44 = vadd.f32 %v8188_v59, %v1851_v8  ;;  %v1897_v58 = vmul.f32 %v8176_v16, %v5781_v47  ;;  %v5987_v30 = vadd.f32 %v1759_v32, %v1758_v50  ;;  %v1768_v21 = vadd.f32 %v8190_v26, %v1722_v62  ;;  %v8195_v4 = vld [vmem:[#allocation104_spill] sm:$0xff] }
 0x30d   :  { %v1217_v56 = vadd.f32 %v1177_v14, %v1176_v15  ;;  %v2952_v25 = vmul.f32 %v8191_v51, %v5942_v29  ;;  %v3006_v60 = vmul.f32 %v8192_v36, %v5942_v29  ;;  %v5996_v6 = vmul.f32 %v8193_v52, %v5942_v29  ;;  %v8203_v16 = vld [vmem:[#allocation124_spill] sm:$0xff] }
 0x30e   :  { %8189 = vst [vmem:[#allocation113_spill] sm:$0xff] %v5987_v30  ;;  %v6000_v8 = vmul.f32 %v8195_v4, %v5942_v29  ;;  %v1904_v50 = vadd.f32 %v1896_v17, %v5822_v38  ;;  %v1769_v32 = vrot.slane %v1768_v21, 4  ;;  %v6004_v14 = vsel %vm3066_vm6, %v3049_v49, %v3102_v18 }
 0x30f   :  { %8194 = vst [vmem:[#allocation60_spill] sm:$0xff] %v5996_v6  ;;  %v1218_v59 = vrot.slane %v1217_v56, 4  ;;  %v1876_v62 = vmax.f32 %v5951_v54, %v5959_v63  ;;  %v1877_v15 = vmax.f32 %v5956_v9, %v5983_v44  ;;  %v1905_v26 = vadd.f32 %v1897_v58, %v1887_v42  ;;  %v1517_v54 = vpop.permute.xlu1 %1516  ;;  %v8199_v42 = vld [vmem:[#allocation122_spill] sm:$0xff]  ;;  %v8200_v44 = vld [vmem:[#allocation125_spill] sm:$0xff] }
 0x310   :  { %8196 = vst [vmem:[#allocation17_spill] sm:$0xff] %v6000_v8  ;;  %v6012_v6 = vmul.f32 %v5363_v19, %v5942_v29  ;;  %v1941_v8 = vmul.f32 %v5648_v10, %v5783_v5  ;;  %v1770_v38 = vadd.f32 %v1769_v32, %v1768_v21  ;;  %v2646_v49 = vmul.f32 %v5444_v39, %v5987_v30  ;;  %v8202_v32 = vld [vmem:[#allocation70_spill] sm:$0xff] }
 0x311   :  { %8197 = vst [vmem:[#allocation29_spill] sm:$0xff] %v6004_v14  ;;  %v1219_v17 = vadd.f32 %v1218_v59, %v1217_v56  ;;  %v2692_v18 = vmul.f32 %v5447_v34, %v5987_v30  ;;  %v2746_v9 = vmul.f32 %v5456_v37, %v5987_v30  ;;  %v2800_v63 = vmul.f32 %v8199_v42, %v5987_v30  ;;  %v8201_v14 = vld [vmem:[#allocation56_spill] sm:$0xff] }
 0x312   :  { %8198 = vst [vmem:[#allocation26_spill] sm:$0xff] %v6012_v6  ;;  %v1922_v58 = vadd.f32 %v8200_v44, %v1904_v50  ;;  %v1950_v6 = vmul.f32 %v8201_v14, %v5834_v46  ;;  %v1771_v21 = vrot.slane %v1770_v38, 2  ;;  %v1720_v59 = vmul.f32 %v8202_v32, %v1517_v54  ;;  %v8204_v50 = vld [vmem:[#allocation65_spill] sm:$0xff] }
 0x313   :  { %v1220_v56 = vrot.slane %v1219_v17, 2  ;;  %v2854_v19 = vmul.f32 %v8203_v16, %v5987_v30  ;;  %v2908_v4 = vmul.f32 %v5484_v22, %v5987_v30  ;;  %v1951_v52 = vmul.f32 %v8201_v14, %v5781_v47 }
 0x314   :  { %v1995_v36 = vmul.f32 %v8156_v41, %v5783_v5  ;;  %v2004_v44 = vmul.f32 %v8204_v50, %v5834_v46  ;;  %v1761_v51 = vadd.f32 %v1721_v61, %v1720_v59  ;;  %v6038_v42 = vadd.f32 %v2646_v49, %v2636_v13 }
 0x315   :  { %v6040_v37 = vadd.f32 %v2692_v18, %v2682_v2  ;;  %v2005_v54 = vmul.f32 %v8204_v50, %v5781_v47  ;;  %v1772_v32 = vadd.f32 %v1771_v21, %v1770_v38  ;;  %v1221_v22 = vadd.f32 %v1220_v56, %v1219_v17 }
 0x316   :  { %v6046_v16 = vadd.f32 %v2746_v9, %v2736_v24  ;;  %v2962_v14 = vmul.f32 %v5487_v20, %v5987_v30  ;;  %v1762_v5 = vrot.slane %v1761_v51, 4  ;;  %v6050_v34 = vadd.f32 %v2800_v63, %v2790_v0  ;;  %v8207_v0 = vld [vmem:[#allocation64_spill] sm:$0xff] }
 0x317   :  { %v6052_v61 = vadd.f32 %v2854_v19, %v2844_v1  ;;  %v3016_v13 = vmul.f32 %v5494_v27, %v5987_v30  ;;  %v6056_v2 = vadd.f32 %v2908_v4, %v2898_v43  ;;  %v6060_v49 = vmul.f32 %v5497_v31, %v5987_v30 }
 0x318   :  { %v6064_v24 = vmul.f32 %v5568_v3, %v5987_v30  ;;  %v1958_v38 = vadd.f32 %v1950_v6, %v5838_v33  ;;  %v1763_v17 = vadd.f32 %v1762_v5, %v1761_v51  ;;  %v6069_v19 = vmul.f32 %v5580_v53, %v5987_v30 }
 0x319   :  { %v1923_v1 = vadd.f32 %v8207_v0, %v1905_v26  ;;  %v1959_v18 = vadd.f32 %v1951_v52, %v1941_v8  ;;  %v1773_v43 = vrot.slane %v1772_v32, 1  ;;  %v1222_v4 = vrot.slane %v1221_v22, 1  ;;  %v8211_v8 = vld [vmem:[#allocation52_spill] sm:$0xff]  ;;  %v8222_v0 = vld [vmem:[#allocation130_spill] sm:$0xff] }
 0x31a   :  { %8205 = vst [vmem:[#allocation116_spill] sm:$0xff] %v6064_v24  ;;  %v6072_v9 = vadd.f32 %v2962_v14, %v2952_v25  ;;  %v6074_v63 = vmax.f32 %v1876_v62, %v1922_v58  ;;  %v1764_v21 = vrot.slane %v1763_v17, 2  ;;  %v6076_v56 = vadd.f32 %v3016_v13, %v3006_v60 }
 0x31b   :  { %8206 = vst [vmem:[#allocation27_spill] sm:$0xff] %v6069_v19  ;;  %v6078_v59 = vmax.f32 %v1877_v15, %v1923_v1  ;;  %v6082_v5 = vmul.f32 %v5648_v10, %v5987_v30  ;;  %v6086_v33 = vmul.f32 %v5403_v40, %v5942_v29  ;;  %v6089_v52 = vadd.f32 %v5866_v23, %v1958_v38  ;;  %v419_v23 = vpop.permute.xlu2 %418  ;;  %v8221_v38 = vld [vmem:[#allocation120_spill] sm:$0xff] }
 0x31c   :  { %v6092_v51 = vadd.f32 %v2004_v44, %v5901_v12  ;;  %v6094_v25 = vadd.f32 %v2005_v54, %v1995_v36  ;;  %v1765_v60 = vadd.f32 %v1764_v21, %v1763_v17  ;;  %v6097_v6 = vadd.f32 %v5870_v28, %v1959_v18  ;;  %v8214_v36 = vld [vmem:[#allocation119_spill] sm:$0xff]  ;;  %v8223_v18 = vld [vmem:[#allocation34_spill] sm:$0xff]  ;;  %v8228_v21 = vld [vmem:[#allocation25_spill] sm:$0xff] }
 0x31d   :  { %8208 = vst [vmem:[#allocation57_spill] sm:$0xff] %v6082_v5  ;;  %v2028_v14 = vadd.f32 %v8211_v8, %v5911_v35  ;;  %v6102_v62 = vstv %s6044_s25  ;;  %v6104_v15 = vadd.f32 %v1773_v43, %v1772_v32  ;;  %v6106_v26 = vadd.f32 %v1222_v4, %v1221_v22  ;;  %v8225_v4 = vld [vmem:[#allocation62_spill] sm:$0xff]  ;;  %v8236_v28 = vld [vmem:[#allocation33_spill] sm:$0xff]  ;;  %s6569_s25 = sld [smem:[#allocation2 + $0x2d]] }
 0x31e   :  { %8209 = vst [vmem:[#allocation53_spill] sm:$0xff] %v6086_v33  ;;  %v2029_v58 = vadd.f32 %v8214_v36, %v5926_v55  ;;  %v6116_v44 = vmul.f32 %v8156_v41, %v5987_v30  ;;  %v6120_v35 = vmul.f32 %v8167_v57, %v5942_v29  ;;  %v8217_v22 = vmax.f32 %v5825_v45, %v5877_v48  ;;  %v8227_v48 = vld [vmem:[#allocation112_spill] sm:$0xff]  ;;  %v8248_v33 = vld [vmem:[#allocation93_spill] sm:$0xff] }
 0x31f   :  { %8210 = vst [vmem:[#allocation16_spill] sm:$0xff] %v6089_v52  ;;  %v1766_v32 = vrot.slane %v1765_v60, 1  ;;  %v8219_v55 = vmax.f32 %v5844_v7, %v5880_v11  ;;  %v2046_v17 = vmul.f32 %v6102_v62, %v8221_v38  ;;  %v2047_v1 = vmul.f32 %v6102_v62, %v8222_v0  ;;  %v8229_v7 = vld [vmem:[#allocation96_spill] sm:$0xff]  ;;  %v8238_v0 = vld [vmem:[#allocation121_spill] sm:$0xff] }
 0x320   :  { %8212 = vst [vmem:[#allocation61_spill] sm:$0xff] %v6104_v15  ;;  %v6125_v54 = vmax.f32 %v8217_v22, %v2028_v14  ;;  %v6137_v43 = vmul.f32 %v8223_v18, %v419_v23  ;;  %v6141_v45 = vmul.f32 %v6102_v62, %v8225_v4  ;;  %v6145_v8 = vmul.f32 %v8228_v21, %v8227_v48  ;;  %v406_v14 = vpop.permute.xlu1 %405  ;;  %v8231_v36 = vld [vmem:[#allocation84_spill] sm:$0xff]  ;;  %v8233_v22 = vld [vmem:[#allocation86_spill] sm:$0xff] }
 0x321   :  { %8213 = vst [vmem:[#allocation19_spill] sm:$0xff] %v6106_v26  ;;  %v6130_v13 = vmax.f32 %v8219_v55, %v2029_v58  ;;  %v6149_v11 = vmul.f32 %v8228_v21, %v8229_v7  ;;  %v2637_v58 = vmul.f32 %v8231_v36, %v6106_v26  ;;  %v6155_v23 = vmul.f32 %v5444_v39, %v6104_v15  ;;  %v8234_v18 = vld [vmem:[#allocation118_spill] sm:$0xff]  ;;  %v8237_v7 = vld [vmem:[#allocation87_spill] sm:$0xff] }
 0x322   :  { %8215 = vst [vmem:[#allocation111_spill] sm:$0xff] %v6116_v44  ;;  %v2683_v55 = vmul.f32 %v8233_v22, %v6106_v26  ;;  %v6161_v12 = vmul.f32 %v8234_v18, %v6104_v15  ;;  %v631_v48 = vmul.f32 %v8236_v28, %v406_v14  ;;  %v2737_v4 = vmul.f32 %v8237_v7, %v6106_v26  ;;  %v8245_v28 = vld [vmem:[#allocation124_spill] sm:$0xff]  ;;  %v8267_v7 = vld [vmem:[#allocation79_spill] sm:$0xff] }
 0x323   :  { %8216 = vst [vmem:[#allocation75_spill] sm:$0xff] %v6120_v35  ;;  %v6168_v38 = vmul.f32 %v8238_v0, %v6104_v15  ;;  %v6172_v35 = vadd.f32 %v1766_v32, %v1765_v60  ;;  %v6182_v14 = vmul.f32 %v8245_v28, %v6104_v15  ;;  %v2899_v5 = vmul.f32 %v8248_v33, %v6106_v26  ;;  %v8251_v32 = vld [vmem:[#allocation98_spill] sm:$0xff] }
 0x324   :  { %8218 = vst [vmem:[#allocation83_spill] sm:$0xff] %v6125_v54  ;;  %v8242_v54 = vld [vmem:[#allocation122_spill] sm:$0xff] }
 0x325   :  { %8220 = vst [vmem:[#allocation63_spill] sm:$0xff] %v6130_v13  ;;  %v8240_v13 = vld [vmem:[#allocation89_spill] sm:$0xff]  ;;  %v6176_v30 = vmul.f32 %v8242_v54, %v6104_v15 }
 0x326   :  { %8224 = vst [vmem:[#allocation8_spill] sm:$0xff] %v6137_v43  ;;  %v2791_v29 = vmul.f32 %v8240_v13, %v6106_v26  ;;  %v2747_v43 = vmul.f32 %v8238_v0, %v6172_v35  ;;  %v2963_v0 = vmul.f32 %v5487_v20, %v6172_v35 }
 0x327   :  { %8226 = vst [vmem:[#allocation58_spill] sm:$0xff] %v6141_v45  ;;  %v8247_v45 = vld [vmem:[#allocation14_spill] sm:$0xff] }
 0x328   :  { %8230 = vst [vmem:[#allocation91_spill] sm:$0xff] %v6149_v11  ;;  %v8244_v11 = vld [vmem:[#allocation92_spill] sm:$0xff]  ;;  %v666_v50 = vadd.f32 %v631_v48, %v8247_v45  ;;  %v6201_v45 = vmul.f32 %v5494_v27, %v6104_v15  ;;  %v6205_v48 = vmul.f32 %v5497_v31, %v6104_v15 }
 0x329   :  { %8232 = vst [vmem:[#allocation88_spill] sm:$0xff] %v6155_v23  ;;  %v2845_v44 = vmul.f32 %v8244_v11, %v6106_v26  ;;  %v8253_v23 = vld [vmem:[#allocation100_spill] sm:$0xff]  ;;  %v1005_v11 = vpop.permute.xlu2 %1004  ;;  %v992_v24 = vpop.permute.xlu1 %991 }
 0x32a   :  { %8235 = vst [vmem:[#allocation73_spill] sm:$0xff] %v6161_v12  ;;  %v2953_v12 = vmul.f32 %v8251_v32, %v6106_v26  ;;  %v3007_v19 = vmul.f32 %v8253_v23, %v6106_v26  ;;  %v6213_v32 = vmul.f32 %v5568_v3, %v6104_v15 }
 0x32b   :  { %8239 = vst [vmem:[#allocation66_spill] sm:$0xff] %v6168_v38  ;;  %v8249_v38 = vld [vmem:[#allocation126_spill] sm:$0xff] }
 0x32c   :  { %8241 = vst [vmem:[#allocation32_spill] sm:$0xff] %v6172_v35  ;;  %v6189_v60 = vmul.f32 %v8249_v38, %v6104_v15 }
 0x32d   :  { %8243 = vst [vmem:[#allocation103_spill] sm:$0xff] %v6176_v30  ;;  %v6195_v30 = vmul.f32 %v5487_v20, %v6104_v15  ;;  %v6257_v20 = vadd.f32 %v2747_v43, %v2737_v4  ;;  %v6276_v43 = vmul.f32 %v5568_v3, %v6172_v35 }
 0x32e   :  { %8246 = vst [vmem:[#allocation125_spill] sm:$0xff] %v6182_v14  ;;  %v667_v14 = vrot.slane %v666_v50, 4 }
 0x32f   :  { %8250 = vst [vmem:[#allocation70_spill] sm:$0xff] %v6189_v60  ;;  %v8256_v60 = vld [vmem:[#allocation101_spill] sm:$0xff] }
 0x330   :  { %8252 = vst [vmem:[#allocation64_spill] sm:$0xff] %v6195_v30  ;;  %v6209_v33 = vmul.f32 %v8256_v60, %v6106_v26  ;;  %v8259_v30 = vld [vmem:[#allocation104_spill] sm:$0xff]  ;;  %v668_v60 = vadd.f32 %v667_v14, %v666_v50  ;;  %v6243_v50 = vmul.f32 %v5648_v10, %v6104_v15  ;;  %v8265_v14 = vld [vmem:[#allocation21_spill] sm:$0xff] }
 0x331   :  { %8254 = vst [vmem:[#allocation52_spill] sm:$0xff] %v6201_v45  ;;  %v6217_v23 = vmul.f32 %v8259_v30, %v6106_v26  ;;  %v2647_v45 = vmul.f32 %v5444_v39, %v6172_v35  ;;  %v8262_v30 = vld [vmem:[#allocation107_spill] sm:$0xff] }
 0x332   :  { %8255 = vst [vmem:[#allocation119_spill] sm:$0xff] %v6205_v48  ;;  %v2693_v48 = vmul.f32 %v8234_v18, %v6172_v35  ;;  %v6235_v39 = vmul.f32 %v8262_v30, %v6106_v26  ;;  %v2909_v18 = vmul.f32 %v8249_v38, %v6172_v35  ;;  %v1179_v30 = vmul.f32 %v8267_v7, %v992_v24 }
 0x333   :  { %8257 = vst [vmem:[#allocation34_spill] sm:$0xff] %v6209_v33  ;;  %v6227_v33 = vmul.f32 %v5580_v53, %v6104_v15  ;;  %v6253_v36 = vadd.f32 %v2647_v45, %v2637_v58  ;;  %v8277_v58 = vld [vmem:[#allocation9_spill] sm:$0xff] }
 0x334   :  { %8258 = vst [vmem:[#allocation33_spill] sm:$0xff] %v6213_v32  ;;  %v2801_v32 = vmul.f32 %v8242_v54, %v6172_v35  ;;  %v8266_v54 = vld [vmem:[#allocation97_spill] sm:$0xff]  ;;  %v6255_v38 = vadd.f32 %v2693_v48, %v2683_v55  ;;  %v6266_v24 = vadd.f32 %v2909_v18, %v2899_v5 }
 0x335   :  { %8260 = vst [vmem:[#allocation14_spill] sm:$0xff] %v6217_v23  ;;  %v2855_v23 = vmul.f32 %v8245_v28, %v6172_v35  ;;  %v6247_v13 = vmul.f32 %v8266_v54, %v1005_v11  ;;  %v669_v28 = vrot.slane %v668_v60, 2 }
 0x336   :  { %8261 = vst [vmem:[#allocation131_spill] sm:$0xff] %v6227_v33  ;;  %v2064_v33 = vadd.f32 %v8265_v14, %v2046_v17  ;;  %v8269_v17 = vld [vmem:[#allocation18_spill] sm:$0xff]  ;;  %v6262_v54 = vadd.f32 %v2801_v32, %v2791_v29  ;;  %v6280_v29 = vmul.f32 %v5580_v53, %v6172_v35  ;;  %v8297_v53 = vld [vmem:[#allocation44_spill] sm:$0xff] }
 0x337   :  { %8263 = vst [vmem:[#allocation132_spill] sm:$0xff] %v6235_v39  ;;  %v8268_v39 = vld [vmem:[#allocation22_spill] sm:$0xff]  ;;  %v670_v52 = vadd.f32 %v669_v28, %v668_v60  ;;  %v1224_v14 = vadd.f32 %v1179_v30, %v8269_v17  ;;  %v6264_v11 = vadd.f32 %v2855_v23, %v2845_v44  ;;  %v6284_v30 = vmul.f32 %v5403_v40, %v6106_v26  ;;  %v8276_v44 = vld [vmem:[#allocation59_spill] sm:$0xff]  ;;  %v426_v60 = vpop.permute.xlu2 %425 }
 0x338   :  { %8264 = vst [vmem:[#allocation133_spill] sm:$0xff] %v6243_v50  ;;  %v6251_v22 = vadd.f32 %v8268_v39, %v2047_v1  ;;  %v3017_v50 = vmul.f32 %v5494_v27, %v6172_v35  ;;  %v6268_v39 = vadd.f32 %v2963_v0, %v2953_v12  ;;  %v6272_v1 = vmul.f32 %v5497_v31, %v6172_v35  ;;  %v8281_v32 = vld [vmem:[#allocation110_spill] sm:$0xff]  ;;  %v8285_v17 = vld [vmem:[#allocation39_spill] sm:$0xff] }
 0x339   :  { %8271 = vst [vmem:[#allocation97_spill] sm:$0xff] %v6276_v43  ;;  %v671_v4 = vrot.slane %v670_v52, 1  ;;  %v1225_v7 = vrot.slane %v1224_v14, 4  ;;  %v6290_v12 = vmul.f32 %v8156_v41, %v6104_v15  ;;  %v2031_v0 = vadd.f32 %v8276_v44, %v6094_v25  ;;  %v8301_v15 = vld [vmem:[#allocation48_spill] sm:$0xff] }
 0x33a   :  { %8270 = vst [vmem:[#allocation21_spill] sm:$0xff] %v6272_v1  ;;  %v6286_v5 = vadd.f32 %v3017_v50, %v3007_v19  ;;  %v2049_v23 = vmul.f32 %v6102_v62, %v8277_v58  ;;  %v6300_v28 = vmul.f32 %v5648_v10, %v6172_v35  ;;  %v6304_v19 = vmul.f32 %v8167_v57, %v6106_v26  ;;  %v8288_v58 = vld [vmem:[#allocation36_spill] sm:$0xff] }
 0x33b   :  { %8272 = vst [vmem:[#allocation79_spill] sm:$0xff] %v6280_v29  ;;  %v6296_v55 = vadd.f32 %v671_v4, %v670_v52  ;;  %v1226_v18 = vadd.f32 %v1225_v7, %v1224_v14  ;;  %v2030_v45 = vadd.f32 %v8281_v32, %v6092_v51  ;;  %v8282_v25 = vmax.f32 %v6078_v59, %v6097_v6  ;;  %v8284_v52 = vld [vmem:[#allocation20_spill] sm:$0xff]  ;;  %v8287_v7 = vld [vmem:[#allocation35_spill] sm:$0xff]  ;;  %v8290_v59 = vld [vmem:[#allocation37_spill] sm:$0xff] }
 0x33c   :  { %8273 = vst [vmem:[#allocation22_spill] sm:$0xff] %v6284_v30  ;;  %v2059_v50 = vmul.f32 %v8284_v52, %v5781_v47  ;;  %v6317_v14 = vmul.f32 %v8228_v21, %v8285_v17  ;;  %v6324_v51 = vadd.f32 %v6145_v8, %v2064_v33  ;;  %v6334_v47 = vmul.f32 %v8156_v41, %v6172_v35  ;;  %v8294_v33 = vld [vmem:[#allocation43_spill] sm:$0xff]  ;;  %v8320_v29 = vld [vmem:[#allocation73_spill] sm:$0xff] }
 0x33d   :  { %8274 = vst [vmem:[#allocation18_spill] sm:$0xff] %v6286_v5  ;;  %v6311_v48 = vmax.f32 %v8282_v25, %v2031_v0  ;;  %v1227_v4 = vrot.slane %v1226_v18, 2  ;;  %v2664_v44 = vmul.f32 %v8287_v7, %v6296_v55  ;;  %v2710_v26 = vmul.f32 %v8288_v58, %v6296_v55  ;;  %v8291_v0 = vld [vmem:[#allocation38_spill] sm:$0xff]  ;;  %v8292_v25 = vld [vmem:[#allocation41_spill] sm:$0xff] }
 0x33e   :  { %8275 = vst [vmem:[#allocation134_spill] sm:$0xff] %v6290_v12  ;;  %v2764_v6 = vmul.f32 %v8290_v59, %v6296_v55  ;;  %v2818_v32 = vmul.f32 %v8291_v0, %v6296_v55  ;;  %v2872_v17 = vmul.f32 %v8292_v25, %v6296_v55  ;;  %v2926_v8 = vmul.f32 %v8294_v33, %v6296_v55  ;;  %v8295_v12 = vld [vmem:[#allocation30_spill] sm:$0xff] }
 0x33f   :  { %8278 = vst [vmem:[#allocation59_spill] sm:$0xff] %v6296_v55  ;;  %v6341_v10 = vmul.f32 %v8295_v12, %v426_v60  ;;  %v2980_v3 = vmul.f32 %v8297_v53, %v6296_v55  ;;  %v6347_v31 = vmul.f32 %v8284_v52, %v5834_v46  ;;  %v6349_v41 = vadd.f32 %v2059_v50, %v2049_v23  ;;  %v8300_v60 = vld [vmem:[#allocation46_spill] sm:$0xff] }
 0x340   :  { %8279 = vst [vmem:[#allocation135_spill] sm:$0xff] %v6300_v28  ;;  %v2880_v12 = vadd.f32 %v2872_v17, %v6052_v61  ;;  %v1798_v27 = vmul.f32 %v8300_v60, %v6296_v55  ;;  %v1844_v46 = vmul.f32 %v8301_v15, %v6296_v55  ;;  %v8318_v28 = vld [vmem:[#allocation88_spill] sm:$0xff] }
 0x341   :  { %8280 = vst [vmem:[#allocation136_spill] sm:$0xff] %v6304_v19  ;;  %v2718_v19 = vadd.f32 %v2710_v26, %v6040_v37  ;;  %v8299_v37 = vld [vmem:[#allocation45_spill] sm:$0xff]  ;;  %v8330_v15 = vld [vmem:[#allocation100_spill] sm:$0xff] }
 0x342   :  { %8283 = vst [vmem:[#allocation110_spill] sm:$0xff] %v6311_v48  ;;  %v1228_v48 = vadd.f32 %v1227_v4, %v1226_v18  ;;  %v3034_v26 = vmul.f32 %v8299_v37, %v6296_v55  ;;  %v1806_v17 = vadd.f32 %v1798_v27, %v6060_v49  ;;  %v8312_v27 = vld [vmem:[#allocation89_spill] sm:$0xff] }
 0x343   :  { %8286 = vst [vmem:[#allocation137_spill] sm:$0xff] %v6317_v14  ;;  %v2672_v14 = vadd.f32 %v2664_v44, %v6038_v42  ;;  %v2772_v42 = vadd.f32 %v2764_v6, %v6046_v16  ;;  %v2826_v44 = vadd.f32 %v2818_v32, %v6050_v34  ;;  %v8303_v16 = vld [vmem:[#allocation51_spill] sm:$0xff]  ;;  %v413_v6 = vpop.permute.xlu1 %412  ;;  %v2988_v34 = vadd.f32 %v2980_v3, %v6072_v9  ;;  %v8304_v32 = vld [vmem:[#allocation16_spill] sm:$0xff] }
 0x344   :  { %8289 = vst [vmem:[#allocation35_spill] sm:$0xff] %v6324_v51  ;;  %v1229_v18 = vrot.slane %v1228_v48, 1  ;;  %v1898_v50 = vmul.f32 %v8303_v16, %v6296_v55  ;;  %v6367_v61 = vadd.f32 %v3034_v26, %v6076_v56  ;;  %v8311_v9 = vld [vmem:[#allocation87_spill] sm:$0xff] }
 0x345   :  { %8293 = vst [vmem:[#allocation36_spill] sm:$0xff] %v6334_v47  ;;  %v2726_v4 = vmax.f32 %v2672_v14, %v2718_v19  ;;  %v2934_v19 = vadd.f32 %v2926_v8, %v6056_v2  ;;  %v439_v14 = vpop.permute.xlu2 %438  ;;  %v8308_v2 = vld [vmem:[#allocation47_spill] sm:$0xff]  ;;  %v8310_v47 = vld [vmem:[#allocation86_spill] sm:$0xff] }
 0x346   :  { %8296 = vst [vmem:[#allocation37_spill] sm:$0xff] %v6341_v10  ;;  %v6360_v52 = vadd.f32 %v1229_v18, %v1228_v48  ;;  %v8307_v18 = vld [vmem:[#allocation42_spill] sm:$0xff]  ;;  %v632_v8 = vmul.f32 %v8308_v2, %v413_v6  ;;  %v8316_v6 = vld [vmem:[#allocation92_spill] sm:$0xff]  ;;  %v3116_v51 = vld [vmem:[%s7707_s8 + $0x38] sm:$0xff] }
 0x347   :  { %8298 = vst [vmem:[#allocation38_spill] sm:$0xff] %v6349_v41  ;;  %v2780_v23 = vmax.f32 %v2726_v4, %v2772_v42  ;;  %v8305_v41 = vmax.f32 %v6074_v63, %v8304_v32  ;;  %v636_v4 = vmul.f32 %v8307_v18, %v439_v14  ;;  %v8309_v42 = vld [vmem:[#allocation84_spill] sm:$0xff] }
 0x348   :  { %8302 = vst [vmem:[#allocation41_spill] sm:$0xff] %v6360_v52  ;;  %v2638_v35 = vmul.f32 %v8309_v42, %v6360_v52  ;;  %v2684_v3 = vmul.f32 %v8310_v47, %v6360_v52  ;;  %v2738_v56 = vmul.f32 %v8311_v9, %v6360_v52  ;;  %v2792_v49 = vmul.f32 %v8312_v27, %v6360_v52  ;;  %v8313_v63 = vld [vmem:[#allocation116_spill] sm:$0xff] }
 0x349   :  { %v6373_v48 = vmax.f32 %v8305_v41, %v2030_v45  ;;  %v2834_v26 = vmax.f32 %v2780_v23, %v2826_v44  ;;  %v1852_v41 = vadd.f32 %v1844_v46, %v8313_v63  ;;  %v8314_v45 = vld [vmem:[#allocation23_spill] sm:$0xff]  ;;  %v8315_v14 = vld [vmem:[#allocation8_spill] sm:$0xff]  ;;  %v2846_v2 = vmul.f32 %v8316_v6, %v6360_v52 }
 0x34a   :  { %v687_v32 = vadd.f32 %v8314_v45, %v636_v4  ;;  %v673_v18 = vadd.f32 %v8315_v14, %v632_v8  ;;  %v6392_v10 = vadd.f32 %v8318_v28, %v2638_v35  ;;  %v6395_v43 = vadd.f32 %v8320_v29, %v2684_v3  ;;  %v8322_v44 = vld [vmem:[#allocation56_spill] sm:$0xff]  ;;  %v8323_v4 = vld [vmem:[#allocation93_spill] sm:$0xff]  ;;  %v8324_v45 = vld [vmem:[#allocation98_spill] sm:$0xff] }
 0x34b   :  { %8306 = vst [vmem:[#allocation43_spill] sm:$0xff] %v6373_v48  ;;  %v8317_v48 = vld [vmem:[#allocation27_spill] sm:$0xff]  ;;  %v2888_v16 = vmax.f32 %v2834_v26, %v2880_v12  ;;  %v1952_v23 = vmul.f32 %v8322_v44, %v6296_v55  ;;  %v2900_v8 = vmul.f32 %v8323_v4, %v6360_v52  ;;  %v2954_v14 = vmul.f32 %v8324_v45, %v6360_v52  ;;  %v8325_v28 = vld [vmem:[#allocation66_spill] sm:$0xff]  ;;  %v8327_v3 = vld [vmem:[#allocation60_spill] sm:$0xff]  ;;  %v999_v45 = vpop.permute.xlu1 %998 }
 0x34c   :  { %v1906_v30 = vadd.f32 %v1898_v50, %v8317_v48  ;;  %8319 = vst [vmem:[#allocation30_spill] sm:$0xff] %v6392_v10  ;;  %v688_v46 = vrot.slane %v687_v32, 4  ;;  %v674_v63 = vrot.slane %v673_v18, 4  ;;  %v3156_v35 = vld [vmem:[%s7707_s8 + $0x178] sm:$0xff]  ;;  %v6407_v50 = vadd.f32 %v8325_v28, %v2738_v56  ;;  %v8328_v44 = vld [vmem:[#allocation125_spill] sm:$0xff] }
 0x34d   :  { %8321 = vst [vmem:[#allocation44_spill] sm:$0xff] %v6395_v43  ;;  %v8326_v29 = vld [vmem:[#allocation103_spill] sm:$0xff]  ;;  %v2942_v48 = vmax.f32 %v2888_v16, %v2934_v19  ;;  %v1824_v26 = vadd.f32 %v8327_v3, %v1806_v17  ;;  %3201 = vmatpush.msra.mxu2 %v3156_v35  ;;  %v6414_v5 = vadd.f32 %v8328_v44, %v2846_v2  ;;  %v3155_v16 = vld [vmem:[%s7707_s8 + $0x170] sm:$0xff]  ;;  %v8334_v44 = vld [vmem:[#allocation17_spill] sm:$0xff] }
 0x34e   :  { %v6410_v12 = vadd.f32 %v8326_v29, %v2792_v49  ;;  %v689_v43 = vadd.f32 %v688_v46, %v687_v32  ;;  %v675_v10 = vadd.f32 %v674_v63, %v673_v18  ;;  %v3008_v1 = vmul.f32 %v8330_v15, %v6360_v52  ;;  %v3124_v56 = vld [vmem:[%s7707_s8 + $0x78] sm:$0xff]  ;;  %v8331_v17 = vld [vmem:[#allocation70_spill] sm:$0xff]  ;;  %v8332_v18 = vld [vmem:[#allocation101_spill] sm:$0xff] }
 0x34f   :  { %8329 = vst [vmem:[#allocation45_spill] sm:$0xff] %v6414_v5  ;;  %v3140_v19 = vld [vmem:[%s7707_s8 + $0xf8] sm:$0xff]  ;;  %v6428_v49 = vadd.f32 %v8331_v17, %v2900_v8  ;;  %v2996_v32 = vmax.f32 %v2942_v48, %v2988_v34  ;;  %v6432_v2 = vmul.f32 %v8332_v18, %v6360_v52  ;;  %v1870_v46 = vadd.f32 %v8334_v44, %v1852_v41  ;;  %v8336_v3 = vld [vmem:[#allocation64_spill] sm:$0xff]  ;;  %v3123_v34 = vld [vmem:[%s7707_s8 + $0x70] sm:$0xff] }
 0x350   :  { %v690_v63 = vrot.slane %v689_v43, 2  ;;  %v676_v35 = vrot.slane %v675_v10, 2  ;;  %v8335_v28 = vld [vmem:[#allocation115_spill] sm:$0xff]  ;;  %3161 = vmatpush.msra.mxu0 %v3124_v56  ;;  %3181 = vmatpush.msra.mxu1 %v3140_v19  ;;  %v6437_v5 = vadd.f32 %v8336_v3, %v2954_v14  ;;  %v3139_v8 = vld [vmem:[%s7707_s8 + $0xf0] sm:$0xff]  ;;  %v3154_v41 = vld [vmem:[%s7707_s8 + $0x168] sm:$0xff] }
 0x351   :  { %8333 = vst [vmem:[#allocation16_spill] sm:$0xff] %v6432_v2  ;;  %v1180_v29 = vmul.f32 %v8335_v28, %v999_v45  ;;  %3202 = vmatpush.msra.mxu2 %v3155_v16  ;;  %v3050_v45 = vmax.f32 %v2996_v32, %v6367_v61  ;;  %v1878_v48 = vmax.f32 %v1824_v26, %v1870_v46  ;;  %v8337_v56 = vld [vmem:[#allocation26_spill] sm:$0xff]  ;;  %v8338_v14 = vld [vmem:[#allocation57_spill] sm:$0xff] }
 0x352   :  { %v1924_v19 = vadd.f32 %v8337_v56, %v1906_v30  ;;  %v1960_v17 = vadd.f32 %v1952_v23, %v8338_v14  ;;  %v691_v16 = vadd.f32 %v690_v63, %v689_v43  ;;  %v677_v44 = vadd.f32 %v676_v35, %v675_v10  ;;  %3162 = vmatpush.msra.mxu0 %v3123_v34  ;;  %v3122_v3 = vld [vmem:[%s7707_s8 + $0x68] sm:$0xff]  ;;  %v3153_v30 = vld [vmem:[%s7707_s8 + $0x160] sm:$0xff]  ;;  %v8346_v14 = vld [vmem:[#allocation107_spill] sm:$0xff] }
 0x353   :  { %v1231_v28 = vadd.f32 %v6247_v13, %v1180_v29  ;;  %3182 = vmatpush.msra.mxu1 %v3139_v8  ;;  %3203 = vmatpush.msra.mxu2 %v3154_v41  ;;  %v3138_v61 = vld [vmem:[%s7707_s8 + $0xe8] sm:$0xff]  ;;  %v8339_v43 = vld [vmem:[#allocation52_spill] sm:$0xff] }
 0x354   :  { %v6462_v10 = vadd.f32 %v8339_v43, %v3008_v1  ;;  %v8341_v13 = vld [vmem:[#allocation104_spill] sm:$0xff]  ;;  %v6468_v26 = vmax.f32 %v1878_v48, %v1924_v19  ;;  %v8343_v32 = vld [vmem:[#allocation53_spill] sm:$0xff]  ;;  %v692_v63 = vrot.slane %v691_v16, 1  ;;  %v678_v35 = vrot.slane %v677_v44, 1  ;;  %3163 = vmatpush.msra.mxu0 %v3122_v3  ;;  %v3152_v48 = vld [vmem:[%s7707_s8 + $0x158] sm:$0xff] }
 0x355   :  { %v6466_v23 = vmul.f32 %v8341_v13, %v6360_v52  ;;  %v6471_v46 = vadd.f32 %v8343_v32, %v1960_v17  ;;  %v1232_v29 = vrot.slane %v1231_v28, 4  ;;  %3183 = vmatpush.msra.mxu1 %v3138_v61  ;;  %v8344_v34 = vld [vmem:[#allocation65_spill] sm:$0xff]  ;;  %3204 = vmatpush.msra.mxu2 %v3153_v30  ;;  %v3121_v1 = vld [vmem:[%s7707_s8 + $0x60] sm:$0xff]  ;;  %v6490_v17 = vmul.f32 %v8346_v14, %v6360_v52  ;;  %v8349_v30 = vld [vmem:[#allocation123_spill] sm:$0xff] }
 0x356   :  { %8340 = vst [vmem:[#allocation42_spill] sm:$0xff] %v6462_v10  ;;  %v2006_v8 = vmul.f32 %v8344_v34, %v6296_v55  ;;  %v3137_v41 = vld [vmem:[%s7707_s8 + $0xe0] sm:$0xff]  ;;  %v8345_v56 = vld [vmem:[#allocation29_spill] sm:$0xff]  ;;  %v6494_v3 = vmul.f32 %v5403_v40, %v6360_v52  ;;  %3964 = vpow2.f32 %v8349_v30  ;;  %v6499_v43 = vadd.f32 %v678_v35, %v677_v44  ;;  %3164 = vmatpush.msra.mxu0 %v3121_v1  ;;  %v3151_v55 = vld [vmem:[%s7707_s8 + $0x150] sm:$0xff] }
 0x357   :  { %8342 = vst [vmem:[#allocation47_spill] sm:$0xff] %v6466_v23  ;;  %v6486_v19 = vsel %vm3068_vm7, %v3050_v45, %v8345_v56  ;;  %v1233_v32 = vadd.f32 %v1232_v29, %v1231_v28  ;;  %3184 = vmatpush.msra.mxu1 %v3137_v41  ;;  %v3120_v45 = vld [vmem:[%s7707_s8 + $0x58] sm:$0xff]  ;;  %v8350_v61 = vld [vmem:[#allocation58_spill] sm:$0xff]  ;;  %v6514_v44 = vadd.f32 %v692_v63, %v691_v16  ;;  %v8353_v41 = vld [vmem:[#allocation108_spill] sm:$0xff] }
 0x358   :  { %8347 = vst [vmem:[#allocation84_spill] sm:$0xff] %v6490_v17  ;;  %v3136_v56 = vld [vmem:[%s7707_s8 + $0xd8] sm:$0xff]  ;;  %v6512_v30 = vadd.f32 %v6347_v31, %v8350_v61  ;;  %3205 = vmatpush.msra.mxu2 %v3152_v48  ;;  %v3119_v28 = vld [vmem:[%s7707_s8 + $0x50] sm:$0xff]  ;;  %3165 = vmatpush.msra.mxu0 %v3120_v45  ;;  %v3150_v48 = vld [vmem:[%s7707_s8 + $0x148] sm:$0xff]  ;;  %v2665_v61 = vmul.f32 %v8287_v7, %v6499_v43 }
 0x359   :  { %8348 = vst [vmem:[#allocation86_spill] sm:$0xff] %v6494_v3  ;;  %v3135_v35 = vld [vmem:[%s7707_s8 + $0xd0] sm:$0xff]  ;;  %v8352_v29 = vld [vmem:[#allocation111_spill] sm:$0xff]  ;;  %v6527_v3 = vmul.f32 %v8228_v21, %v8353_v41  ;;  %v1234_v63 = vrot.slane %v1233_v32, 2  ;;  %3185 = vmatpush.msra.mxu1 %v3136_v56  ;;  %v3134_v45 = vld [vmem:[%s7707_s8 + $0xc8] sm:$0xff]  ;;  %v2765_v56 = vmul.f32 %v8290_v59, %v6499_v43 }
 0x35a   :  { %8351 = vst [vmem:[#allocation87_spill] sm:$0xff] %v6512_v30  ;;  %v6523_v1 = vadd.f32 %v2006_v8, %v8352_v29  ;;  %v8355_v31 = vld [vmem:[#allocation91_spill] sm:$0xff]  ;;  %v2711_v8 = vmul.f32 %v8288_v58, %v6499_v43  ;;  %v6542_v29 = vmul.f32 %v8167_v57, %v6360_v52  ;;  %3206 = vmatpush.msra.mxu2 %v3151_v55  ;;  %v8358_v41 = vld [vmem:[#allocation113_spill] sm:$0xff]  ;;  %v3149_v17 = vld [vmem:[%s7707_s8 + $0x140] sm:$0xff] }
 0x35b   :  { %8354 = vst [vmem:[#allocation89_spill] sm:$0xff] %v6527_v3  ;;  %v6531_v16 = vadd.f32 %v8355_v31, %v6251_v22  ;;  %v3118_v22 = vld [vmem:[%s7707_s8 + $0x48] sm:$0xff]  ;;  %v2819_v31 = vmul.f32 %v8291_v0, %v6499_v43  ;;  %v8361_v30 = vld [vmem:[#allocation15_spill] sm:$0xff]  ;;  %3166 = vmatpush.msra.mxu0 %v3119_v28  ;;  %3186 = vmatpush.msra.mxu1 %v3135_v35  ;;  %v3117_v3 = vld [vmem:[%s7707_s8 + $0x40] sm:$0xff] }
 0x35c   :  { %8357 = vst [vmem:[#allocation23_spill] sm:$0xff] %v6542_v29  ;;  %v8362_v52 = vsub.f32 0.0, %v8361_v30  ;;  %v1235_v29 = vadd.f32 %v1234_v63, %v1233_v32  ;;  %v2673_v23 = vadd.f32 %v2665_v61, %v6253_v36  ;;  %v2719_v2 = vadd.f32 %v2711_v8, %v6255_v38  ;;  %3207 = vmatpush.msra.mxu2 %v3150_v48  ;;  %v3965_v28 = vpop.eup %3964  ;;  %v3148_v63 = vld [vmem:[%s7707_s8 + $0x138] sm:$0xff] }
 0x35d   :  { %8356 = vst [vmem:[#allocation116_spill] sm:$0xff] %v6531_v16  ;;  %v6558_v16 = vmul.f32 %v6102_v62, %v8358_v41  ;;  %v6579_v32 = vmul.f32 %v8287_v7, %v6514_v44  ;;  %v6583_v36 = vmul.f32 %v8288_v58, %v6514_v44  ;;  %v6587_v38 = vmul.f32 %v8290_v59, %v6514_v44  ;;  %v3115_v41 = vld [vmem:[%s7707_s8 + $0x30] sm:$0xff] }
 0x35e   :  { %v616_v21 = vmul.f32 1.442695, %v8362_v52  ;;  %v3133_v52 = vld [vmem:[%s7707_s8 + $0xc0] sm:$0xff]  ;;  %v2873_v30 = vmul.f32 %v8292_v25, %v6499_v43  ;;  %v1236_v35 = vrot.slane %v1235_v29, 1  ;;  %3167 = vmatpush.msra.mxu0 %v3118_v22  ;;  %3187 = vmatpush.msra.mxu1 %v3134_v45  ;;  %v2727_v48 = vmax.f32 %v2673_v23, %v2719_v2  ;;  %v3132_v22 = vld [vmem:[%s7707_s8 + $0xb8] sm:$0xff] }
 0x35f   :  { %8359 = vst [vmem:[#allocation8_spill] sm:$0xff] %v6558_v16  ;;  %v2773_v61 = vadd.f32 %v2765_v56, %v6257_v20  ;;  %v2927_v8 = vmul.f32 %v8294_v33, %v6499_v43  ;;  %3208 = vmatpush.msra.mxu2 %v3149_v17  ;;  %v6605_v45 = vmul.f32 %v8291_v0, %v6514_v44  ;;  %v3147_v56 = vld [vmem:[%s7707_s8 + $0x130] sm:$0xff] }
 0x360   :  { %v2827_v2 = vadd.f32 %v2819_v31, %v6262_v54  ;;  %v6610_v20 = vmul.f32 %v8292_v25, %v6514_v44  ;;  %v2981_v23 = vmul.f32 %v8297_v53, %v6499_v43  ;;  %3966 = vpow2.f32 %v616_v21  ;;  %3168 = vmatpush.msra.mxu0 %v3117_v3  ;;  %3188 = vmatpush.msra.mxu1 %v3133_v52  ;;  %v1549_v31 = vpop.permute.xlu1 %1548  ;;  %v3131_v21 = vld [vmem:[%s7707_s8 + $0xb0] sm:$0xff] }
 0x361   :  { %v6614_v17 = vadd.f32 %v1236_v35, %v1235_v29  ;;  %v2781_v55 = vmax.f32 %v2727_v48, %v2773_v61  ;;  %v2881_v54 = vadd.f32 %v2873_v30, %v6264_v11  ;;  %3209 = vmatpush.msra.mxu2 %v3148_v63  ;;  %v6628_v3 = vmul.f32 %v8294_v33, %v6514_v44  ;;  %v3146_v35 = vld [vmem:[%s7707_s8 + $0x128] sm:$0xff] }
 0x362   :  { %v2935_v29 = vadd.f32 %v2927_v8, %v6266_v24  ;;  %v6633_v52 = vmul.f32 %v8297_v53, %v6514_v44  ;;  %v2989_v11 = vadd.f32 %v2981_v23, %v6268_v39  ;;  %v1725_v30 = vmul.f32 %v3965_v28, %v1549_v31  ;;  %3169 = vmatpush.msra.mxu0 %v3116_v51  ;;  %v3114_v39 = vld [vmem:[%s7707_s8 + $0x28] sm:$0xff]  ;;  %v3145_v31 = vld [vmem:[%s7707_s8 + $0x120] sm:$0xff] }
 0x363   :  { %8363 = vst [vmem:[#allocation92_spill] sm:$0xff] %v6614_v17  ;;  %3189 = vmatpush.msra.mxu1 %v3132_v22  ;;  %v3035_v63 = vmul.f32 %v8299_v37, %v6499_v43  ;;  %v1799_v48 = vmul.f32 %v8300_v60, %v6499_v43  ;;  %v6644_v24 = vstv %s6544_s14  ;;  %3210 = vmatpush.msra.mxu2 %v3147_v56  ;;  %v3130_v51 = vld [vmem:[%s7707_s8 + $0xa8] sm:$0xff]  ;;  %s7403_s14 = sld [smem:[#allocation2 + $0x2c]] }
 0x364   :  { %8364 = vst [vmem:[#allocation27_spill] sm:$0xff] %v6644_v24  ;;  %v6654_v28 = vmul.f32 %v8309_v42, %v6614_v17  ;;  %v6658_v61 = vmul.f32 %v8310_v47, %v6614_v17  ;;  %v2835_v8 = vmax.f32 %v2781_v55, %v2827_v2  ;;  %v6662_v22 = vmul.f32 %v8299_v37, %v6514_v44  ;;  %v8366_v23 = vld [vmem:[#allocation13_spill] sm:$0xff]  ;;  %v3129_v2 = vld [vmem:[%s7707_s8 + $0xa0] sm:$0xff]  ;;  %v3144_v24 = vld [vmem:[%s7707_s8 + $0x118] sm:$0xff] }
 0x365   :  { %v1775_v56 = vadd.f32 %v1725_v30, %v8366_v23  ;;  %3170 = vmatpush.msra.mxu0 %v3115_v41  ;;  %3190 = vmatpush.msra.mxu1 %v3131_v21  ;;  %v6670_v42 = vmul.f32 %v8311_v9, %v6614_v17  ;;  %v6674_v47 = vmul.f32 %v8312_v27, %v6614_v17  ;;  %v6679_v55 = vstv %s6569_s25  ;;  %v3113_v41 = vld [vmem:[%s7707_s8 + $0x20] sm:$0xff]  ;;  %v8368_v30 = vld [vmem:[#allocation98_spill] sm:$0xff] }
 0x366   :  { %8365 = vst [vmem:[#allocation88_spill] sm:$0xff] %v6662_v22  ;;  %3211 = vmatpush.msra.mxu2 %v3146_v35  ;;  %v6689_v9 = vmul.f32 %v8316_v6, %v6614_v17  ;;  %v2889_v21 = vmax.f32 %v2835_v8, %v2881_v54  ;;  %v6693_v27 = vmul.f32 %v8323_v4, %v6614_v17  ;;  %v3967_v23 = vpop.eup %3966  ;;  %v8370_v54 = vld [vmem:[#allocation21_spill] sm:$0xff]  ;;  %v8371_v4 = vld [vmem:[#allocation48_spill] sm:$0xff]  ;;  %v8372_v22 = vld [vmem:[#allocation18_spill] sm:$0xff] }
 0x367   :  { %8367 = vst [vmem:[#allocation73_spill] sm:$0xff] %v6679_v55  ;;  %v6697_v35 = vmul.f32 %v8368_v30, %v6614_v17  ;;  %v1776_v55 = vrot.slane %v1775_v56, 4  ;;  %3171 = vmatpush.msra.mxu0 %v3114_v39  ;;  %3191 = vmatpush.msra.mxu1 %v3130_v51  ;;  %v6704_v6 = vmul.f32 %v8330_v15, %v6614_v17  ;;  %v3112_v30 = vld [vmem:[%s7707_s8 + $0x18] sm:$0xff] }
 0x368   :  { %v1807_v8 = vadd.f32 %v1799_v48, %v8370_v54  ;;  %v1845_v16 = vmul.f32 %v8371_v4, %v6499_v43  ;;  %3212 = vmatpush.msra.mxu2 %v3145_v31  ;;  %v3128_v39 = vld [vmem:[%s7707_s8 + $0x98] sm:$0xff]  ;;  %v2943_v51 = vmax.f32 %v2889_v21, %v2935_v29  ;;  %v3043_v10 = vadd.f32 %v3035_v63, %v8372_v22  ;;  %v3143_v31 = vld [vmem:[%s7707_s8 + $0x110] sm:$0xff]  ;;  %v8376_v63 = vld [vmem:[#allocation97_spill] sm:$0xff]  ;;  %v432_v21 = vpop.permute.xlu1 %431 }
 0x369   :  { %8369 = vst [vmem:[#allocation93_spill] sm:$0xff] %v6704_v6  ;;  %v6718_v15 = vmul.f32 %v8300_v60, %v6514_v44  ;;  %v8374_v48 = vld [vmem:[#allocation51_spill] sm:$0xff]  ;;  %v1777_v6 = vadd.f32 %v1776_v55, %v1775_v56  ;;  %3172 = vmatpush.msra.mxu0 %v3113_v41  ;;  %3192 = vmatpush.msra.mxu1 %v3129_v2  ;;  %v3111_v56 = vld [vmem:[%s7707_s8 + $0x10] sm:$0xff] }
 0x36a   :  { %v1899_v54 = vmul.f32 %v8374_v48, %v6499_v43  ;;  %v6727_v29 = vmul.f32 %v8332_v18, %v6614_v17  ;;  %v1853_v22 = vadd.f32 %v1845_v16, %v8376_v63  ;;  %3213 = vmatpush.msra.mxu2 %v3144_v24  ;;  %v3127_v55 = vld [vmem:[%s7707_s8 + $0x90] sm:$0xff]  ;;  %v2997_v41 = vmax.f32 %v2943_v51, %v2989_v11  ;;  %v8378_v16 = vld [vmem:[#allocation79_spill] sm:$0xff]  ;;  %v3142_v24 = vld [vmem:[%s7707_s8 + $0x108] sm:$0xff] }
 0x36b   :  { %8373 = vst [vmem:[#allocation66_spill] sm:$0xff] %v6718_v15  ;;  %v8377_v2 = vld [vmem:[#allocation34_spill] sm:$0xff]  ;;  %v6741_v18 = vmul.f32 %v8371_v4, %v6514_v44  ;;  %v635_v60 = vmul.f32 %v3967_v23, %v432_v21  ;;  %3173 = vmatpush.msra.mxu0 %v3112_v30  ;;  %3193 = vmatpush.msra.mxu1 %v3128_v39  ;;  %v3110_v23 = vld [vmem:[%s7707_s8 + $0x8] sm:$0xff]  ;;  %v8382_v21 = vld [vmem:[#allocation56_spill] sm:$0xff] }
 0x36c   :  { %8375 = vst [vmem:[#allocation103_spill] sm:$0xff] %v6727_v29  ;;  %v1825_v15 = vadd.f32 %v8377_v2, %v1807_v8  ;;  %v1907_v63 = vadd.f32 %v1899_v54, %v8378_v16  ;;  %v1778_v29 = vrot.slane %v1777_v6, 2  ;;  %v6749_v11 = vmul.f32 %v8341_v13, %v6614_v17  ;;  %3214 = vmatpush.msra.mxu2 %v3143_v31  ;;  %v3126_v30 = vld [vmem:[%s7707_s8 + $0x88] sm:$0xff]  ;;  %v8381_v51 = vld [vmem:[#allocation14_spill] sm:$0xff] }
 0x36d   :  { %v6753_v8 = vmul.f32 %v8374_v48, %v6514_v44  ;;  %v3051_v39 = vmax.f32 %v2997_v41, %v3043_v10  ;;  %v1871_v54 = vadd.f32 %v8381_v51, %v1853_v22  ;;  %v6764_v13 = vmul.f32 %v8346_v14, %v6614_v17  ;;  %v8383_v31 = vld [vmem:[#allocation37_spill] sm:$0xff]  ;;  %3174 = vmatpush.msra.mxu0 %v3111_v56  ;;  %v3141_v48 = vld [vmem:[%s7707_s8 + $0x100] sm:$0xff]  ;;  %v8388_v51 = vld [vmem:[#allocation75_spill] sm:$0xff] }
 0x36e   :  { %8379 = vst [vmem:[#allocation60_spill] sm:$0xff] %v6749_v11  ;;  %v1953_v2 = vmul.f32 %v8382_v21, %v6499_v43  ;;  %v1779_v16 = vadd.f32 %v1778_v29, %v1777_v6  ;;  %3194 = vmatpush.msra.mxu1 %v3127_v55  ;;  %v8384_v11 = vld [vmem:[#allocation132_spill] sm:$0xff]  ;;  %v6774_v41 = vstv %s6676_s7  ;;  %3215 = vmatpush.msra.mxu2 %v3142_v24 }
 0x36f   :  { %8380 = vst [vmem:[#allocation125_spill] sm:$0xff] %v6753_v8  ;;  %v680_v8 = vadd.f32 %v635_v60, %v8383_v31  ;;  %v1925_v10 = vadd.f32 %v8384_v11, %v1907_v63  ;;  %v6778_v14 = vsel %vm3070_vm8, %v3051_v39, %v6486_v19  ;;  %v1879_v22 = vmax.f32 %v1825_v15, %v1871_v54  ;;  %v8386_v60 = vld [vmem:[#allocation135_spill] sm:$0xff]  ;;  %v3109_v63 = vld [vmem:[%s7707_s8] sm:$0xff] }
 0x370   :  { %8385 = vst [vmem:[#allocation100_spill] sm:$0xff] %v6774_v41  ;;  %v6782_v6 = vmul.f32 %v8382_v21, %v6514_v44  ;;  %v1961_v29 = vadd.f32 %v1953_v2, %v8386_v60  ;;  %v1780_v56 = vrot.slane %v1779_v16, 1  ;;  %3175 = vmatpush.msra.mxu0 %v3110_v23  ;;  %3195 = vmatpush.msra.mxu1 %v3126_v30  ;;  %v3125_v19 = vld [vmem:[%s7707_s8 + $0x80] sm:$0xff]  ;;  %v8387_v23 = vld [vmem:[#allocation22_spill] sm:$0xff]  ;;  %v6815_v31 = vstv %s6730_s5  ;;  %s7010_s8 = sld [smem:[#allocation2 + $0x15]] }
 0x371   :  { %v681_v55 = vrot.slane %v680_v8, 4  ;;  %v6793_v15 = vmul.f32 %v5403_v40, %v6614_v17  ;;  %v2007_v24 = vmul.f32 %v8344_v34, %v6499_v43  ;;  %3216 = vmatpush.msra.mxu2 %v3141_v48  ;;  %v6797_v11 = vmax.f32 %v1879_v22, %v1925_v10  ;;  %8389 = vst [vmem:[#allocation70_spill] sm:$0xff] %v6815_v31  ;;  %v8390_v22 = vld [vmem:[#allocation36_spill] sm:$0xff]  ;;  %v8400_v10 = vld [vmem:[#allocation127_spill] sm:$0xff]  ;;  %s7173_s5 = sld [smem:[#allocation2 + $0x20]] }
 0x372   :  { %v6800_v30 = vadd.f32 %v8387_v23, %v1961_v29  ;;  %v6804_v39 = vmul.f32 %v8344_v34, %v6514_v44  ;;  %v2032_v54 = vadd.f32 %v8388_v51, %v6523_v1  ;;  %v6808_v2 = vadd.f32 %v1780_v56, %v1779_v16  ;;  %3176 = vmatpush.msra.mxu0 %v3109_v63  ;;  %v8395_v63 = vld [vmem:[#allocation118_spill] sm:$0xff]  ;;  %v8396_v23 = vld [vmem:[#allocation121_spill] sm:$0xff] }
 0x373   :  { %v682_v40 = vadd.f32 %v681_v55, %v680_v8  ;;  %3196 = vmatpush.msra.mxu1 %v3125_v19  ;;  %v6812_v48 = vmul.f32 %v8167_v57, %v6614_v17  ;;  %v6820_v60 = vadd.f32 %v2007_v24, %v8390_v22  ;;  %v8391_v1 = vmax.f32 %v6468_v26, %v6471_v46  ;;  %v8393_v8 = vld [vmem:[#allocation32_spill] sm:$0xff]  ;;  %v8394_v57 = vld [vmem:[#allocation117_spill] sm:$0xff]  ;;  %v8397_v51 = vld [vmem:[#allocation122_spill] sm:$0xff] }
 0x374   :  { %v6829_v29 = vmul.f32 %v6102_v62, %v8393_v8  ;;  %v2649_v55 = vmul.f32 %v8394_v57, %v6808_v2  ;;  %v2695_v19 = vmul.f32 %v8395_v63, %v6808_v2  ;;  %v2749_v24 = vmul.f32 %v8396_v23, %v6808_v2  ;;  %v8398_v26 = vld [vmem:[#allocation124_spill] sm:$0xff] }
 0x375   :  { %v6825_v16 = vmax.f32 %v8391_v1, %v2032_v54  ;;  %v683_v56 = vrot.slane %v682_v40, 2  ;;  %v2803_v22 = vmul.f32 %v8397_v51, %v6808_v2  ;;  %v2857_v46 = vmul.f32 %v8398_v26, %v6808_v2  ;;  %v8399_v54 = vld [vmem:[#allocation126_spill] sm:$0xff] }
 0x376   :  { %v2911_v1 = vmul.f32 %v8399_v54, %v6808_v2  ;;  %v2965_v41 = vmul.f32 %v8400_v10, %v6808_v2  ;;  %v2657_v57 = vadd.f32 %v2649_v55, %v6654_v28  ;;  %v2703_v63 = vadd.f32 %v2695_v19, %v6658_v61  ;;  %v8404_v19 = vld [vmem:[#allocation49_spill] sm:$0xff] }
 0x377   :  { %8392 = vst [vmem:[#allocation101_spill] sm:$0xff] %v6825_v16  ;;  %v684_v8 = vadd.f32 %v683_v56, %v682_v40  ;;  %v2757_v16 = vadd.f32 %v2749_v24, %v6670_v42  ;;  %v2811_v23 = vadd.f32 %v2803_v22, %v6674_v47  ;;  %v2865_v51 = vadd.f32 %v2857_v46, %v6689_v9  ;;  %v8401_v40 = vld [vmem:[#allocation61_spill] sm:$0xff] }
 0x378   :  { %v2919_v31 = vadd.f32 %v2911_v1, %v6693_v27  ;;  %v2973_v26 = vadd.f32 %v2965_v41, %v6697_v35  ;;  %v2675_v54 = vadd.f32 %v6579_v32, %v2657_v57  ;;  %v2721_v10 = vadd.f32 %v6583_v36, %v2703_v63  ;;  %v8402_v32 = vld [vmem:[#allocation128_spill] sm:$0xff]  ;;  %v8403_v56 = vld [vmem:[#allocation129_spill] sm:$0xff] }
 0x379   :  { %v685_v17 = vrot.slane %v684_v8, 1  ;;  %v6856_v28 = vmul.f32 %v6102_v62, %v8401_v40  ;;  %v2775_v61 = vadd.f32 %v6587_v38, %v2757_v16  ;;  %v2829_v42 = vadd.f32 %v6605_v45, %v2811_v23  ;;  %v8405_v45 = vld [vmem:[#allocation50_spill] sm:$0xff]  ;;  %v8408_v63 = vld [vmem:[#allocation44_spill] sm:$0xff] }
 0x37a   :  { %v2883_v47 = vadd.f32 %v6610_v20, %v2865_v51  ;;  %v2937_v9 = vadd.f32 %v6628_v3, %v2919_v31  ;;  %v2729_v35 = vmax.f32 %v2675_v54, %v2721_v10  ;;  %v2991_v41 = vadd.f32 %v6633_v52, %v2973_v26  ;;  %v8406_v20 = vld [vmem:[#allocation67_spill] sm:$0xff]  ;;  %v8410_v54 = vld [vmem:[#allocation45_spill] sm:$0xff] }
 0x37b   :  { %v6862_v27 = vadd.f32 %v685_v17, %v684_v8  ;;  %v3019_v36 = vmul.f32 %v8402_v32, %v6808_v2  ;;  %v1791_v55 = vmul.f32 %v8403_v56, %v6808_v2  ;;  %v1837_v38 = vmul.f32 %v8404_v19, %v6808_v2  ;;  %v8412_v56 = vld [vmem:[#allocation66_spill] sm:$0xff] }
 0x37c   :  { %v1891_v16 = vmul.f32 %v8405_v45, %v6808_v2  ;;  %v1945_v3 = vmul.f32 %v8406_v20, %v6808_v2  ;;  %v2783_v8 = vmax.f32 %v2729_v35, %v2775_v61 }
 0x37d   :  { %v2666_v17 = vmul.f32 %v8287_v7, %v6862_v27  ;;  %v2712_v52 = vmul.f32 %v8288_v58, %v6862_v27  ;;  %v2766_v31 = vmul.f32 %v8290_v59, %v6862_v27  ;;  %v2820_v24 = vmul.f32 %v8291_v0, %v6862_v27  ;;  %v8407_v7 = vld [vmem:[#allocation30_spill] sm:$0xff] }
 0x37e   :  { %v2874_v22 = vmul.f32 %v8292_v25, %v6862_v27  ;;  %v2928_v46 = vmul.f32 %v8294_v33, %v6862_v27  ;;  %v2982_v1 = vmul.f32 %v8297_v53, %v6862_v27  ;;  %v2837_v23 = vmax.f32 %v2783_v8, %v2829_v42  ;;  %v8409_v59 = vld [vmem:[#allocation54_spill] sm:$0xff] }
 0x37f   :  { %v2674_v57 = vadd.f32 %v2666_v17, %v8407_v7  ;;  %v2720_v58 = vadd.f32 %v2712_v52, %v8408_v63  ;;  %v1999_v51 = vmul.f32 %v8409_v59, %v6808_v2  ;;  %v2774_v26 = vadd.f32 %v2766_v31, %v6407_v50  ;;  %v8411_v42 = vld [vmem:[#allocation46_spill] sm:$0xff]  ;;  %v8422_v63 = vld [vmem:[#allocation47_spill] sm:$0xff] }
 0x380   :  { %v2828_v0 = vadd.f32 %v2820_v24, %v6410_v12  ;;  %v2882_v25 = vadd.f32 %v2874_v22, %v8410_v54  ;;  %v2936_v10 = vadd.f32 %v2928_v46, %v6428_v49  ;;  %v2891_v61 = vmax.f32 %v2837_v23, %v2883_v47  ;;  %v8413_v49 = vld [vmem:[#allocation93_spill] sm:$0xff]  ;;  %v8414_v47 = vld [vmem:[#allocation42_spill] sm:$0xff]  ;;  %v8418_v46 = vld [vmem:[#allocation60_spill] sm:$0xff] }
 0x381   :  { %v2728_v33 = vmax.f32 %v2674_v57, %v2720_v58  ;;  %v2990_v53 = vadd.f32 %v2982_v1, %v6437_v5  ;;  %v3036_v35 = vmul.f32 %v8299_v37, %v6862_v27  ;;  %v1800_v32 = vmul.f32 %v8411_v42, %v6862_v27  ;;  %v8415_v5 = vld [vmem:[#allocation119_spill] sm:$0xff]  ;;  %v8417_v24 = vld [vmem:[#allocation33_spill] sm:$0xff]  ;;  %v8423_v54 = vld [vmem:[#allocation88_spill] sm:$0xff] }
 0x382   :  { %v1809_v19 = vadd.f32 %v8412_v56, %v1791_v55  ;;  %v1846_v50 = vmul.f32 %v8371_v4, %v6862_v27  ;;  %v1855_v12 = vadd.f32 %v6741_v18, %v1837_v38  ;;  %v2945_v20 = vmax.f32 %v2891_v61, %v2937_v9  ;;  %v8416_v37 = vld [vmem:[#allocation103_spill] sm:$0xff]  ;;  %v8420_v9 = vld [vmem:[#allocation125_spill] sm:$0xff] }
 0x383   :  { %v2782_v45 = vmax.f32 %v2728_v33, %v2774_v26  ;;  %v3027_v17 = vadd.f32 %v3019_v36, %v8413_v49  ;;  %v3044_v52 = vadd.f32 %v3036_v35, %v8414_v47  ;;  %v1808_v31 = vadd.f32 %v1800_v32, %v8415_v5  ;;  %v8419_v4 = vld [vmem:[#allocation51_spill] sm:$0xff]  ;;  %v8421_v36 = vld [vmem:[#allocation16_spill] sm:$0xff]  ;;  %v8425_v42 = vld [vmem:[#allocation133_spill] sm:$0xff] }
 0x384   :  { %v1827_v8 = vadd.f32 %v8416_v37, %v1809_v19  ;;  %v1854_v22 = vadd.f32 %v1846_v50, %v8417_v24  ;;  %v1873_v55 = vadd.f32 %v8418_v46, %v1855_v12  ;;  %v2999_v7 = vmax.f32 %v2945_v20, %v2991_v41  ;;  %v8424_v61 = vld [vmem:[#allocation131_spill] sm:$0xff]  ;;  %v8426_v50 = vld [vmem:[#allocation84_spill] sm:$0xff]  ;;  %v8427_v20 = vld [vmem:[#allocation86_spill] sm:$0xff] }
 0x385   :  { %v2836_v1 = vmax.f32 %v2782_v45, %v2828_v0  ;;  %v1900_v18 = vmul.f32 %v8419_v4, %v6862_v27  ;;  %v1909_v38 = vadd.f32 %v8420_v9, %v1891_v16  ;;  %v1826_v57 = vadd.f32 %v8421_v36, %v1808_v31  ;;  %v8430_v37 = vld [vmem:[#allocation23_spill] sm:$0xff]  ;;  %v8432_v24 = vld [vmem:[#allocation20_spill] sm:$0xff] }
 0x386   :  { %v1872_v58 = vadd.f32 %v8422_v63, %v1854_v22  ;;  %v1881_v23 = vmax.f32 %v1827_v8, %v1873_v55  ;;  %v1954_v59 = vmul.f32 %v8382_v21, %v6862_v27  ;;  %v3045_v33 = vadd.f32 %v8423_v54, %v3027_v17  ;;  %v8435_v4 = vld [vmem:[#allocation31_spill] sm:$0xff]  ;;  %v8439_v54 = vld [vmem:[#allocation92_spill] sm:$0xff] }
 0x387   :  { %v2890_v26 = vmax.f32 %v2836_v1, %v2882_v25  ;;  %v1908_v0 = vadd.f32 %v1900_v18, %v8424_v61  ;;  %v1927_v41 = vadd.f32 %v6764_v13, %v1909_v38  ;;  %v1963_v16 = vadd.f32 %v6782_v6, %v1945_v3  ;;  %v8428_v13 = vld [vmem:[#allocation134_spill] sm:$0xff]  ;;  %v8429_v6 = vld [vmem:[#allocation136_spill] sm:$0xff]  ;;  %v8436_v18 = vld [vmem:[#allocation25_spill] sm:$0xff] }
 0x388   :  { %v1880_v35 = vmax.f32 %v1826_v57, %v1872_v58  ;;  %v1962_v32 = vadd.f32 %v1954_v59, %v8425_v42  ;;  %v2008_v56 = vmul.f32 %v8344_v34, %v6862_v27  ;;  %v2017_v21 = vadd.f32 %v6804_v39, %v1999_v51  ;;  %v8431_v51 = vld [vmem:[#allocation59_spill] sm:$0xff]  ;;  %v8441_v61 = vld [vmem:[#allocation89_spill] sm:$0xff] }
 0x389   :  { %v2944_v19 = vmax.f32 %v2890_v26, %v2936_v10  ;;  %v1926_v12 = vadd.f32 %v8426_v50, %v1908_v0  ;;  %v1935_v45 = vmax.f32 %v1881_v23, %v1927_v41  ;;  %v3053_v25 = vmax.f32 %v2999_v7, %v3045_v33  ;;  %v8437_v63 = vld [vmem:[#allocation19_spill] sm:$0xff]  ;;  %v8438_v23 = vld [vmem:[#allocation41_spill] sm:$0xff]  ;;  %v8442_v0 = vld [vmem:[#allocation38_spill] sm:$0xff] }
 0x38a   :  { %v1980_v49 = vadd.f32 %v8427_v20, %v1962_v32  ;;  %v1981_v17 = vadd.f32 %v6793_v15, %v1963_v16  ;;  %v2016_v47 = vadd.f32 %v2008_v56, %v8428_v13  ;;  %v2033_v3 = vadd.f32 %v8429_v6, %v6820_v60  ;;  %v8440_v33 = vld [vmem:[#allocation87_spill] sm:$0xff]  ;;  %v8444_v16 = vld [vmem:[#allocation116_spill] sm:$0xff]  ;;  %v8450_v13 = vld [vmem:[#allocation101_spill] sm:$0xff] }
 0x38b   :  { %v2998_v5 = vmax.f32 %v2944_v19, %v2990_v53  ;;  %v1934_v31 = vmax.f32 %v1880_v35, %v1926_v12  ;;  %v2035_v34 = vadd.f32 %v6812_v48, %v2017_v21  ;;  %v2053_v39 = vmul.f32 %v6102_v62, %v6808_v2  ;;  %v8434_v62 = vld [vmem:[#allocation8_spill] sm:$0xff]  ;;  %v8445_v56 = vld [vmem:[#allocation63_spill] sm:$0xff]  ;;  %v8447_v21 = vld [vmem:[#allocation110_spill] sm:$0xff] }
 0x38c   :  { %v1989_v10 = vmax.f32 %v1935_v45, %v1981_v17  ;;  %v2034_v8 = vadd.f32 %v8430_v37, %v2016_v47  ;;  %v2060_v22 = vmul.f32 %v8432_v24, %v8431_v51  ;;  %v2061_v53 = vmul.f32 %v8432_v24, %v6499_v43  ;;  %v8446_v12 = vld [vmem:[#allocation43_spill] sm:$0xff]  ;;  %v8448_v20 = vld [vmem:[#allocation120_spill] sm:$0xff]  ;;  %v8451_v6 = vld [vmem:[#allocation130_spill] sm:$0xff] }
 0x38d   :  { %v3052_v46 = vmax.f32 %v2998_v5, %v3044_v52  ;;  %v1988_v15 = vmax.f32 %v1934_v31, %v1980_v49  ;;  %v2062_v55 = vmul.f32 %v8432_v24, %v6862_v27  ;;  %v8433_v48 = vmax.f32 %v6797_v11, %v6800_v30  ;;  %v8449_v49 = vld [vmem:[#allocation70_spill] sm:$0xff] }
 0x38e   :  { %v2063_v1 = vmul.f32 %v8432_v24, %v6514_v44  ;;  %v2068_v7 = vadd.f32 %v2060_v22, %v8434_v62  ;;  %v2078_v52 = vmul.f32 %v8436_v18, %v8435_v4  ;;  %v2069_v36 = vadd.f32 %v2061_v53, %v6829_v29  ;;  %v8454_v24 = vld [vmem:[#allocation113_spill] sm:$0xff] }
 0x38f   :  { %v6946_v60 = vmax.f32 %v8433_v48, %v2033_v3  ;;  %v3106_v9 = vsel %vm3072_vm9, %v3052_v46, %v6778_v14  ;;  %v6955_v38 = vmax.f32 %v1988_v15, %v2034_v8  ;;  %v2070_v57 = vadd.f32 %v2062_v55, %v6856_v28  ;;  %v8443_v28 = vld [vmem:[#allocation137_spill] sm:$0xff]  ;;  %v8455_v46 = vld [vmem:[#allocation32_spill] sm:$0xff]  ;;  %v8456_v55 = vld [vmem:[#allocation10_spill] sm:$0xff] }
 0x390   :  { %v3107_v11 = vsel %vm3074_vm10, %v3053_v25, %v3106_v9  ;;  %v2071_v30 = vadd.f32 %v2063_v1, %v2053_v39  ;;  %v2079_v58 = vmul.f32 %v8436_v18, %v8437_v63  ;;  %v2080_v59 = vmul.f32 %v8436_v18, %v8438_v23  ;;  %v8453_v8 = vld [vmem:[#allocation9_spill] sm:$0xff]  ;;  %v8457_v48 = vld [vmem:[#allocation24_spill] sm:$0xff] }
 0x391   :  { %3217 = vmatmul.f32.vlgmr.msra.gmra.mxu2 %v3107_v11  ;;  %v6964_v26 = vmax.f32 %v1989_v10, %v2035_v34  ;;  %v2081_v14 = vmul.f32 %v8436_v18, %v8439_v54  ;;  %v2084_v29 = vadd.f32 %v8441_v61, %v8440_v33  ;;  %v2085_v41 = vadd.f32 %v8443_v28, %v8442_v0  ;;  %v8452_v10 = vld [vmem:[#allocation62_spill] sm:$0xff]  ;;  %v8458_v1 = vld [vmem:[#allocation109_spill] sm:$0xff]  ;;  %v8460_v11 = vld [vmem:[#allocation12_spill] sm:$0xff] }
 0x392   :  { %v2086_v35 = vadd.f32 %v2078_v52, %v2068_v7  ;;  %v2087_v42 = vadd.f32 %v2079_v58, %v2069_v36  ;;  %v2088_v32 = vadd.f32 %v2080_v59, %v2070_v57  ;;  %v2091_v19 = vmax.f32 %v8445_v56, %v8444_v16  ;;  %v8459_v36 = vld [vmem:[#allocation28_spill] sm:$0xff]  ;;  %v8465_v16 = vld [vmem:[#allocation39_spill] sm:$0xff] }
 0x393   :  { %v2089_v50 = vadd.f32 %v2081_v14, %v2071_v30  ;;  %v2092_v45 = vmax.f32 %v8446_v12, %v2084_v29  ;;  %v2093_v25 = vmax.f32 %v8447_v21, %v2085_v41  ;;  %v2100_v17 = vmul.f32 %v8449_v49, %v8448_v20  ;;  %v8461_v29 = vld [vmem:[#allocation112_spill] sm:$0xff] }
 0x394   :  { %v2094_v47 = vmax.f32 %v8450_v13, %v2086_v35  ;;  %v2095_v5 = vmax.f32 %v6946_v60, %v2087_v42  ;;  %v2096_v31 = vmax.f32 %v6955_v38, %v2088_v32  ;;  %v2101_v3 = vmul.f32 %v8449_v49, %v8451_v6  ;;  %v8462_v0 = vld [vmem:[#allocation100_spill] sm:$0xff] }
 0x395   :  { %v2097_v34 = vmax.f32 %v6964_v26, %v2089_v50  ;;  %v2102_v37 = vmul.f32 %v8449_v49, %v8452_v10  ;;  %v2103_v39 = vmul.f32 %v8449_v49, %v8453_v8  ;;  %v2104_v22 = vmul.f32 %v8449_v49, %v8454_v24  ;;  %v8463_v41 = vld [vmem:[#allocation96_spill] sm:$0xff] }
 0x396   :  { %v2105_v15 = vmul.f32 %v8449_v49, %v8455_v46  ;;  %v2107_v53 = vmul.f32 %v8449_v49, %v6808_v2  ;;  %v2112_v60 = vmul.f32 %v8457_v48, %v8456_v55  ;;  %v2113_v62 = vmul.f32 %v8457_v48, %v8458_v1  ;;  %v8464_v42 = vld [vmem:[#allocation108_spill] sm:$0xff] }
 0x397   :  { %v2106_v7 = vmul.f32 %v8449_v49, %v8401_v40  ;;  %v2114_v18 = vmul.f32 %v8457_v48, %v8431_v51  ;;  %v2115_v52 = vmul.f32 %v8457_v48, %v6499_v43  ;;  %v2116_v9 = vmul.f32 %v8457_v48, %v6862_v27 }
 0x398   :  { %v2117_v38 = vmul.f32 %v8457_v48, %v6514_v44  ;;  %v2118_v57 = vadd.f32 %v8459_v36, %v2100_v17  ;;  %v2119_v30 = vadd.f32 %v8460_v11, %v2101_v3  ;;  %v2120_v58 = vadd.f32 %v2112_v60, %v2102_v37  ;;  %v8466_v48 = vld [vmem:[#allocation83_spill] sm:$0xff] }
 0x399   :  { %v2121_v59 = vadd.f32 %v2113_v62, %v2103_v39  ;;  %v2122_v26 = vadd.f32 %v2114_v18, %v2104_v22  ;;  %v2123_v14 = vadd.f32 %v2115_v52, %v2105_v15  ;;  %v2124_v33 = vadd.f32 %v2116_v9, %v2106_v7  ;;  %v8467_v60 = vld [vmem:[#allocation35_spill] sm:$0xff] }
 0x39a   :  { %v2125_v61 = vadd.f32 %v2117_v38, %v2107_v53  ;;  %v2128_v28 = vmul.f32 %v8462_v0, %v8461_v29  ;;  %v2129_v35 = vmul.f32 %v8462_v0, %v8463_v41  ;;  %v2130_v32 = vmul.f32 %v8462_v0, %v8464_v42 }
 0x39b   :  { %v2131_v56 = vmul.f32 %v8462_v0, %v8465_v16  ;;  %v2132_v50 = vmul.f32 %v8462_v0, %v8435_v4  ;;  %v2133_v12 = vmul.f32 %v8462_v0, %v8437_v63  ;;  %v2134_v21 = vmul.f32 %v8462_v0, %v8438_v23 }
 0x39c   :  { %v2135_v49 = vmul.f32 %v8462_v0, %v8439_v54  ;;  %v2136_v17 = vadd.f32 %v2128_v28, %v2118_v57  ;;  %v2137_v13 = vadd.f32 %v2129_v35, %v2119_v30  ;;  %v2138_v3 = vadd.f32 %v2130_v32, %v2120_v58  ;;  %v8469_v58 = vld [vmem:[#allocation11_spill] sm:$0xff] }
 0x39d   :  { %v2139_v37 = vadd.f32 %v2131_v56, %v2121_v59  ;;  %v2140_v39 = vadd.f32 %v2132_v50, %v2122_v26  ;;  %v2141_v22 = vadd.f32 %v2133_v12, %v2123_v14  ;;  %v2142_v15 = vadd.f32 %v2134_v21, %v2124_v33  ;;  %v8470_v35 = vld [vmem:[#allocation71_spill] sm:$0xff]  ;;  %v8471_v56 = vld [vmem:[#allocation74_spill] sm:$0xff] }
 0x39e   :  { %v2143_v53 = vadd.f32 %v2135_v49, %v2125_v61  ;;  %v8468_v62 = vmax.f32 %v8466_v48, %v8467_v60  ;;  %v2145_v18 = vmax.f32 %v2091_v19, %v2137_v13  ;;  %v2146_v52 = vmax.f32 %v2092_v45, %v2138_v3 }
 0x39f   :  { %v7033_v9 = vmax.f32 %v2093_v25, %v2139_v37  ;;  %v7035_v38 = vmax.f32 %v2094_v47, %v2140_v39  ;;  %v7037_v36 = vmax.f32 %v2095_v5, %v2141_v22  ;;  %v7039_v57 = vmax.f32 %v2096_v31, %v2142_v15 }
 0x3a0   :  { %v2144_v7 = vmax.f32 %v8468_v62, %v2136_v17  ;;  %v7041_v11 = vmax.f32 %v2097_v34, %v2143_v53  ;;  %v2153_v30 = vstv %s7010_s8  ;;  %v2166_v59 = vmul.f32 %v8469_v58, %v8456_v55 }
 0x3a1   :  { %v2167_v26 = vmul.f32 %v8469_v58, %v8458_v1  ;;  %v2154_v19 = vmul.f32 %v2153_v30, %v8448_v20  ;;  %v2155_v45 = vmul.f32 %v2153_v30, %v8451_v6  ;;  %v2157_v25 = vmul.f32 %v2153_v30, %v8453_v8 }
 0x3a2   :  { %v2168_v47 = vmul.f32 %v8469_v58, %v8431_v51  ;;  %v2156_v5 = vmul.f32 %v2153_v30, %v8452_v10  ;;  %v2158_v31 = vmul.f32 %v2153_v30, %v8454_v24  ;;  %v2159_v34 = vmul.f32 %v2153_v30, %v8455_v46 }
 0x3a3   :  { %v2161_v14 = vmul.f32 %v2153_v30, %v6808_v2  ;;  %v2160_v33 = vmul.f32 %v2153_v30, %v8401_v40  ;;  %v2169_v61 = vmul.f32 %v8469_v58, %v6499_v43  ;;  %v2170_v0 = vmul.f32 %v8469_v58, %v6862_v27 }
 0x3a4   :  { %v2171_v28 = vmul.f32 %v8469_v58, %v6514_v44  ;;  %v2172_v32 = vadd.f32 %v8470_v35, %v2154_v19  ;;  %v2173_v50 = vadd.f32 %v8471_v56, %v2155_v45  ;;  %v2174_v12 = vadd.f32 %v2166_v59, %v2156_v5  ;;  %v8472_v56 = vld [vmem:[#allocation68_spill] sm:$0xff] }
 0x3a5   :  { %v2175_v21 = vadd.f32 %v2167_v26, %v2157_v25  ;;  %v2176_v49 = vadd.f32 %v2168_v47, %v2158_v31  ;;  %v2177_v17 = vadd.f32 %v2169_v61, %v2159_v34  ;;  %v2178_v13 = vadd.f32 %v2170_v0, %v2160_v33 }
 0x3a6   :  { %v2181_v3 = vstv %s7028_s30  ;;  %v2179_v37 = vadd.f32 %v2171_v28, %v2161_v14 }
 0x3a7   :  { %v2182_v39 = vmul.f32 %v2181_v3, %v8461_v29  ;;  %v2183_v22 = vmul.f32 %v2181_v3, %v8463_v41  ;;  %v2184_v15 = vmul.f32 %v2181_v3, %v8464_v42  ;;  %v2185_v53 = vmul.f32 %v2181_v3, %v8465_v16 }
 0x3a8   :  { %v2186_v48 = vmul.f32 %v2181_v3, %v8435_v4  ;;  %v2187_v60 = vmul.f32 %v2181_v3, %v8437_v63  ;;  %v2188_v62 = vmul.f32 %v2181_v3, %v8438_v23  ;;  %v2189_v30 = vmul.f32 %v2181_v3, %v8439_v54 }
 0x3a9   :  { %v2190_v58 = vadd.f32 %v2182_v39, %v2172_v32  ;;  %v2191_v59 = vadd.f32 %v2183_v22, %v2173_v50  ;;  %v2192_v26 = vadd.f32 %v2184_v15, %v2174_v12  ;;  %v2193_v19 = vadd.f32 %v2185_v53, %v2175_v21 }
 0x3aa   :  { %v2194_v45 = vadd.f32 %v2186_v48, %v2176_v49  ;;  %v2195_v25 = vadd.f32 %v2187_v60, %v2177_v17  ;;  %v2196_v47 = vadd.f32 %v2188_v62, %v2178_v13  ;;  %v2197_v5 = vadd.f32 %v2189_v30, %v2179_v37  ;;  %v8473_v13 = vld [vmem:[#allocation69_spill] sm:$0xff] }
 0x3ab   :  { %v2198_v31 = vmax.f32 %v2144_v7, %v2190_v58  ;;  %v2199_v34 = vmax.f32 %v2145_v18, %v2191_v59  ;;  %v2200_v14 = vmax.f32 %v2146_v52, %v2192_v26  ;;  %v2201_v33 = vmax.f32 %v7033_v9, %v2193_v19  ;;  %v8474_v58 = vld [vmem:[#allocation76_spill] sm:$0xff]  ;;  %v8475_v26 = vld [vmem:[#allocation77_spill] sm:$0xff] }
 0x3ac   :  { %v2202_v61 = vmax.f32 %v7035_v38, %v2194_v45  ;;  %v2203_v0 = vmax.f32 %v7037_v36, %v2195_v25  ;;  %v2204_v28 = vmax.f32 %v7039_v57, %v2196_v47  ;;  %v2205_v35 = vmax.f32 %v7041_v11, %v2197_v5 }
 0x3ad   :  { %v3063_v32 = vsel %vm3062_vm4, %v2199_v34, %v2198_v31  ;;  %v2210_v50 = vmul.f32 %v8472_v56, %v8456_v55  ;;  %v2211_v7 = vmul.f32 %v8472_v56, %v8458_v1  ;;  %v2212_v52 = vmul.f32 %v8472_v56, %v8431_v51 }
 0x3ae   :  { %v3065_v18 = vsel %vm3064_vm5, %v2200_v14, %v3063_v32  ;;  %v2213_v9 = vmul.f32 %v8472_v56, %v6499_v43  ;;  %v2214_v38 = vmul.f32 %v8472_v56, %v6862_v27  ;;  %v2215_v57 = vmul.f32 %v8472_v56, %v6514_v44 }
 0x3af   :  { %v3067_v36 = vsel %vm3066_vm6, %v2201_v33, %v3065_v18  ;;  %v2217_v11 = vstv %s7067_s0  ;;  %v2235_v12 = vstv %s7072_s17  ;;  %v2256_v3 = vmul.f32 %v8473_v13, %v8456_v55 }
 0x3b0   :  { %v3069_v21 = vsel %vm3068_vm7, %v2202_v61, %v3067_v36  ;;  %v2218_v49 = vmul.f32 %v2217_v11, %v8461_v29  ;;  %v2219_v17 = vmul.f32 %v2217_v11, %v8463_v41  ;;  %v2220_v39 = vmul.f32 %v2217_v11, %v8464_v42 }
 0x3b1   :  { %v3071_v37 = vsel %vm3070_vm8, %v2203_v0, %v3069_v21  ;;  %v2221_v22 = vmul.f32 %v2217_v11, %v8465_v16  ;;  %v2222_v15 = vmul.f32 %v2217_v11, %v8435_v4  ;;  %v2223_v48 = vmul.f32 %v2217_v11, %v8437_v63 }
 0x3b2   :  { %v3073_v53 = vsel %vm3072_vm9, %v2204_v28, %v3071_v37  ;;  %v2224_v60 = vmul.f32 %v2217_v11, %v8438_v23  ;;  %v2225_v62 = vmul.f32 %v2217_v11, %v8439_v54  ;;  %v2226_v59 = vadd.f32 %v2218_v49, %v8474_v58 }
 0x3b3   :  { %v3075_v30 = vsel %vm3074_vm10, %v2205_v35, %v3073_v53  ;;  %v2227_v19 = vadd.f32 %v2219_v17, %v8475_v26  ;;  %v2228_v45 = vadd.f32 %v2220_v39, %v2210_v50  ;;  %v2229_v25 = vadd.f32 %v2221_v22, %v2211_v7  ;;  %v8477_v26 = vld [vmem:[#allocation80_spill] sm:$0xff] }
 0x3b4   :  { %3177 = vmatmul.f32.vlgmr.msra.gmra.mxu0 %v3075_v30  ;;  %v2230_v47 = vadd.f32 %v2222_v15, %v2212_v52  ;;  %v2231_v5 = vadd.f32 %v2223_v48, %v2213_v9  ;;  %v2232_v31 = vadd.f32 %v2224_v60, %v2214_v38  ;;  %v2236_v34 = vmul.f32 %v2235_v12, %v8448_v20 }
 0x3b5   :  { %v2237_v14 = vmul.f32 %v2235_v12, %v8451_v6  ;;  %v2238_v33 = vmul.f32 %v2235_v12, %v8452_v10  ;;  %v2239_v61 = vmul.f32 %v2235_v12, %v8453_v8  ;;  %v2240_v0 = vmul.f32 %v2235_v12, %v8454_v24 }
 0x3b6   :  { %v2241_v28 = vmul.f32 %v2235_v12, %v8455_v46  ;;  %v2242_v35 = vmul.f32 %v2235_v12, %v8401_v40  ;;  %v2243_v32 = vmul.f32 %v2235_v12, %v6808_v2  ;;  %v2233_v56 = vadd.f32 %v2225_v62, %v2215_v57 }
 0x3b7   :  { %v7129_v50 = vadd.f32 %v2236_v34, %v2226_v59  ;;  %v7131_v7 = vadd.f32 %v2237_v14, %v2227_v19  ;;  %v7133_v18 = vadd.f32 %v2238_v33, %v2228_v45  ;;  %v7135_v52 = vadd.f32 %v2239_v61, %v2229_v25  ;;  %v8476_v59 = vld [vmem:[#allocation78_spill] sm:$0xff] }
 0x3b8   :  { %v7137_v9 = vadd.f32 %v2240_v0, %v2230_v47  ;;  %v7139_v38 = vadd.f32 %v2241_v28, %v2231_v5  ;;  %v7141_v36 = vadd.f32 %v2242_v35, %v2232_v31  ;;  %v7143_v11 = vadd.f32 %v2243_v32, %v2233_v56 }
 0x3b9   :  { %v2257_v12 = vmul.f32 %v8473_v13, %v8458_v1  ;;  %v2258_v57 = vmul.f32 %v8473_v13, %v8431_v51  ;;  %v2259_v21 = vmul.f32 %v8473_v13, %v6499_v43  ;;  %v2260_v49 = vmul.f32 %v8473_v13, %v6862_v27 }
 0x3ba   :  { %v2261_v17 = vmul.f32 %v8473_v13, %v6514_v44  ;;  %v2263_v37 = vstv %s7110_s18  ;;  %v2281_v39 = vstv %s7116_s4 }
 0x3bb   :  { %v2264_v22 = vmul.f32 %v2263_v37, %v8461_v29  ;;  %v2265_v15 = vmul.f32 %v2263_v37, %v8463_v41  ;;  %v2266_v53 = vmul.f32 %v2263_v37, %v8464_v42  ;;  %v2267_v48 = vmul.f32 %v2263_v37, %v8465_v16 }
 0x3bc   :  { %v2268_v60 = vmul.f32 %v2263_v37, %v8435_v4  ;;  %v2269_v62 = vmul.f32 %v2263_v37, %v8437_v63  ;;  %v2270_v30 = vmul.f32 %v2263_v37, %v8438_v23  ;;  %v2271_v58 = vmul.f32 %v2263_v37, %v8439_v54 }
 0x3bd   :  { %v2272_v13 = vadd.f32 %v2264_v22, %v8476_v59  ;;  %v2273_v19 = vadd.f32 %v2265_v15, %v8477_v26  ;;  %v2274_v45 = vadd.f32 %v2266_v53, %v2256_v3  ;;  %v2275_v25 = vadd.f32 %v2267_v48, %v2257_v12  ;;  %v8478_v15 = vld [vmem:[#allocation40_spill] sm:$0xff]  ;;  %v8479_v53 = vld [vmem:[#allocation27_spill] sm:$0xff] }
 0x3be   :  { %v2276_v47 = vadd.f32 %v2268_v60, %v2258_v57  ;;  %v2277_v5 = vadd.f32 %v2269_v62, %v2259_v21  ;;  %v2278_v31 = vadd.f32 %v2270_v30, %v2260_v49  ;;  %v2279_v34 = vadd.f32 %v2271_v58, %v2261_v17  ;;  %v8481_v48 = vld [vmem:[#allocation55_spill] sm:$0xff]  ;;  %v8483_v62 = vld [vmem:[#allocation73_spill] sm:$0xff] }
 0x3bf   :  { %v2282_v14 = vmul.f32 %v2281_v39, %v8448_v20  ;;  %v2283_v33 = vmul.f32 %v2281_v39, %v8451_v6  ;;  %v2284_v61 = vmul.f32 %v2281_v39, %v8452_v10  ;;  %v2285_v0 = vmul.f32 %v2281_v39, %v8453_v8 }
 0x3c0   :  { %v2286_v28 = vmul.f32 %v2281_v39, %v8454_v24  ;;  %v2287_v3 = vmul.f32 %v2281_v39, %v8455_v46  ;;  %v2288_v35 = vmul.f32 %v2281_v39, %v8401_v40  ;;  %v2289_v32 = vmul.f32 %v2281_v39, %v6808_v2 }
 0x3c1   :  { %v7179_v56 = vadd.f32 %v2282_v14, %v2272_v13  ;;  %v7181_v12 = vadd.f32 %v2283_v33, %v2273_v19  ;;  %v7183_v57 = vadd.f32 %v2284_v61, %v2274_v45  ;;  %v7185_v21 = vadd.f32 %v2285_v0, %v2275_v25  ;;  %v8486_v19 = vld [vmem:[#allocation72_spill] sm:$0xff] }
 0x3c2   :  { %v7187_v49 = vadd.f32 %v2286_v28, %v2276_v47  ;;  %v7189_v17 = vadd.f32 %v2287_v3, %v2277_v5  ;;  %v7191_v37 = vadd.f32 %v2288_v35, %v2278_v31  ;;  %v7193_v22 = vadd.f32 %v2289_v32, %v2279_v34  ;;  %v8487_v35 = vld [vmem:[#allocation82_spill] sm:$0xff] }
 0x3c3   :  { %v7197_v39 = vmul.f32 %v8479_v53, %v8478_v15  ;;  %v7201_v60 = vmul.f32 %v8479_v53, %v8481_v48  ;;  %v7205_v30 = vmul.f32 %v8483_v62, %v8478_v15  ;;  %v7209_v58 = vmul.f32 %v8483_v62, %v8481_v48  ;;  %v8488_v15 = vld [vmem:[#allocation81_spill] sm:$0xff] }
 0x3c4   :  { %v2298_v59 = vmax.f32 %v7129_v50, %v7179_v56  ;;  %v2299_v13 = vmax.f32 %v7131_v7, %v7181_v12  ;;  %v2300_v26 = vmax.f32 %v7133_v18, %v7183_v57  ;;  %v2310_v45 = vmul.f32 %v8486_v19, %v8456_v55 }
 0x3c5   :  { %8480 = vst [vmem:[#allocation17_spill] sm:$0xff] %v7197_v39  ;;  %v2301_v25 = vmax.f32 %v7135_v52, %v7185_v21  ;;  %v2302_v47 = vmax.f32 %v7137_v9, %v7187_v49  ;;  %v2303_v5 = vmax.f32 %v7139_v38, %v7189_v17  ;;  %v2304_v50 = vmax.f32 %v7141_v36, %v7191_v37 }
 0x3c6   :  { %8482 = vst [vmem:[#allocation115_spill] sm:$0xff] %v7201_v60  ;;  %v2305_v7 = vmax.f32 %v7143_v11, %v7193_v22  ;;  %v2311_v18 = vmul.f32 %v8486_v19, %v8458_v1  ;;  %v2312_v31 = vmul.f32 %v8486_v19, %v8431_v51  ;;  %v2317_v34 = vstv %s7167_s19 }
 0x3c7   :  { %8484 = vst [vmem:[#allocation64_spill] sm:$0xff] %v7205_v30  ;;  %v2313_v52 = vmul.f32 %v8486_v19, %v6499_v43  ;;  %v2314_v9 = vmul.f32 %v8486_v19, %v6862_v27  ;;  %v2318_v38 = vmul.f32 %v2317_v34, %v8461_v29  ;;  %v2335_v14 = vstv %s7173_s5 }
 0x3c8   :  { %8485 = vst [vmem:[#allocation26_spill] sm:$0xff] %v7209_v58  ;;  %v2319_v36 = vmul.f32 %v2317_v34, %v8463_v41  ;;  %v2320_v11 = vmul.f32 %v2317_v34, %v8464_v42  ;;  %v2321_v33 = vmul.f32 %v2317_v34, %v8465_v16  ;;  %v2322_v61 = vmul.f32 %v2317_v34, %v8435_v4 }
 0x3c9   :  { %v2315_v0 = vmul.f32 %v8486_v19, %v6514_v44  ;;  %v2323_v28 = vmul.f32 %v2317_v34, %v8437_v63  ;;  %v2324_v3 = vmul.f32 %v2317_v34, %v8438_v23  ;;  %v2364_v32 = vmul.f32 %v8487_v35, %v8456_v55  ;;  %v8489_v19 = vld [vmem:[#allocation85_spill] sm:$0xff] }
 0x3ca   :  { %v2325_v56 = vmul.f32 %v2317_v34, %v8439_v54  ;;  %v2328_v12 = vadd.f32 %v2320_v11, %v2310_v45  ;;  %v2329_v57 = vadd.f32 %v2321_v33, %v2311_v18  ;;  %v2330_v21 = vadd.f32 %v2322_v61, %v2312_v31 }
 0x3cb   :  { %v2331_v49 = vadd.f32 %v2323_v28, %v2313_v52  ;;  %v2332_v17 = vadd.f32 %v2324_v3, %v2314_v9  ;;  %v2336_v37 = vmul.f32 %v2335_v14, %v8448_v20  ;;  %v2337_v22 = vmul.f32 %v2335_v14, %v8451_v6 }
 0x3cc   :  { %v2326_v48 = vadd.f32 %v2318_v38, %v8488_v15  ;;  %v2327_v58 = vadd.f32 %v2319_v36, %v8489_v19  ;;  %v2338_v30 = vmul.f32 %v2335_v14, %v8452_v10  ;;  %v2343_v45 = vmul.f32 %v2335_v14, %v6808_v2 }
 0x3cd   :  { %v2339_v18 = vmul.f32 %v2335_v14, %v8453_v8  ;;  %v2340_v31 = vmul.f32 %v2335_v14, %v8454_v24  ;;  %v2341_v34 = vmul.f32 %v2335_v14, %v8455_v46  ;;  %v2342_v52 = vmul.f32 %v2335_v14, %v8401_v40 }
 0x3ce   :  { %v2333_v9 = vadd.f32 %v2325_v56, %v2315_v0  ;;  %v2344_v11 = vadd.f32 %v2336_v37, %v2326_v48  ;;  %v2345_v33 = vadd.f32 %v2337_v22, %v2327_v58  ;;  %v2346_v61 = vadd.f32 %v2338_v30, %v2328_v12  ;;  %v8490_v37 = vld [vmem:[#allocation94_spill] sm:$0xff] }
 0x3cf   :  { %v2347_v38 = vadd.f32 %v2339_v18, %v2329_v57  ;;  %v2348_v28 = vadd.f32 %v2340_v31, %v2330_v21  ;;  %v2349_v36 = vadd.f32 %v2341_v34, %v2331_v49  ;;  %v2350_v3 = vadd.f32 %v2342_v52, %v2332_v17 }
 0x3d0   :  { %v2351_v15 = vadd.f32 %v2343_v45, %v2333_v9  ;;  %v7265_v19 = vmax.f32 %v2298_v59, %v2344_v11  ;;  %v7267_v60 = vmax.f32 %v2299_v13, %v2345_v33  ;;  %v7269_v39 = vmax.f32 %v2300_v26, %v2346_v61  ;;  %v8491_v11 = vld [vmem:[#allocation90_spill] sm:$0xff]  ;;  %v8492_v61 = vld [vmem:[#allocation99_spill] sm:$0xff] }
 0x3d1   :  { %v7271_v62 = vmax.f32 %v2301_v25, %v2347_v38  ;;  %v7273_v14 = vmax.f32 %v2302_v47, %v2348_v28  ;;  %v7275_v0 = vmax.f32 %v2303_v5, %v2349_v36  ;;  %v7277_v30 = vmax.f32 %v2304_v50, %v2350_v3 }
 0x3d2   :  { %v7279_v58 = vmax.f32 %v2305_v7, %v2351_v15  ;;  %v2365_v56 = vmul.f32 %v8487_v35, %v8458_v1  ;;  %v2366_v59 = vmul.f32 %v8487_v35, %v8431_v51  ;;  %v2371_v13 = vstv %s7251_s20 }
 0x3d3   :  { %v2367_v26 = vmul.f32 %v8487_v35, %v6499_v43  ;;  %v2368_v25 = vmul.f32 %v8487_v35, %v6862_v27  ;;  %v2372_v47 = vmul.f32 %v2371_v13, %v8461_v29  ;;  %v2389_v5 = vstv %s7255_s21 }
 0x3d4   :  { %v2373_v50 = vmul.f32 %v2371_v13, %v8463_v41  ;;  %v2374_v7 = vmul.f32 %v2371_v13, %v8464_v42  ;;  %v2375_v12 = vmul.f32 %v2371_v13, %v8465_v16  ;;  %v2376_v57 = vmul.f32 %v2371_v13, %v8435_v4 }
 0x3d5   :  { %v2369_v21 = vmul.f32 %v8487_v35, %v6514_v44  ;;  %v2377_v49 = vmul.f32 %v2371_v13, %v8437_v63  ;;  %v2378_v17 = vmul.f32 %v2371_v13, %v8438_v23  ;;  %v2418_v22 = vmul.f32 %v8490_v37, %v8456_v55 }
 0x3d6   :  { %v2379_v48 = vmul.f32 %v2371_v13, %v8439_v54  ;;  %v2382_v45 = vadd.f32 %v2374_v7, %v2364_v32  ;;  %v2383_v18 = vadd.f32 %v2375_v12, %v2365_v56  ;;  %v2384_v31 = vadd.f32 %v2376_v57, %v2366_v59 }
 0x3d7   :  { %v2385_v34 = vadd.f32 %v2377_v49, %v2367_v26  ;;  %v2386_v52 = vadd.f32 %v2378_v17, %v2368_v25  ;;  %v2390_v9 = vmul.f32 %v2389_v5, %v8448_v20  ;;  %v2391_v35 = vmul.f32 %v2389_v5, %v8451_v6 }
 0x3d8   :  { %v2380_v33 = vadd.f32 %v2372_v47, %v8491_v11  ;;  %v2381_v38 = vadd.f32 %v2373_v50, %v8492_v61  ;;  %v2392_v28 = vmul.f32 %v2389_v5, %v8452_v10  ;;  %v2397_v32 = vmul.f32 %v2389_v5, %v6808_v2 }
 0x3d9   :  { %v2393_v36 = vmul.f32 %v2389_v5, %v8453_v8  ;;  %v2394_v3 = vmul.f32 %v2389_v5, %v8454_v24  ;;  %v2395_v15 = vmul.f32 %v2389_v5, %v8455_v46  ;;  %v2396_v56 = vmul.f32 %v2389_v5, %v8401_v40 }
 0x3da   :  { %v2387_v59 = vadd.f32 %v2379_v48, %v2369_v21  ;;  %v2398_v13 = vadd.f32 %v2390_v9, %v2380_v33  ;;  %v2399_v26 = vadd.f32 %v2391_v35, %v2381_v38  ;;  %v2400_v25 = vadd.f32 %v2392_v28, %v2382_v45  ;;  %v8493_v33 = vld [vmem:[#allocation95_spill] sm:$0xff] }
 0x3db   :  { %v2401_v47 = vadd.f32 %v2393_v36, %v2383_v18  ;;  %v2402_v7 = vadd.f32 %v2394_v3, %v2384_v31  ;;  %v2403_v50 = vadd.f32 %v2395_v15, %v2385_v34  ;;  %v2404_v12 = vadd.f32 %v2396_v56, %v2386_v52 }
 0x3dc   :  { %v2405_v57 = vadd.f32 %v2397_v32, %v2387_v59  ;;  %v2406_v49 = vmax.f32 %v7265_v19, %v2398_v13  ;;  %v2407_v17 = vmax.f32 %v7267_v60, %v2399_v26  ;;  %v2408_v11 = vmax.f32 %v7269_v39, %v2400_v25  ;;  %v8494_v13 = vld [vmem:[#allocation102_spill] sm:$0xff]  ;;  %v8495_v25 = vld [vmem:[#allocation105_spill] sm:$0xff] }
 0x3dd   :  { %v2409_v61 = vmax.f32 %v7271_v62, %v2401_v47  ;;  %v2410_v5 = vmax.f32 %v7273_v14, %v2402_v7  ;;  %v2411_v21 = vmax.f32 %v7275_v0, %v2403_v50  ;;  %v2412_v48 = vmax.f32 %v7277_v30, %v2404_v12 }
 0x3de   :  { %v2413_v45 = vmax.f32 %v7279_v58, %v2405_v57  ;;  %v2419_v18 = vmul.f32 %v8490_v37, %v8458_v1  ;;  %v2420_v19 = vmul.f32 %v8490_v37, %v8431_v51  ;;  %v2425_v31 = vstv %s7303_s22 }
 0x3df   :  { %v2421_v39 = vmul.f32 %v8490_v37, %v6499_v43  ;;  %v2422_v60 = vmul.f32 %v8490_v37, %v6862_v27  ;;  %v2426_v62 = vmul.f32 %v2425_v31, %v8461_v29  ;;  %v2443_v14 = vstv %s7307_s23 }
 0x3e0   :  { %v2427_v0 = vmul.f32 %v2425_v31, %v8463_v41  ;;  %v2428_v30 = vmul.f32 %v2425_v31, %v8464_v42  ;;  %v2429_v58 = vmul.f32 %v2425_v31, %v8465_v16  ;;  %v2430_v34 = vmul.f32 %v2425_v31, %v8435_v4 }
 0x3e1   :  { %v2423_v52 = vmul.f32 %v8490_v37, %v6514_v44  ;;  %v2431_v9 = vmul.f32 %v2425_v31, %v8437_v63  ;;  %v2432_v35 = vmul.f32 %v2425_v31, %v8438_v23  ;;  %v2472_v38 = vmul.f32 %v8493_v33, %v8456_v55 }
 0x3e2   :  { %v2433_v28 = vmul.f32 %v2425_v31, %v8439_v54  ;;  %v2436_v32 = vadd.f32 %v2428_v30, %v2418_v22  ;;  %v2437_v36 = vadd.f32 %v2429_v58, %v2419_v18  ;;  %v2438_v3 = vadd.f32 %v2430_v34, %v2420_v19 }
 0x3e3   :  { %v2439_v15 = vadd.f32 %v2431_v9, %v2421_v39  ;;  %v2440_v56 = vadd.f32 %v2432_v35, %v2422_v60  ;;  %v2444_v59 = vmul.f32 %v2443_v14, %v8448_v20  ;;  %v2445_v37 = vmul.f32 %v2443_v14, %v8451_v6 }
 0x3e4   :  { %v2434_v26 = vadd.f32 %v2426_v62, %v8494_v13  ;;  %v2435_v47 = vadd.f32 %v2427_v0, %v8495_v25  ;;  %v2446_v7 = vmul.f32 %v2443_v14, %v8452_v10  ;;  %v2451_v22 = vmul.f32 %v2443_v14, %v6808_v2 }
 0x3e5   :  { %v2447_v50 = vmul.f32 %v2443_v14, %v8453_v8  ;;  %v2448_v12 = vmul.f32 %v2443_v14, %v8454_v24  ;;  %v2449_v57 = vmul.f32 %v2443_v14, %v8455_v46  ;;  %v2450_v18 = vmul.f32 %v2443_v14, %v8401_v40 }
 0x3e6   :  { %v2441_v19 = vadd.f32 %v2433_v28, %v2423_v52  ;;  %v2452_v31 = vadd.f32 %v2444_v59, %v2434_v26  ;;  %v2453_v39 = vadd.f32 %v2445_v37, %v2435_v47  ;;  %v2454_v60 = vadd.f32 %v2446_v7, %v2436_v32 }
 0x3e7   :  { %v2455_v62 = vadd.f32 %v2447_v50, %v2437_v36  ;;  %v2456_v30 = vadd.f32 %v2448_v12, %v2438_v3  ;;  %v2457_v0 = vadd.f32 %v2449_v57, %v2439_v15  ;;  %v2458_v58 = vadd.f32 %v2450_v18, %v2440_v56 }
 0x3e8   :  { %v2459_v34 = vadd.f32 %v2451_v22, %v2441_v19  ;;  %v7361_v9 = vmax.f32 %v2406_v49, %v2452_v31  ;;  %v7363_v35 = vmax.f32 %v2407_v17, %v2453_v39  ;;  %v7365_v13 = vmax.f32 %v2408_v11, %v2454_v60  ;;  %v8496_v19 = vld [vmem:[#allocation106_spill] sm:$0xff] }
 0x3e9   :  { %v7367_v25 = vmax.f32 %v2409_v61, %v2455_v62  ;;  %v7369_v14 = vmax.f32 %v2410_v5, %v2456_v30  ;;  %v7371_v52 = vmax.f32 %v2411_v21, %v2457_v0  ;;  %v7373_v28 = vmax.f32 %v2412_v48, %v2458_v58  ;;  %v8497_v39 = vld [vmem:[#allocation114_spill] sm:$0xff] }
 0x3ea   :  { %v7375_v32 = vmax.f32 %v2413_v45, %v2459_v34  ;;  %v2473_v36 = vmul.f32 %v8493_v33, %v8458_v1  ;;  %v2474_v49 = vmul.f32 %v8493_v33, %v8431_v51  ;;  %v2479_v17 = vstv %s7347_s24 }
 0x3eb   :  { %v2475_v11 = vmul.f32 %v8493_v33, %v6499_v43  ;;  %v2476_v61 = vmul.f32 %v8493_v33, %v6862_v27  ;;  %v2480_v5 = vmul.f32 %v2479_v17, %v8461_v29  ;;  %v2497_v21 = vstv %s7351_s3 }
 0x3ec   :  { %v2481_v48 = vmul.f32 %v2479_v17, %v8463_v41  ;;  %v2482_v45 = vmul.f32 %v2479_v17, %v8464_v42  ;;  %v2483_v3 = vmul.f32 %v2479_v17, %v8465_v16  ;;  %v2484_v15 = vmul.f32 %v2479_v17, %v8435_v4 }
 0x3ed   :  { %v2477_v56 = vmul.f32 %v8493_v33, %v6514_v44  ;;  %v2485_v59 = vmul.f32 %v2479_v17, %v8437_v63  ;;  %v2486_v37 = vmul.f32 %v2479_v17, %v8438_v23  ;;  %v2526_v26 = vmul.f32 %v8479_v53, %v8456_v55 }
 0x3ee   :  { %v2487_v47 = vmul.f32 %v2479_v17, %v8439_v54  ;;  %v2490_v7 = vadd.f32 %v2482_v45, %v2472_v38  ;;  %v2491_v22 = vadd.f32 %v2483_v3, %v2473_v36  ;;  %v2492_v50 = vadd.f32 %v2484_v15, %v2474_v49 }
 0x3ef   :  { %v2493_v12 = vadd.f32 %v2485_v59, %v2475_v11  ;;  %v2494_v57 = vadd.f32 %v2486_v37, %v2476_v61  ;;  %v2498_v18 = vmul.f32 %v2497_v21, %v8448_v20  ;;  %v2499_v33 = vmul.f32 %v2497_v21, %v8451_v6 }
 0x3f0   :  { %v2488_v31 = vadd.f32 %v2480_v5, %v8496_v19  ;;  %v2489_v60 = vadd.f32 %v2481_v48, %v8497_v39  ;;  %v2500_v62 = vmul.f32 %v2497_v21, %v8452_v10  ;;  %v2505_v38 = vmul.f32 %v2497_v21, %v6808_v2  ;;  %v8498_v39 = vld [vmem:[#allocation73_spill] sm:$0xff] }
 0x3f1   :  { %v2501_v30 = vmul.f32 %v2497_v21, %v8453_v8  ;;  %v2502_v0 = vmul.f32 %v2497_v21, %v8454_v24  ;;  %v2503_v58 = vmul.f32 %v2497_v21, %v8455_v46  ;;  %v2504_v34 = vmul.f32 %v2497_v21, %v8401_v40 }
 0x3f2   :  { %v2495_v36 = vadd.f32 %v2487_v47, %v2477_v56  ;;  %v2506_v49 = vadd.f32 %v2498_v18, %v2488_v31  ;;  %v2507_v17 = vadd.f32 %v2499_v33, %v2489_v60  ;;  %v2508_v11 = vadd.f32 %v2500_v62, %v2490_v7 }
 0x3f3   :  { %v2509_v61 = vadd.f32 %v2501_v30, %v2491_v22  ;;  %v2510_v5 = vadd.f32 %v2502_v0, %v2492_v50  ;;  %v2511_v48 = vadd.f32 %v2503_v58, %v2493_v12  ;;  %v2512_v45 = vadd.f32 %v2504_v34, %v2494_v57 }
 0x3f4   :  { %v7413_v3 = vadd.f32 %v2505_v38, %v2495_v36  ;;  %v2514_v15 = vmax.f32 %v7361_v9, %v2506_v49  ;;  %v2515_v59 = vmax.f32 %v7363_v35, %v2507_v17  ;;  %v2516_v37 = vmax.f32 %v7365_v13, %v2508_v11  ;;  %v8499_v49 = vld [vmem:[#allocation17_spill] sm:$0xff]  ;;  %v8500_v11 = vld [vmem:[#allocation115_spill] sm:$0xff] }
 0x3f5   :  { %v2517_v21 = vmax.f32 %v7367_v25, %v2509_v61  ;;  %v2518_v56 = vmax.f32 %v7369_v14, %v2510_v5  ;;  %v2519_v47 = vmax.f32 %v7371_v52, %v2511_v48  ;;  %v2520_v7 = vmax.f32 %v7373_v28, %v2512_v45 }
 0x3f6   :  { %v2521_v22 = vmax.f32 %v7375_v32, %v7413_v3  ;;  %v2527_v50 = vmul.f32 %v8479_v53, %v8458_v1  ;;  %v2528_v9 = vmul.f32 %v8479_v53, %v8431_v51  ;;  %v2533_v35 = vstv %s7399_s26 }
 0x3f7   :  { %v2529_v13 = vmul.f32 %v8479_v53, %v6499_v43  ;;  %v2530_v25 = vmul.f32 %v8479_v53, %v6862_v27  ;;  %v2534_v14 = vmul.f32 %v2533_v35, %v8461_v29  ;;  %v2551_v52 = vstv %s7403_s14 }
 0x3f8   :  { %v2535_v28 = vmul.f32 %v2533_v35, %v8463_v41  ;;  %v2536_v12 = vmul.f32 %v2533_v35, %v8464_v42  ;;  %v2537_v57 = vmul.f32 %v2533_v35, %v8465_v16  ;;  %v2538_v18 = vmul.f32 %v2533_v35, %v8435_v4 }
 0x3f9   :  { %v2531_v33 = vmul.f32 %v8479_v53, %v6514_v44  ;;  %v2539_v19 = vmul.f32 %v2533_v35, %v8437_v63  ;;  %v2540_v31 = vmul.f32 %v2533_v35, %v8438_v23  ;;  %v2580_v60 = vmul.f32 %v8498_v39, %v8456_v55 }
 0x3fa   :  { %v2541_v62 = vmul.f32 %v2533_v35, %v8439_v54  ;;  %v2544_v38 = vadd.f32 %v2536_v12, %v2526_v26  ;;  %v2545_v30 = vadd.f32 %v2537_v57, %v2527_v50  ;;  %v2546_v0 = vadd.f32 %v2538_v18, %v2528_v9 }
 0x3fb   :  { %v2547_v58 = vadd.f32 %v2539_v19, %v2529_v13  ;;  %v2548_v34 = vadd.f32 %v2540_v31, %v2530_v25  ;;  %v2552_v36 = vmul.f32 %v2551_v52, %v8448_v20  ;;  %v2553_v53 = vmul.f32 %v2551_v52, %v8451_v6 }
 0x3fc   :  { %v2542_v17 = vadd.f32 %v2534_v14, %v8499_v49  ;;  %v2543_v61 = vadd.f32 %v2535_v28, %v8500_v11  ;;  %v2554_v5 = vmul.f32 %v2551_v52, %v8452_v10  ;;  %v2559_v55 = vmul.f32 %v2551_v52, %v6808_v2 }
 0x3fd   :  { %v2555_v26 = vmul.f32 %v2551_v52, %v8453_v8  ;;  %v2556_v48 = vmul.f32 %v2551_v52, %v8454_v24  ;;  %v2557_v45 = vmul.f32 %v2551_v52, %v8455_v46  ;;  %v2558_v50 = vmul.f32 %v2551_v52, %v8401_v40  ;;  %v3230_v52 = vld [vmem:[%s7709_s10 + $0x48] sm:$0x7] }
 0x3fe   :  { %v2549_v9 = vadd.f32 %v2541_v62, %v2531_v33  ;;  %v2560_v35 = vadd.f32 %v2552_v36, %v2542_v17  ;;  %v2561_v13 = vadd.f32 %v2553_v53, %v2543_v61  ;;  %v2562_v25 = vadd.f32 %v2554_v5, %v2544_v38  ;;  %3782 = vmatpush.msk.msra.mxu3 %vm3239_vm11, %v3230_v52  ;;  %v8501_v53 = vld [vmem:[#allocation64_spill] sm:$0xff]  ;;  %v8502_v17 = vld [vmem:[#allocation26_spill] sm:$0xff] }
 0x3ff   :  { %v2563_v14 = vadd.f32 %v2555_v26, %v2545_v30  ;;  %v2564_v28 = vadd.f32 %v2556_v48, %v2546_v0  ;;  %v2565_v12 = vadd.f32 %v2557_v45, %v2547_v58  ;;  %v2566_v57 = vadd.f32 %v2558_v50, %v2548_v34  ;;  %v3227_v61 = vld [vmem:[%s7709_s10 + $0x30] sm:$0xff]  ;;  %v3226_v48 = vld [vmem:[%s7709_s10 + $0x28] sm:$0xff] }
 0x400   :  { %v2567_v18 = vadd.f32 %v2559_v55, %v2549_v9  ;;  %v7460_v19 = vmax.f32 %v2514_v15, %v2560_v35  ;;  %v7462_v31 = vmax.f32 %v2515_v59, %v2561_v13  ;;  %v7464_v49 = vmax.f32 %v2516_v37, %v2562_v25 }
 0x401   :  { %v7469_v33 = vmax.f32 %v2517_v21, %v2563_v14  ;;  %v7471_v62 = vmax.f32 %v2518_v56, %v2564_v28  ;;  %v7473_v38 = vmax.f32 %v2519_v47, %v2565_v12  ;;  %v7475_v30 = vmax.f32 %v2520_v7, %v2566_v57  ;;  %v3229_v21 = vld [vmem:[%s7709_s10 + $0x40] sm:$0xff] }
 0x402   :  { %v2581_v15 = vmul.f32 %v8498_v39, %v8458_v1  ;;  %v2582_v59 = vmul.f32 %v8498_v39, %v8431_v51  ;;  %v2587_v37 = vstv %s7446_s6  ;;  %v2583_v56 = vmul.f32 %v8498_v39, %v6499_v43  ;;  %v3228_v43 = vld [vmem:[%s7709_s10 + $0x38] sm:$0xff]  ;;  %3250 = vmatpush.msra.mxu3 %v3229_v21  ;;  %v3302_v21 = vld [vmem:[%s7711_s12 + $0x130] sm:$0x7] }
 0x403   :  { %v2588_v47 = vmul.f32 %v2587_v37, %v8461_v29  ;;  %v2589_v7 = vmul.f32 %v2587_v37, %v8463_v41  ;;  %v2590_v0 = vmul.f32 %v2587_v37, %v8464_v42  ;;  %v2584_v51 = vmul.f32 %v8498_v39, %v6862_v27  ;;  %3788 = vmatpush.msk.msrb.mxu1 %vm3239_vm11, %v3302_v21  ;;  %v3431_v21 = vld [vmem:[#allocation5 + $0xb0] sm:$0xff] }
 0x404   :  { %v2591_v1 = vmul.f32 %v2587_v37, %v8465_v16  ;;  %v2592_v58 = vmul.f32 %v2587_v37, %v8435_v4  ;;  %v2605_v34 = vstv %s7454_s27  ;;  %v2585_v29 = vmul.f32 %v8498_v39, %v6514_v44  ;;  %3251 = vmatpush.msra.mxu3 %v3228_v43  ;;  %v3295_v43 = vld [vmem:[%s7711_s12 + $0xf8] sm:$0xff] }
 0x405   :  { %v2593_v41 = vmul.f32 %v2587_v37, %v8437_v63  ;;  %v2594_v42 = vmul.f32 %v2587_v37, %v8438_v23  ;;  %v2598_v36 = vadd.f32 %v2590_v0, %v2580_v60  ;;  %v2596_v27 = vadd.f32 %v2588_v47, %v8501_v53  ;;  %v3303_v47 = vld [vmem:[%s7711_s12 + $0x138] sm:$0x7]  ;;  %v3298_v0 = vld [vmem:[%s7711_s12 + $0x110] sm:$0xff]  ;;  %v3285_v53 = vld [vmem:[%s7711_s12 + $0xa8] sm:$0xff] }
 0x406   :  { %v2597_v16 = vadd.f32 %v2589_v7, %v8502_v17  ;;  %v2599_v11 = vadd.f32 %v2591_v1, %v2581_v15  ;;  %v2600_v4 = vadd.f32 %v2592_v58, %v2582_v59  ;;  %v2606_v55 = vmul.f32 %v2605_v34, %v8448_v20  ;;  %3252 = vmatpush.msra.mxu3 %v3227_v61  ;;  %v3221_v59 = vld [vmem:[%s7709_s10] sm:$0xff]  ;;  %v3297_v7 = vld [vmem:[%s7711_s12 + $0x108] sm:$0xff]  ;;  %v3286_v17 = vld [vmem:[%s7711_s12 + $0xb0] sm:$0xff] }
 0x407   :  { %v2601_v5 = vadd.f32 %v2593_v41, %v2583_v56  ;;  %v2607_v44 = vmul.f32 %v2605_v34, %v8451_v6  ;;  %v2608_v63 = vmul.f32 %v2605_v34, %v8452_v10  ;;  %v2595_v23 = vmul.f32 %v2587_v37, %v8439_v54  ;;  %v3301_v37 = vld [vmem:[%s7711_s12 + $0x128] sm:$0x7]  ;;  %v3300_v56 = vld [vmem:[%s7711_s12 + $0x120] sm:$0x7]  ;;  %3790 = vmatpush.msk.msrb.mxu2 %vm3239_vm11, %v3303_v47  ;;  %v3282_v61 = vld [vmem:[%s7711_s12 + $0x90] sm:$0xff] }
 0x408   :  { %v2602_v39 = vadd.f32 %v2594_v42, %v2584_v51  ;;  %v2609_v60 = vmul.f32 %v2605_v34, %v8453_v8  ;;  %v2610_v26 = vmul.f32 %v2605_v34, %v8454_v24  ;;  %v2611_v45 = vmul.f32 %v2605_v34, %v8455_v46  ;;  %v3225_v8 = vld [vmem:[%s7709_s10 + $0x20] sm:$0xff]  ;;  %3253 = vmatpush.msra.mxu3 %v3226_v48  ;;  %v3299_v51 = vld [vmem:[%s7711_s12 + $0x118] sm:$0xff]  ;;  %v3293_v58 = vld [vmem:[%s7711_s12 + $0xe8] sm:$0xff] }
 0x409   :  { %v2614_v50 = vadd.f32 %v2606_v55, %v2596_v27  ;;  %v2615_v20 = vadd.f32 %v2607_v44, %v2597_v16  ;;  %v2616_v9 = vadd.f32 %v2608_v63, %v2598_v36  ;;  %v2612_v6 = vmul.f32 %v2605_v34, %v8401_v40  ;;  %3786 = vmatpush.msk.msrb.mxu0 %vm3239_vm11, %v3301_v37  ;;  %v3296_v1 = vld [vmem:[%s7711_s12 + $0x100] sm:$0xff]  ;;  %v3290_v42 = vld [vmem:[%s7711_s12 + $0xd0] sm:$0xff]  ;;  %v3291_v36 = vld [vmem:[%s7711_s12 + $0xd8] sm:$0xff] }
 0x40a   :  { %v2613_v10 = vmul.f32 %v2605_v34, %v6808_v2  ;;  %v2617_v54 = vadd.f32 %v2609_v60, %v2599_v11  ;;  %v2618_v35 = vadd.f32 %v2610_v26, %v2600_v4  ;;  %v2619_v24 = vadd.f32 %v2611_v45, %v2601_v5  ;;  %3254 = vmatpush.msra.mxu3 %v3225_v8  ;;  %v3294_v34 = vld [vmem:[%s7711_s12 + $0xf0] sm:$0xff]  ;;  %v3292_v41 = vld [vmem:[%s7711_s12 + $0xe0] sm:$0xff]  ;;  %v3287_v16 = vld [vmem:[%s7711_s12 + $0xb8] sm:$0xff] }
 0x40b   :  { %v2622_v13 = vmax.f32 %v7460_v19, %v2614_v50  ;;  %v2623_v25 = vmax.f32 %v7462_v31, %v2615_v20  ;;  %v2624_v46 = vmax.f32 %v7464_v49, %v2616_v9  ;;  %v2575_v40 = vmax.f32 %v2521_v22, %v2567_v18  ;;  %3356 = vmatpush.msrb.mxu0 %v3297_v7  ;;  %v3288_v27 = vld [vmem:[%s7711_s12 + $0xc0] sm:$0xff]  ;;  %v3281_v11 = vld [vmem:[%s7711_s12 + $0x88] sm:$0xff]  ;;  %v3283_v5 = vld [vmem:[%s7711_s12 + $0x98] sm:$0xff] }
 0x40c   :  { %v2620_v14 = vadd.f32 %v2612_v6, %v2602_v39  ;;  %v2626_v2 = vmax.f32 %v7471_v62, %v2618_v35  ;;  %v2603_v28 = vadd.f32 %v2595_v23, %v2585_v29  ;;  %v2625_v12 = vmax.f32 %v7469_v33, %v2617_v54  ;;  %v3224_v62 = vld [vmem:[%s7709_s10 + $0x18] sm:$0xff]  ;;  %3376 = vmatpush.msrb.mxu1 %v3298_v0  ;;  %v3289_v29 = vld [vmem:[%s7711_s12 + $0xc8] sm:$0xff]  ;;  %v3284_v4 = vld [vmem:[%s7711_s12 + $0xa0] sm:$0xff] }
 0x40d   :  { %v2627_v57 = vmax.f32 %v7473_v38, %v2619_v24  ;;  %v3085_v52 = vsel %vm3062_vm4, %v2623_v25, %v2622_v13  ;;  %v3223_v38 = vld [vmem:[%s7709_s10 + $0x10] sm:$0xff]  ;;  %3255 = vmatpush.msra.mxu3 %v3224_v62  ;;  %3396 = vmatpush.msrb.mxu2 %v3299_v51  ;;  %v3277_v55 = vld [vmem:[%s7711_s12 + $0x68] sm:$0xff]  ;;  %v3280_v44 = vld [vmem:[%s7711_s12 + $0x80] sm:$0xff] }
 0x40e   :  { %v2628_v19 = vmax.f32 %v7475_v30, %v2620_v14  ;;  %v3086_v31 = vsel %vm3064_vm5, %v2624_v46, %v3085_v52  ;;  %v2621_v49 = vadd.f32 %v2613_v10, %v2603_v28  ;;  %v3222_v30 = vld [vmem:[%s7709_s10 + $0x8] sm:$0xff]  ;;  %3357 = vmatpush.msrb.mxu0 %v3293_v58  ;;  %3377 = vmatpush.msrb.mxu1 %v3294_v34  ;;  %v3278_v63 = vld [vmem:[%s7711_s12 + $0x70] sm:$0xff]  ;;  %v3279_v23 = vld [vmem:[%s7711_s12 + $0x78] sm:$0xff] }
 0x40f   :  { %v3087_v15 = vsel %vm3066_vm6, %v2625_v12, %v3086_v31  ;;  %3256 = vmatpush.msra.mxu3 %v3223_v38  ;;  %3397 = vmatpush.msrb.mxu2 %v3295_v43  ;;  %v3276_v39 = vld [vmem:[%s7711_s12 + $0x60] sm:$0xff]  ;;  %v3273_v10 = vld [vmem:[%s7711_s12 + $0x48] sm:$0xff]  ;;  %v3274_v54 = vld [vmem:[%s7711_s12 + $0x50] sm:$0xff] }
 0x410   :  { %v3088_v32 = vsel %vm3068_vm7, %v2626_v2, %v3087_v15  ;;  %v2629_v3 = vmax.f32 %v2575_v40, %v2621_v49  ;;  %3358 = vmatpush.msrb.mxu0 %v3289_v29  ;;  %3378 = vmatpush.msrb.mxu1 %v3290_v42  ;;  %v3862_v60 = vld [vmem:[%s7708_s9] ss:$0 sm:$0xff]  ;;  %v3275_v35 = vld [vmem:[%s7711_s12 + $0x58] sm:$0xff]  ;;  %v3269_v24 = vld [vmem:[%s7711_s12 + $0x28] sm:$0xff] }
 0x411   :  { %v3089_v22 = vsel %vm3070_vm8, %v2627_v57, %v3088_v32  ;;  %3257 = vmatpush.msra.mxu3 %v3222_v30  ;;  %3398 = vmatpush.msrb.mxu2 %v3291_v36  ;;  %v3272_v6 = vld [vmem:[%s7711_s12 + $0x40] sm:$0xff]  ;;  %v3270_v13 = vld [vmem:[%s7711_s12 + $0x30] sm:$0xff]  ;;  %v3271_v25 = vld [vmem:[%s7711_s12 + $0x38] sm:$0xff] }
 0x412   :  { %v3090_v18 = vsel %vm3072_vm9, %v2628_v19, %v3089_v22  ;;  %3359 = vmatpush.msrb.mxu0 %v3285_v53  ;;  %3379 = vmatpush.msrb.mxu1 %v3286_v17  ;;  %v3268_v8 = vld [vmem:[%s7711_s12 + $0x20] sm:$0xff]  ;;  %v3265_v40 = vld [vmem:[%s7711_s12 + $0x8] sm:$0xff]  ;;  %v3266_v14 = vld [vmem:[%s7711_s12 + $0x10] sm:$0xff] }
 0x413   :  { %v3091_v33 = vsel %vm3074_vm10, %v2629_v3, %v3090_v18  ;;  %3258 = vmatpush.msra.mxu3 %v3221_v59  ;;  %3399 = vmatpush.msrb.mxu2 %v3287_v16  ;;  %v3264_v46 = vld [vmem:[%s7711_s12] sm:$0xff]  ;;  %v3267_v2 = vld [vmem:[%s7711_s12 + $0x18] sm:$0xff]  ;;  %v3471_v28 = vld [vmem:[#allocation5 + $0x1f0] sm:$0xff] }
 0x414   :  { %3197 = vmatmul.f32.vlgmr.msra.gmra.mxu1 %v3091_v33  ;;  %3360 = vmatpush.msrb.mxu0 %v3281_v11  ;;  %v3218_v50 = vpop.f32.mrf.mxu2  ;;  %v3503_v12 = vld [vmem:[#allocation5 + $0x2f0] sm:$0xff]  ;;  %v3469_v57 = vld [vmem:[#allocation5 + $0x1e0] sm:$0xff] }
 0x415   :  { %3784 = vmatpush.msk.msrb.mxu3 %vm3239_vm11, %v3300_v56  ;;  %3380 = vmatpush.msrb.mxu1 %v3282_v61  ;;  %v3501_v52 = vld [vmem:[#allocation5 + $0x2e0] sm:$0xff]  ;;  %v3439_v19 = vld [vmem:[#allocation5 + $0xf0] sm:$0xff] }
 0x416   :  { %3400 = vmatpush.msrb.mxu2 %v3283_v5  ;;  %3361 = vmatpush.msrb.mxu0 %v3277_v55  ;;  %v3535_v31 = vld [vmem:[#allocation5 + $0x3f0] sm:$0xff]  ;;  %v3437_v49 = vld [vmem:[#allocation5 + $0xe0] sm:$0xff] }
 0x417   :  { %3336 = vmatpush.msrb.mxu3 %v3296_v1  ;;  %3381 = vmatpush.msrb.mxu1 %v3278_v63  ;;  %v3467_v15 = vld [vmem:[#allocation5 + $0x1d0] sm:$0xff]  ;;  %v3533_v3 = vld [vmem:[#allocation5 + $0x3e0] sm:$0xff] }
 0x418   :  { %3401 = vmatpush.msrb.mxu2 %v3279_v23  ;;  %3362 = vmatpush.msrb.mxu0 %v3273_v10  ;;  %v3499_v32 = vld [vmem:[#allocation5 + $0x2d0] sm:$0xff]  ;;  %v3465_v33 = vld [vmem:[#allocation5 + $0x1c0] sm:$0xff] }
 0x419   :  { %3337 = vmatpush.msrb.mxu3 %v3292_v41  ;;  %3382 = vmatpush.msrb.mxu1 %v3274_v54  ;;  %v3435_v22 = vld [vmem:[#allocation5 + $0xd0] sm:$0xff]  ;;  %v3497_v62 = vld [vmem:[#allocation5 + $0x2c0] sm:$0xff] }
 0x41a   :  { %3402 = vmatpush.msrb.mxu2 %v3275_v35  ;;  %3363 = vmatpush.msrb.mxu0 %v3269_v24  ;;  %v3531_v18 = vld [vmem:[#allocation5 + $0x3d0] sm:$0xff]  ;;  %v3433_v38 = vld [vmem:[#allocation5 + $0xc0] sm:$0xff] }
 0x41b   :  { %3338 = vmatpush.msrb.mxu3 %v3288_v27  ;;  %3383 = vmatpush.msrb.mxu1 %v3270_v13  ;;  %v3529_v30 = vld [vmem:[#allocation5 + $0x3c0] sm:$0xff]  ;;  %v3463_v59 = vld [vmem:[#allocation5 + $0x1b0] sm:$0xff] }
 0x41c   :  { %3403 = vmatpush.msrb.mxu2 %v3271_v25  ;;  %3364 = vmatpush.msrb.mxu0 %v3265_v40  ;;  %v3495_v37 = vld [vmem:[#allocation5 + $0x2b0] sm:$0xff]  ;;  %v3461_v47 = vld [vmem:[#allocation5 + $0x1a0] sm:$0xff] }
 0x41d   :  { %3339 = vmatpush.msrb.mxu3 %v3284_v4  ;;  %3384 = vmatpush.msrb.mxu1 %v3266_v14  ;;  %v3527_v56 = vld [vmem:[#allocation5 + $0x3b0] sm:$0xff]  ;;  %v3493_v7 = vld [vmem:[#allocation5 + $0x2a0] sm:$0xff] }
 0x41e   :  { %3404 = vmatpush.msrb.mxu2 %v3267_v2  ;;  %3563 = vmatpush.msra.mxu0 %v3471_v28  ;;  %v3429_v0 = vld [vmem:[#allocation5 + $0xa0] sm:$0xff]  ;;  %v3459_v1 = vld [vmem:[#allocation5 + $0x190] sm:$0xff]  ;;  %v3472_v28 = vld [vmem:[#allocation5 + $0x1f8] sm:$0xff] }
 0x41f   :  { %3340 = vmatpush.msrb.mxu3 %v3280_v44  ;;  %3583 = vmatpush.msra.mxu1 %v3503_v12  ;;  %v3525_v51 = vld [vmem:[#allocation5 + $0x3a0] sm:$0xff]  ;;  %v3491_v58 = vld [vmem:[#allocation5 + $0x290] sm:$0xff]  ;;  %v3504_v12 = vld [vmem:[#allocation5 + $0x2f8] sm:$0xff] }
 0x420   :  { %3603 = vmatpush.msra.mxu2 %v3535_v31  ;;  %3564 = vmatpush.msra.mxu0 %v3469_v57  ;;  %v3427_v34 = vld [vmem:[#allocation5 + $0x90] sm:$0xff]  ;;  %v3457_v29 = vld [vmem:[#allocation5 + $0x180] sm:$0xff]  ;;  %v3502_v31 = vld [vmem:[#allocation5 + $0x2e8] sm:$0xff] }
 0x421   :  { %3341 = vmatpush.msrb.mxu3 %v3276_v39  ;;  %3584 = vmatpush.msra.mxu1 %v3501_v52  ;;  %v3523_v43 = vld [vmem:[#allocation5 + $0x390] sm:$0xff]  ;;  %v3489_v41 = vld [vmem:[#allocation5 + $0x280] sm:$0xff] }
 0x422   :  { %3604 = vmatpush.msra.mxu2 %v3533_v3  ;;  %3565 = vmatpush.msra.mxu0 %v3467_v15  ;;  %v3425_v42 = vld [vmem:[#allocation5 + $0x80] sm:$0xff]  ;;  %v3455_v53 = vld [vmem:[#allocation5 + $0x170] sm:$0xff]  ;;  %v3500_v3 = vld [vmem:[#allocation5 + $0x2d8] sm:$0xff] }
 0x423   :  { %3342 = vmatpush.msrb.mxu3 %v3272_v6  ;;  %3585 = vmatpush.msra.mxu1 %v3499_v32  ;;  %v3521_v36 = vld [vmem:[#allocation5 + $0x380] sm:$0xff]  ;;  %v3487_v27 = vld [vmem:[#allocation5 + $0x270] sm:$0xff]  ;;  %v3468_v32 = vld [vmem:[#allocation5 + $0x1d8] sm:$0xff] }
 0x424   :  { %3605 = vmatpush.msra.mxu2 %v3531_v18  ;;  %3566 = vmatpush.msra.mxu0 %v3465_v33  ;;  %v3423_v17 = vld [vmem:[#allocation5 + $0x70] sm:$0xff]  ;;  %v3453_v11 = vld [vmem:[#allocation5 + $0x160] sm:$0xff]  ;;  %v3536_v18 = vld [vmem:[#allocation5 + $0x3f8] sm:$0xff] }
 0x425   :  { %3343 = vmatpush.msrb.mxu3 %v3268_v8  ;;  %3586 = vmatpush.msra.mxu1 %v3497_v62  ;;  %v3519_v16 = vld [vmem:[#allocation5 + $0x370] sm:$0xff]  ;;  %v3485_v4 = vld [vmem:[#allocation5 + $0x260] sm:$0xff]  ;;  %v3466_v33 = vld [vmem:[#allocation5 + $0x1c8] sm:$0xff] }
 0x426   :  { %3606 = vmatpush.msra.mxu2 %v3529_v30  ;;  %3567 = vmatpush.msra.mxu0 %v3463_v59  ;;  %v3421_v61 = vld [vmem:[#allocation5 + $0x60] sm:$0xff]  ;;  %v3451_v55 = vld [vmem:[#allocation5 + $0x150] sm:$0xff]  ;;  %v3498_v62 = vld [vmem:[#allocation5 + $0x2c8] sm:$0xff] }
 0x427   :  { %3344 = vmatpush.msrb.mxu3 %v3264_v46  ;;  %3587 = vmatpush.msra.mxu1 %v3495_v37  ;;  %v3517_v5 = vld [vmem:[#allocation5 + $0x360] sm:$0xff]  ;;  %v3483_v44 = vld [vmem:[#allocation5 + $0x250] sm:$0xff]  ;;  %v3534_v30 = vld [vmem:[#allocation5 + $0x3e8] sm:$0xff] }
 0x428   :  { %3607 = vmatpush.msra.mxu2 %v3527_v56  ;;  %3568 = vmatpush.msra.mxu0 %v3461_v47  ;;  %v3419_v63 = vld [vmem:[#allocation5 + $0x50] sm:$0xff]  ;;  %v3863_v39 = vld [vmem:[%s7710_s11] ss:$0 sm:$0xff]  ;;  %v3464_v59 = vld [vmem:[#allocation5 + $0x1b8] sm:$0xff] }
 0x429   :  { %3588 = vmatpush.msra.mxu1 %v3493_v7  ;;  %v3515_v23 = vld [vmem:[#allocation5 + $0x350] sm:$0xff]  ;;  %v3445_v35 = vld [vmem:[#allocation5 + $0x120] sm:$0xff]  ;;  %v3496_v37 = vld [vmem:[#allocation5 + $0x2b8] sm:$0xff] }
 0x42a   :  { %3608 = vmatpush.msra.mxu2 %v3525_v51  ;;  %3569 = vmatpush.msra.mxu0 %v3459_v1  ;;  %v3415_v6 = vld [vmem:[#allocation5 + $0x30] sm:$0xff]  ;;  %v3477_v8 = vld [vmem:[#allocation5 + $0x220] sm:$0xff]  ;;  %v3532_v56 = vld [vmem:[#allocation5 + $0x3d8] sm:$0xff] }
 0x42b   :  { %3589 = vmatpush.msra.mxu1 %v3491_v58  ;;  %v3511_v10 = vld [vmem:[#allocation5 + $0x330] sm:$0xff]  ;;  %v3413_v46 = vld [vmem:[#allocation5 + $0x20] sm:$0xff]  ;;  %v3462_v47 = vld [vmem:[#allocation5 + $0x1a8] sm:$0xff] }
 0x42c   :  { %3609 = vmatpush.msra.mxu2 %v3523_v43  ;;  %3570 = vmatpush.msra.mxu0 %v3457_v29  ;;  %v3443_v13 = vld [vmem:[#allocation5 + $0x110] sm:$0xff]  ;;  %v3509_v40 = vld [vmem:[#allocation5 + $0x320] sm:$0xff]  ;;  %v3494_v7 = vld [vmem:[#allocation5 + $0x2a8] sm:$0xff] }
 0x42d   :  { %3590 = vmatpush.msra.mxu1 %v3489_v41  ;;  %v3475_v25 = vld [vmem:[#allocation5 + $0x210] sm:$0xff]  ;;  %v3441_v14 = vld [vmem:[#allocation5 + $0x100] sm:$0xff]  ;;  %v3530_v51 = vld [vmem:[#allocation5 + $0x3c8] sm:$0xff] }
 0x42e   :  { %3610 = vmatpush.msra.mxu2 %v3521_v36  ;;  %3571 = vmatpush.msra.mxu0 %v3455_v53  ;;  %v3473_v2 = vld [vmem:[#allocation5 + $0x200] sm:$0xff]  ;;  %v3411_v57 = vld [vmem:[#allocation5 + $0x10] sm:$0xff]  ;;  %v3460_v1 = vld [vmem:[#allocation5 + $0x198] sm:$0xff] }
 0x42f   :  { %3591 = vmatpush.msra.mxu1 %v3487_v27  ;;  %v3507_v52 = vld [vmem:[#allocation5 + $0x310] sm:$0xff]  ;;  %v3505_v15 = vld [vmem:[#allocation5 + $0x300] sm:$0xff]  ;;  %v3492_v58 = vld [vmem:[#allocation5 + $0x298] sm:$0xff] }
 0x430   :  { %3611 = vmatpush.msra.mxu2 %v3519_v16  ;;  %3572 = vmatpush.msra.mxu0 %v3453_v11  ;;  %v3528_v43 = vld [vmem:[#allocation5 + $0x3b8] sm:$0xff]  ;;  %v3458_v29 = vld [vmem:[#allocation5 + $0x188] sm:$0xff] }
 0x431   :  { %v3178_v26 = vpop.f32.mrf.mxu0  ;;  %3592 = vmatpush.msra.mxu1 %v3485_v4  ;;  %v3490_v41 = vld [vmem:[#allocation5 + $0x288] sm:$0xff]  ;;  %v3456_v53 = vld [vmem:[#allocation5 + $0x178] sm:$0xff] }
 0x432   :  { %v3179_v48 = vadd.f32 %v3862_v60, %v3178_v26  ;;  %v3449_v60 = vld [vmem:[#allocation5 + $0x140] sm:$0xff]  ;;  %3612 = vmatpush.msra.mxu2 %v3517_v5  ;;  %3573 = vmatpush.msra.mxu0 %v3451_v55  ;;  %v3526_v36 = vld [vmem:[#allocation5 + $0x3a8] sm:$0xff]  ;;  %v3488_v27 = vld [vmem:[#allocation5 + $0x278] sm:$0xff] }
 0x433   :  { %v3481_v26 = vld [vmem:[#allocation5 + $0x240] sm:$0xff]  ;;  %3593 = vmatpush.msra.mxu1 %v3483_v44  ;;  %v3524_v16 = vld [vmem:[#allocation5 + $0x398] sm:$0xff]  ;;  %v3454_v11 = vld [vmem:[#allocation5 + $0x168] sm:$0xff] }
 0x434   :  { %3613 = vmatpush.msra.mxu2 %v3515_v23  ;;  %3574 = vmatpush.msra.mxu0 %v3449_v60  ;;  %v3486_v4 = vld [vmem:[#allocation5 + $0x268] sm:$0xff]  ;;  %v3452_v5 = vld [vmem:[#allocation5 + $0x158] sm:$0xff] }
 0x435   :  { %3594 = vmatpush.msra.mxu1 %v3481_v26  ;;  %v3484_v55 = vld [vmem:[#allocation5 + $0x258] sm:$0xff]  ;;  %v3522_v44 = vld [vmem:[#allocation5 + $0x388] sm:$0xff] }
 0x436   :  { %v3450_v23 = vld [vmem:[#allocation5 + $0x148] sm:$0xff]  ;;  %v3520_v60 = vld [vmem:[#allocation5 + $0x378] sm:$0xff] }
 0x437   :  { %v3422_v26 = vld [vmem:[#allocation5 + $0x68] sm:$0xff] }
 0x491   :  { %v3198_v45 = vpop.f32.mrf.mxu1 }
 0x492   :  { %v3199_v20 = vadd.f32 %v3198_v45, %v3179_v48  ;;  %v3417_v48 = vld [vmem:[#allocation5 + $0x40] sm:$0xff] }
 0x493   :  { %v3513_v45 = vld [vmem:[#allocation5 + $0x340] sm:$0xff] }
 0x494   :  { %v3219_v9 = vadd.f32 %v3218_v50, %v3199_v20  ;;  %v3447_v50 = vld [vmem:[#allocation5 + $0x130] sm:$0xff]  ;;  %3614 = vmatpush.msra.mxu2 %v3513_v45  ;;  %v3480_v45 = vld [vmem:[#allocation5 + $0x238] sm:$0xff] }
 0x495   :  { %v3479_v20 = vld [vmem:[#allocation5 + $0x230] sm:$0xff]  ;;  %3575 = vmatpush.msra.mxu0 %v3447_v50  ;;  %v3518_v50 = vld [vmem:[#allocation5 + $0x368] sm:$0xff] }
 0x496   :  { %3783 = vmatmul.msk.f32.vlgmr.msra.gmra.mxu3 %vm3235_vm12, %v3219_v9  ;;  %3595 = vmatpush.msra.mxu1 %v3479_v20  ;;  %v3420_v20 = vld [vmem:[#allocation5 + $0x58] sm:$0xff] }
 0x497   :  { %3543 = vmatpush.msra.mxu3 %v3439_v19  ;;  %3615 = vmatpush.msra.mxu2 %v3511_v10  ;;  %v3470_v19 = vld [vmem:[#allocation5 + $0x1e8] sm:$0xff]  ;;  %v3516_v10 = vld [vmem:[#allocation5 + $0x358] sm:$0xff] }
 0x498   :  { %3576 = vmatpush.msra.mxu0 %v3445_v35  ;;  %3596 = vmatpush.msra.mxu1 %v3477_v8  ;;  %v3444_v35 = vld [vmem:[#allocation5 + $0x118] sm:$0xff] }
 0x499   :  { %3544 = vmatpush.msra.mxu3 %v3437_v49  ;;  %3616 = vmatpush.msra.mxu2 %v3509_v40  ;;  %v3409_v49 = vld [vmem:[#allocation5] sm:$0xff]  ;;  %v3476_v8 = vld [vmem:[#allocation5 + $0x218] sm:$0xff] }
 0x49a   :  { %3577 = vmatpush.msra.mxu0 %v3443_v13  ;;  %3597 = vmatpush.msra.mxu1 %v3475_v25  ;;  %v3416_v13 = vld [vmem:[#allocation5 + $0x38] sm:$0xff]  ;;  %v3442_v25 = vld [vmem:[#allocation5 + $0x108] sm:$0xff] }
 0x49b   :  { %3545 = vmatpush.msra.mxu3 %v3435_v22  ;;  %3617 = vmatpush.msra.mxu2 %v3507_v52  ;;  %v3440_v22 = vld [vmem:[#allocation5 + $0xf8] sm:$0xff]  ;;  %v3506_v52 = vld [vmem:[#allocation5 + $0x308] sm:$0xff] }
 0x49c   :  { %3578 = vmatpush.msra.mxu0 %v3441_v14  ;;  %3598 = vmatpush.msra.mxu1 %v3473_v2  ;;  %v3512_v40 = vld [vmem:[#allocation5 + $0x338] sm:$0xff]  ;;  %v3414_v14 = vld [vmem:[#allocation5 + $0x28] sm:$0xff] }
 0x49d   :  { %3546 = vmatpush.msra.mxu3 %v3433_v38  ;;  %3618 = vmatpush.msra.mxu2 %v3505_v15  ;;  %v3438_v38 = vld [vmem:[#allocation5 + $0xe8] sm:$0xff] }
 0x49e   :  { %v3510_v2 = vld [vmem:[#allocation5 + $0x328] sm:$0xff] }
 0x49f   :  { %3547 = vmatpush.msra.mxu3 %v3431_v21  ;;  %v3436_v21 = vld [vmem:[#allocation5 + $0xd8] sm:$0xff] }
 0x4a1   :  { %3548 = vmatpush.msra.mxu3 %v3429_v0  ;;  %v3434_v0 = vld [vmem:[#allocation5 + $0xc8] sm:$0xff] }
 0x4a3   :  { %3549 = vmatpush.msra.mxu3 %v3427_v34  ;;  %v3432_v34 = vld [vmem:[#allocation5 + $0xb8] sm:$0xff] }
 0x4a5   :  { %3550 = vmatpush.msra.mxu3 %v3425_v42  ;;  %v3430_v42 = vld [vmem:[#allocation5 + $0xa8] sm:$0xff] }
 0x4a7   :  { %3551 = vmatpush.msra.mxu3 %v3423_v17  ;;  %v3428_v17 = vld [vmem:[#allocation5 + $0x98] sm:$0xff] }
 0x4a9   :  { %3552 = vmatpush.msra.mxu3 %v3421_v61  ;;  %v3426_v61 = vld [vmem:[#allocation5 + $0x88] sm:$0xff] }
 0x4ab   :  { %3553 = vmatpush.msra.mxu3 %v3419_v63  ;;  %v3424_v63 = vld [vmem:[#allocation5 + $0x78] sm:$0xff] }
 0x4ad   :  { %3554 = vmatpush.msra.mxu3 %v3417_v48  ;;  %v3448_v48 = vld [vmem:[#allocation5 + $0x138] sm:$0xff] }
 0x4af   :  { %3555 = vmatpush.msra.mxu3 %v3415_v6  ;;  %v3478_v6 = vld [vmem:[#allocation5 + $0x228] sm:$0xff] }
 0x4b1   :  { %3556 = vmatpush.msra.mxu3 %v3413_v46  ;;  %v3474_v46 = vld [vmem:[#allocation5 + $0x208] sm:$0xff] }
 0x4b3   :  { %3557 = vmatpush.msra.mxu3 %v3411_v57  ;;  %v3410_v57 = vld [vmem:[#allocation5 + $0x8] sm:$0xff] }
 0x4b5   :  { %3558 = vmatpush.msra.mxu3 %v3409_v49 }
 0x519   :  { %v3260_v9 = vpop.f32.mrf.mxu3 }
 0x51a   :  { %v3261_v54 = vadd.f32 %v3863_v39, %v3260_v9  ;;  %v3482_v39 = vld [vmem:[#allocation5 + $0x248] sm:$0xff] }
 0x51b   :  { %v3446_v9 = vld [vmem:[#allocation5 + $0x128] sm:$0xff] }
 0x51c   :  { %v3263_v24 = vmax.f32 %v3261_v54, 0.0  ;;  %v3418_v54 = vld [vmem:[#allocation5 + $0x48] sm:$0xff] }
 0x51e   :  { %3785 = vmatmul.msk.f32.vlgmr.msrb.gmra.mxu3 %vm3235_vm12, %v3263_v24  ;;  %3787 = vmatmul.msk.f32.vlgmr.msrb.gmra.mxu0 %vm3235_vm12, %v3263_v24 }
 0x51f   :  { %3789 = vmatmul.msk.f32.vlgmr.msrb.gmra.mxu1 %vm3235_vm12, %v3263_v24  ;;  %3791 = vmatmul.msk.f32.vlgmr.msrb.gmra.mxu2 %vm3235_vm12, %v3263_v24  ;;  %v3514_v24 = vld [vmem:[#allocation5 + $0x348] sm:$0xff] }
 0x520   :  { %3643 = vmatpush.msrb.mxu0 %v3472_v28  ;;  %3663 = vmatpush.msrb.mxu1 %v3504_v12  ;;  %v3412_v28 = vld [vmem:[#allocation5 + $0x18] sm:$0xff] }
 0x521   :  { %3623 = vmatpush.msrb.mxu3 %v3440_v22  ;;  %3683 = vmatpush.msrb.mxu2 %v3536_v18  ;;  %v3508_v12 = vld [vmem:[#allocation5 + $0x318] sm:$0xff] }
 0x522   :  { %3644 = vmatpush.msrb.mxu0 %v3470_v19  ;;  %3664 = vmatpush.msrb.mxu1 %v3502_v31  ;;  %v3304_v19 = vld [vmem:[%s7712_s13] sm:$0xf] }
 0x523   :  { %3624 = vmatpush.msrb.mxu3 %v3438_v38  ;;  %3684 = vmatpush.msrb.mxu2 %v3534_v30  ;;  %v3307_v31 = vperm.slane %v3304_v19, 1  ;;  %v3308_v49 = vperm.slane %v3304_v19, 2  ;;  %v3306_v18 = vperm.slane %v3304_v19, 0 }
 0x524   :  { %3645 = vmatpush.msrb.mxu0 %v3468_v32  ;;  %3665 = vmatpush.msrb.mxu1 %v3500_v3 }
 0x525   :  { %3625 = vmatpush.msrb.mxu3 %v3436_v21  ;;  %3685 = vmatpush.msrb.mxu2 %v3532_v56 }
 0x526   :  { %3646 = vmatpush.msrb.mxu0 %v3466_v33  ;;  %3666 = vmatpush.msrb.mxu1 %v3498_v62  ;;  %v3309_v33 = vperm.slane %v3304_v19, 3 }
 0x527   :  { %3626 = vmatpush.msrb.mxu3 %v3434_v0  ;;  %3686 = vmatpush.msrb.mxu2 %v3530_v51 }
 0x528   :  { %3647 = vmatpush.msrb.mxu0 %v3464_v59  ;;  %3667 = vmatpush.msrb.mxu1 %v3496_v37  ;;  %v3537_v37 = vld [vmem:[%s7714_s15] sm:$0x3] }
 0x529   :  { %3627 = vmatpush.msrb.mxu3 %v3432_v34  ;;  %3687 = vmatpush.msrb.mxu2 %v3528_v43  ;;  %v3539_v21 = vperm.slane %v3537_v37, 0  ;;  %v3540_v34 = vperm.slane %v3537_v37, 1 }
 0x52a   :  { %3648 = vmatpush.msrb.mxu0 %v3462_v47  ;;  %3668 = vmatpush.msrb.mxu1 %v3494_v7 }
 0x52b   :  { %3628 = vmatpush.msrb.mxu3 %v3430_v42  ;;  %3688 = vmatpush.msrb.mxu2 %v3526_v36 }
 0x52c   :  { %3649 = vmatpush.msrb.mxu0 %v3460_v1  ;;  %3669 = vmatpush.msrb.mxu1 %v3492_v58 }
 0x52d   :  { %3629 = vmatpush.msrb.mxu3 %v3428_v17  ;;  %3689 = vmatpush.msrb.mxu2 %v3524_v16 }
 0x52e   :  { %3650 = vmatpush.msrb.mxu0 %v3458_v29  ;;  %3670 = vmatpush.msrb.mxu1 %v3490_v41 }
 0x52f   :  { %3630 = vmatpush.msrb.mxu3 %v3426_v61  ;;  %3690 = vmatpush.msrb.mxu2 %v3522_v44 }
 0x530   :  { %3651 = vmatpush.msrb.mxu0 %v3456_v53  ;;  %3671 = vmatpush.msrb.mxu1 %v3488_v27 }
 0x531   :  { %3631 = vmatpush.msrb.mxu3 %v3424_v63  ;;  %3691 = vmatpush.msrb.mxu2 %v3520_v60 }
 0x532   :  { %3652 = vmatpush.msrb.mxu0 %v3454_v11  ;;  %3672 = vmatpush.msrb.mxu1 %v3486_v4 }
 0x533   :  { %3632 = vmatpush.msrb.mxu3 %v3422_v26  ;;  %3692 = vmatpush.msrb.mxu2 %v3518_v50 }
 0x534   :  { %3653 = vmatpush.msrb.mxu0 %v3452_v5  ;;  %3673 = vmatpush.msrb.mxu1 %v3484_v55 }
 0x535   :  { %3633 = vmatpush.msrb.mxu3 %v3420_v20  ;;  %3693 = vmatpush.msrb.mxu2 %v3516_v10 }
 0x536   :  { %3654 = vmatpush.msrb.mxu0 %v3450_v23  ;;  %3674 = vmatpush.msrb.mxu1 %v3482_v39 }
 0x537   :  { %3634 = vmatpush.msrb.mxu3 %v3418_v54  ;;  %3694 = vmatpush.msrb.mxu2 %v3514_v24 }
 0x538   :  { %3655 = vmatpush.msrb.mxu0 %v3448_v48  ;;  %3675 = vmatpush.msrb.mxu1 %v3480_v45 }
 0x539   :  { %3635 = vmatpush.msrb.mxu3 %v3416_v13  ;;  %3695 = vmatpush.msrb.mxu2 %v3512_v40 }
 0x53a   :  { %3656 = vmatpush.msrb.mxu0 %v3446_v9  ;;  %3676 = vmatpush.msrb.mxu1 %v3478_v6 }
 0x53b   :  { %3636 = vmatpush.msrb.mxu3 %v3414_v14  ;;  %3696 = vmatpush.msrb.mxu2 %v3510_v2 }
 0x53c   :  { %3657 = vmatpush.msrb.mxu0 %v3444_v35  ;;  %3677 = vmatpush.msrb.mxu1 %v3476_v8 }
 0x53d   :  { %3637 = vmatpush.msrb.mxu3 %v3412_v28  ;;  %3697 = vmatpush.msrb.mxu2 %v3508_v12 }
 0x53e   :  { %3658 = vmatpush.msrb.mxu0 %v3442_v25  ;;  %3678 = vmatpush.msrb.mxu1 %v3474_v46 }
 0x53f   :  { %3638 = vmatpush.msrb.mxu3 %v3410_v57  ;;  %3698 = vmatpush.msrb.mxu2 %v3506_v52 }
 0x59b   :  { %v3366_v15 = vpop.f32.mrf.mxu0 }
 0x59c   :  { %v3367_v32 = vadd.f32 %v3366_v15, %v3307_v31  ;;  %v3386_v3 = vpop.f32.mrf.mxu1 }
 0x59d   :  { %v3387_v22 = vadd.f32 %v3386_v3, %v3308_v49 }
 0x59e   :  { %3579 = vmatmul.f32.vlgmr.msra.gmra.mxu0 %v3367_v32 }
 0x59f   :  { %3599 = vmatmul.f32.vlgmr.msra.gmra.mxu1 %v3387_v22 }
 0x5a1   :  { %v3346_v62 = vpop.f32.mrf.mxu3 }
 0x5a2   :  { %v3347_v38 = vadd.f32 %v3346_v62, %v3306_v18  ;;  %v3406_v30 = vpop.f32.mrf.mxu2 }
 0x5a3   :  { %v3407_v59 = vadd.f32 %v3406_v30, %v3309_v33 }
 0x5a4   :  { %3559 = vmatmul.f32.vlgmr.msra.gmra.mxu3 %v3347_v38 }
 0x5a5   :  { %3619 = vmatmul.f32.vlgmr.msra.gmra.mxu2 %v3407_v59 }
 0x5a6   :  { %3659 = vmatmul.f32.vlgmr.msrb.gmra.mxu0 %v3367_v32 }
 0x5a7   :  { %3679 = vmatmul.f32.vlgmr.msrb.gmra.mxu1 %v3387_v22 }
 0x5ac   :  { %3639 = vmatmul.f32.vlgmr.msrb.gmra.mxu3 %v3347_v38 }
 0x5ad   :  { %3699 = vmatmul.f32.vlgmr.msrb.gmra.mxu2 %v3407_v59 }
 0x61b   :  { %v3580_v56 = vpop.f32.mrf.mxu0 }
 0x61c   :  { %v3600_v0 = vpop.f32.mrf.mxu1 }
 0x623   :  { %v3660_v42 = vpop.f32.mrf.mxu0 }
 0x624   :  { %v3680_v53 = vpop.f32.mrf.mxu1 }
 0x627   :  { %v3560_v47 = vpop.f32.mrf.mxu3 }
 0x628   :  { %v3561_v7 = vadd.f32 %v3560_v47, %v3539_v21  ;;  %v3620_v1 = vpop.f32.mrf.mxu2 }
 0x62a   :  { %v3581_v51 = vadd.f32 %v3580_v56, %v3561_v7 }
 0x62c   :  { %v3601_v58 = vadd.f32 %v3600_v0, %v3581_v51 }
 0x62e   :  { %v3621_v43 = vadd.f32 %v3620_v1, %v3601_v58 }
 0x62f   :  { %v3640_v29 = vpop.f32.mrf.mxu3 }
 0x630   :  { %3703 = vst [vmem:[%s7715_s16] sm:$0xff] %v3621_v43  ;;  %v3641_v41 = vadd.f32 %v3640_v29, %v3540_v34  ;;  %v3700_v17 = vpop.f32.mrf.mxu2 }
 0x632   :  { %v3661_v36 = vadd.f32 %v3660_v42, %v3641_v41 }
 0x634   :  { %v3681_v27 = vadd.f32 %v3680_v53, %v3661_v36 }
 0x636   :  { %v3701_v16 = vadd.f32 %v3700_v17, %v3681_v27 }
 0x638   :  { %3704 = vst [vmem:[%s7715_s16 + $0x8] sm:$0xff] %v3701_v16 }
 0x639   :  { %3709 = vsyncpa [#allocation3], 1 }
 0x63a   :  { %3710 = vsyncpa [#allocation4], 1 }

</bundles_post_ra>
